<compile_context>
chip_gen: v7x
topology: tpu7x:2x2x1
jax: 0.10.0
libtpu: 0.0.40
codegen_flags: <defaults>
</compile_context>

<pallas_src>
import numpy as np

import jax
import jax.numpy as jnp
from jax import lax
from jax.experimental import pallas as pl
from jax.experimental.pallas import tpu as pltpu


# --------------------------------------------------------------------------
# Fused kernel
# --------------------------------------------------------------------------
def _lenet_kernel(x_ref, w1_ref, b1_ref, w2_ref, b2_ref,
                  wf1_ref, bf1_ref, wf2_ref, bf2_ref, wf3_ref, bf3_ref,
                  out_ref, p1_ref, c2_ref):
    bb = x_ref.shape[0]  # batch tile

    def bdot(lhs, rhs):
        # lhs: [bb, M, K] f32, rhs: [K, N] bf16  ->  [bb, M, N] f32 (MXU, f32 acc)
        rb = jnp.broadcast_to(rhs, (bb,) + rhs.shape)
        return lax.dot_general(
            lhs.astype(jnp.bfloat16), rb,
            dimension_numbers=(((2,), (1,)), ((0,), (0,))),
            preferred_element_type=jnp.float32)

    # ---- conv1 (+bias, ReLU): block-Toeplitz over row-pairs -----------------
    # x_ref: [bb, 16, 192] with lane = 96*t + 3*w + c  (t = row parity in pair)
    # output lane = 168*s + 6*j + o  (s = output row parity, j = col, o = chan)
    z1 = bdot(x_ref[:, 0:14, :], w1_ref[0])
    for dp in range(1, 3):
        z1 = z1 + bdot(x_ref[:, dp:dp + 14, :], w1_ref[dp])
    a1 = jnp.maximum(z1 + b1_ref[...], 0.0)                    # [bb, 14, 336]

    # ---- pool1 (2x2, stride 2): pure lane-sliced maxes ----------------------
    hp = jnp.maximum(a1[:, :, 0:168], a1[:, :, 168:336])        # max over rows
    # max over adjacent columns; valid pooled data sits at lanes 12*jp + o
    p1_ref[...] = jnp.maximum(hp[:, :, 0:162], hp[:, :, 6:168])  # [bb, 14, 162]

    # ---- conv2 (+bias, ReLU): 5 accumulated block-Toeplitz matmuls ----------
    z2 = bdot(p1_ref[:, 0:10, :], w2_ref[0])
    for di in range(1, 5):
        z2 = z2 + bdot(p1_ref[:, di:di + 10, :], w2_ref[di])
    c2_ref[...] = jnp.maximum(z2 + b2_ref[...], 0.0)             # [bb, 10, 160]

    # ---- pool2 + PyTorch (C,H,W) flatten + fc1 ------------------------------
    # The flatten order & the sparse pooled-lane layout are folded into wf1.
    acc = jnp.zeros((bb, 1, 120), jnp.float32)
    for h2 in range(5):
        r0 = c2_ref[:, 2 * h2:2 * h2 + 1, :]
        r1 = c2_ref[:, 2 * h2 + 1:2 * h2 + 2, :]
        hm = jnp.maximum(r0, r1)                                 # [bb, 1, 160]
        wm = jnp.maximum(hm[:, :, 0:144], hm[:, :, 16:160])      # [bb, 1, 144]
        acc = acc + bdot(wm, wf1_ref[h2])
    h1 = jnp.maximum(acc + bf1_ref[...], 0.0)                    # [bb, 1, 120]

    # ---- fc2 (+ReLU), fc3 ---------------------------------------------------
    h2a = jnp.maximum(bdot(h1, wf2_ref[...]) + bf2_ref[...], 0.0)  # [bb, 1, 84]
    out = bdot(h2a, wf3_ref[...]) + bf3_ref[...]                   # [bb, 1, 10]
    out_ref[...] = out.astype(out_ref.dtype)


# --------------------------------------------------------------------------
# One-time (host-side) weight restructuring -- hoisted out of the traced graph
# --------------------------------------------------------------------------
def prepare_params(raw):
    w1 = np.asarray(raw["conv1_w"], np.float32)   # [6, 3, 5, 5]
    b1 = np.asarray(raw["conv1_b"], np.float32)
    w2 = np.asarray(raw["conv2_w"], np.float32)   # [16, 6, 5, 5]
    b2 = np.asarray(raw["conv2_b"], np.float32)
    f1w = np.asarray(raw["fc1_w"], np.float32)    # [120, 400]
    f1b = np.asarray(raw["fc1_b"], np.float32)
    f2w = np.asarray(raw["fc2_w"], np.float32)    # [84, 120]
    f2b = np.asarray(raw["fc2_b"], np.float32)
    f3w = np.asarray(raw["fc3_w"], np.float32)    # [10, 84]
    f3b = np.asarray(raw["fc3_b"], np.float32)

    # conv1: 3 block-Toeplitz mats, input lane 96*t+3*w+c -> output lane 168*s+6*j+o
    W1 = np.zeros((3, 192, 336), np.float32)
    for dp in range(3):
        for s in range(2):
            for t in range(2):
                kh = 2 * dp + t - s
                if not (0 <= kh < 5):
                    continue
                for j in range(28):
                    for kw in range(5):
                        w = j + kw
                        W1[dp,
                           96 * t + 3 * w: 96 * t + 3 * w + 3,
                           168 * s + 6 * j: 168 * s + 6 * j + 6] = w1[:, :, kh, kw].T
    b1_t = np.tile(b1, 2 * 28)[None, None, :]                     # [1, 1, 336]

    # conv2: 5 mats over the pooled sparse-lane layout (lane 12*jp + o1)
    W2 = np.zeros((5, 162, 160), np.float32)
    for di in range(5):
        for j2 in range(10):
            for kw in range(5):
                jp = j2 + kw
                W2[di, 12 * jp: 12 * jp + 6,
                   16 * j2: 16 * j2 + 16] = w2[:, :, di, kw].T
    b2_t = np.tile(b2, 10)[None, None, :]                         # [1, 1, 160]

    # fc1: split per pooled row h2; remap (lane 32*jp2 + o2) -> flatten o2*25+h2*5+jp2
    Wf1 = np.zeros((5, 144, 120), np.float32)
    for h2 in range(5):
        for jp2 in range(5):
            for o2 in range(16):
                Wf1[h2, 32 * jp2 + o2, :] = f1w[:, o2 * 25 + h2 * 5 + jp2]

    bf16 = jnp.bfloat16
    return {
        "w1": jnp.asarray(W1, bf16), "b1": jnp.asarray(b1_t, jnp.float32),
        "w2": jnp.asarray(W2, bf16), "b2": jnp.asarray(b2_t, jnp.float32),
        "wf1": jnp.asarray(Wf1, bf16), "bf1": jnp.asarray(f1b[None, None, :], jnp.float32),
        "wf2": jnp.asarray(f2w.T, bf16), "bf2": jnp.asarray(f2b[None, None, :], jnp.float32),
        "wf3": jnp.asarray(f3w.T, bf16), "bf3": jnp.asarray(f3b[None, None, :], jnp.float32),
    }


# --------------------------------------------------------------------------
# Forward wrapper (single pallas_call)
# --------------------------------------------------------------------------
def lenet_forward(x_nchw, p):
    B = x_nchw.shape[0]
    # NCHW -> NHWC -> row-pair layout [B, 16, 192]; lane = 96*(h%2) + 3*w + c
    x = jnp.transpose(x_nchw.astype(jnp.float32), (0, 2, 3, 1)).reshape(B, 16, 192)

    b_blk = min(B, 8)
    n_blk = (B + b_blk - 1) // b_blk
    Bp = n_blk * b_blk
    if Bp != B:
        x = jnp.pad(x, ((0, Bp - B), (0, 0), (0, 0)))

    def full(shape):
        n = len(shape)
        return pl.BlockSpec(shape, lambda i, n=n: (0,) * n)

    flops = 2 * Bp * (3 * 14 * 192 * 336 + 5 * 10 * 162 * 160
                      + 5 * 144 * 120 + 120 * 84 + 84 * 10)
    param_bytes = sum(int(v.size) * v.dtype.itemsize for v in p.values())
    bytes_accessed = int(x.size) * 4 + param_bytes + Bp * 10 * 4

    out = pl.pallas_call(
        _lenet_kernel,
        out_shape=jax.ShapeDtypeStruct((Bp, 1, 10), jnp.float32),
        grid=(n_blk,),
        in_specs=[
            pl.BlockSpec((b_blk, 16, 192), lambda i: (i, 0, 0)),
            full(p["w1"].shape), full(p["b1"].shape),
            full(p["w2"].shape), full(p["b2"].shape),
            full(p["wf1"].shape), full(p["bf1"].shape),
            full(p["wf2"].shape), full(p["bf2"].shape),
            full(p["wf3"].shape), full(p["bf3"].shape),
        ],
        out_specs=pl.BlockSpec((b_blk, 1, 10), lambda i: (i, 0, 0)),
        scratch_shapes=[
            pltpu.VMEM((b_blk, 14, 162), jnp.float32),   # pooled conv1 activations
            pltpu.VMEM((b_blk, 10, 160), jnp.float32),   # conv2 activations
        ],
        compiler_params=pltpu.CompilerParams(
            dimension_semantics=("parallel",)),
        cost_estimate=pl.CostEstimate(
            flops=flops, transcendentals=0, bytes_accessed=bytes_accessed),
    )(x, p["w1"], p["b1"], p["w2"], p["b2"],
      p["wf1"], p["bf1"], p["wf2"], p["bf2"], p["wf3"], p["bf3"])

    return out[:B, 0, :]


# --------------------------------------------------------------------------
# Deterministic synthetic parameters (PyTorch nn.Module layouts)
# --------------------------------------------------------------------------
def init_raw_params(key):
    ks = jax.random.split(key, 10)
    s = 0.1
    return {
        "conv1_w": s * jax.random.normal(ks[0], (6, 3, 5, 5), jnp.float32),
        "conv1_b": s * jax.random.normal(ks[1], (6,), jnp.float32),
        "conv2_w": s * jax.random.normal(ks[2], (16, 6, 5, 5), jnp.float32),
        "conv2_b": s * jax.random.normal(ks[3], (16,), jnp.float32),
        "fc1_w": s * jax.random.normal(ks[4], (120, 400), jnp.float32),
        "fc1_b": s * jax.random.normal(ks[5], (120,), jnp.float32),
        "fc2_w": s * jax.random.normal(ks[6], (84, 120), jnp.float32),
        "fc2_b": s * jax.random.normal(ks[7], (84,), jnp.float32),
        "fc3_w": s * jax.random.normal(ks[8], (10, 84), jnp.float32),
        "fc3_b": s * jax.random.normal(ks[9], (10,), jnp.float32),
    }


if __name__ == "__main__":
    key = jax.random.PRNGKey(0)
    k_x, k_p = jax.random.split(key)
    # LeNet's fc1 (16*5*5) implies 32x32 spatial input; batch kept small.
    x = jax.random.normal(k_x, (2, 3, 32, 32), jnp.float32)

    raw = init_raw_params(k_p)
    params = prepare_params(raw)          # one-time weight restructuring (host)

    fwd = jax.jit(lenet_forward)
    out = jax.block_until_ready(fwd(x, params))
    assert out.shape == (2, 10) and out.dtype == jnp.float32
    print("KERNEL_OK")
</pallas_src>

<mosaic_0001>
module attributes {stable_mosaic.version = 11 : i64} {
  func.func @_lenet_kernel(%arg0: i32, %arg1: memref<2x16x192xf32, #tpu.memory_space<vmem>>, %arg2: memref<3x192x336xbf16, #tpu.memory_space<vmem>>, %arg3: memref<1x1x336xf32, #tpu.memory_space<vmem>>, %arg4: memref<5x162x160xbf16, #tpu.memory_space<vmem>>, %arg5: memref<1x1x160xf32, #tpu.memory_space<vmem>>, %arg6: memref<5x144x120xbf16, #tpu.memory_space<vmem>>, %arg7: memref<1x1x120xf32, #tpu.memory_space<vmem>>, %arg8: memref<120x84xbf16, #tpu.memory_space<vmem>>, %arg9: memref<1x1x84xf32, #tpu.memory_space<vmem>>, %arg10: memref<84x10xbf16, #tpu.memory_space<vmem>>, %arg11: memref<1x1x10xf32, #tpu.memory_space<vmem>>, %arg12: memref<2x1x10xf32, #tpu.memory_space<vmem>>, %arg13: memref<2x14x162xf32, #tpu.memory_space<vmem>>, %arg14: memref<2x10x160xf32, #tpu.memory_space<vmem>>) attributes {dimension_semantics = [#tpu.dimension_semantics<parallel>], iteration_bounds = array<i64: 1>, scalar_prefetch = 0 : i64, scratch_operands = 2 : i64, tpu.core_type = #tpu.core_type<tc>, window_params = [{transform_indices = @transform_0, window_bounds = array<i64: 2, 16, 192>}, {pipeline_mode = #tpu.pipeline_mode<synchronous>, transform_indices = @transform_1, window_bounds = array<i64: 3, 192, 336>}, {pipeline_mode = #tpu.pipeline_mode<synchronous>, transform_indices = @transform_2, window_bounds = array<i64: 1, 1, 336>}, {pipeline_mode = #tpu.pipeline_mode<synchronous>, transform_indices = @transform_3, window_bounds = array<i64: 5, 162, 160>}, {pipeline_mode = #tpu.pipeline_mode<synchronous>, transform_indices = @transform_4, window_bounds = array<i64: 1, 1, 160>}, {pipeline_mode = #tpu.pipeline_mode<synchronous>, transform_indices = @transform_5, window_bounds = array<i64: 5, 144, 120>}, {pipeline_mode = #tpu.pipeline_mode<synchronous>, transform_indices = @transform_6, window_bounds = array<i64: 1, 1, 120>}, {pipeline_mode = #tpu.pipeline_mode<synchronous>, transform_indices = @transform_7, window_bounds = array<i64: 120, 84>}, {pipeline_mode = #tpu.pipeline_mode<synchronous>, transform_indices = @transform_8, window_bounds = array<i64: 1, 1, 84>}, {pipeline_mode = #tpu.pipeline_mode<synchronous>, transform_indices = @transform_9, window_bounds = array<i64: 84, 10>}, {pipeline_mode = #tpu.pipeline_mode<synchronous>, transform_indices = @transform_10, window_bounds = array<i64: 1, 1, 10>}, {transform_indices = @transform_11, window_bounds = array<i64: 2, 1, 10>}]} {
    %c0 = arith.constant 0 : index
    %c0_0 = arith.constant 0 : index
    %c0_1 = arith.constant 0 : index
    %0 = vector.load %arg1[%c0, %c0_0, %c0_1] : memref<2x16x192xf32, #tpu.memory_space<vmem>>, vector<2x14x192xf32>
    %c0_2 = arith.constant 0 : index
    %c0_3 = arith.constant 0 : index
    %c0_4 = arith.constant 0 : index
    %1 = vector.load %arg2[%c0_2, %c0_3, %c0_4] : memref<3x192x336xbf16, #tpu.memory_space<vmem>>, vector<1x192x336xbf16>
    %2 = vector.shape_cast %1 : vector<1x192x336xbf16> to vector<192x336xbf16>
    %3 = vector.shape_cast %2 : vector<192x336xbf16> to vector<1x192x336xbf16>
    %4 = vector.broadcast %3 : vector<1x192x336xbf16> to vector<2x192x336xbf16>
    %5 = arith.truncf %0 : vector<2x14x192xf32> to vector<2x14x192xbf16>
    %cst = arith.constant dense<0.000000e+00> : vector<2x14x336xf32>
    %6 = tpu.matmul %5, %4, %cst {dimension_numbers = #tpu.dot_dimension_numbers<[2], [1], [1], [2], [0, 0, 0, 1, 1, 2], [0], [0]>} : vector<2x14x192xbf16>, vector<2x192x336xbf16>, vector<2x14x336xf32> -> vector<2x14x336xf32>
    %c0_5 = arith.constant 0 : index
    %c1 = arith.constant 1 : index
    %c0_6 = arith.constant 0 : index
    %7 = vector.load %arg1[%c0_5, %c1, %c0_6] : memref<2x16x192xf32, #tpu.memory_space<vmem>>, vector<2x14x192xf32>
    %c1_7 = arith.constant 1 : index
    %c0_8 = arith.constant 0 : index
    %c0_9 = arith.constant 0 : index
    %8 = vector.load %arg2[%c1_7, %c0_8, %c0_9] : memref<3x192x336xbf16, #tpu.memory_space<vmem>>, vector<1x192x336xbf16>
    %9 = vector.shape_cast %8 : vector<1x192x336xbf16> to vector<192x336xbf16>
    %10 = vector.shape_cast %9 : vector<192x336xbf16> to vector<1x192x336xbf16>
    %11 = vector.broadcast %10 : vector<1x192x336xbf16> to vector<2x192x336xbf16>
    %12 = arith.truncf %7 : vector<2x14x192xf32> to vector<2x14x192xbf16>
    %cst_10 = arith.constant dense<0.000000e+00> : vector<2x14x336xf32>
    %13 = tpu.matmul %12, %11, %cst_10 {dimension_numbers = #tpu.dot_dimension_numbers<[2], [1], [1], [2], [0, 0, 0, 1, 1, 2], [0], [0]>} : vector<2x14x192xbf16>, vector<2x192x336xbf16>, vector<2x14x336xf32> -> vector<2x14x336xf32>
    %14 = arith.addf %6, %13 : vector<2x14x336xf32>
    %c0_11 = arith.constant 0 : index
    %c2 = arith.constant 2 : index
    %c0_12 = arith.constant 0 : index
    %15 = vector.load %arg1[%c0_11, %c2, %c0_12] : memref<2x16x192xf32, #tpu.memory_space<vmem>>, vector<2x14x192xf32>
    %c2_13 = arith.constant 2 : index
    %c0_14 = arith.constant 0 : index
    %c0_15 = arith.constant 0 : index
    %16 = vector.load %arg2[%c2_13, %c0_14, %c0_15] : memref<3x192x336xbf16, #tpu.memory_space<vmem>>, vector<1x192x336xbf16>
    %17 = vector.shape_cast %16 : vector<1x192x336xbf16> to vector<192x336xbf16>
    %18 = vector.shape_cast %17 : vector<192x336xbf16> to vector<1x192x336xbf16>
    %19 = vector.broadcast %18 : vector<1x192x336xbf16> to vector<2x192x336xbf16>
    %20 = arith.truncf %15 : vector<2x14x192xf32> to vector<2x14x192xbf16>
    %cst_16 = arith.constant dense<0.000000e+00> : vector<2x14x336xf32>
    %21 = tpu.matmul %20, %19, %cst_16 {dimension_numbers = #tpu.dot_dimension_numbers<[2], [1], [1], [2], [0, 0, 0, 1, 1, 2], [0], [0]>} : vector<2x14x192xbf16>, vector<2x192x336xbf16>, vector<2x14x336xf32> -> vector<2x14x336xf32>
    %22 = arith.addf %14, %21 : vector<2x14x336xf32>
    %c0_17 = arith.constant 0 : index
    %c0_18 = arith.constant 0 : index
    %c0_19 = arith.constant 0 : index
    %23 = vector.load %arg3[%c0_17, %c0_18, %c0_19] : memref<1x1x336xf32, #tpu.memory_space<vmem>>, vector<1x1x336xf32>
    %24 = vector.broadcast %23 : vector<1x1x336xf32> to vector<2x14x336xf32>
    %25 = arith.addf %22, %24 : vector<2x14x336xf32>
    %cst_20 = arith.constant 0.000000e+00 : f32
    %26 = vector.broadcast %cst_20 : f32 to vector<2x14x336xf32>
    %27 = arith.maximumf %25, %26 : vector<2x14x336xf32>
    %28 = vector.extract_strided_slice %27 {offsets = [0, 0, 0], sizes = [2, 14, 168], strides = [1, 1, 1]} : vector<2x14x336xf32> to vector<2x14x168xf32>
    %29 = vector.extract_strided_slice %27 {offsets = [0, 0, 168], sizes = [2, 14, 168], strides = [1, 1, 1]} : vector<2x14x336xf32> to vector<2x14x168xf32>
    %30 = arith.maximumf %28, %29 : vector<2x14x168xf32>
    %31 = vector.extract_strided_slice %30 {offsets = [0, 0, 0], sizes = [2, 14, 162], strides = [1, 1, 1]} : vector<2x14x168xf32> to vector<2x14x162xf32>
    %32 = vector.extract_strided_slice %30 {offsets = [0, 0, 6], sizes = [2, 14, 162], strides = [1, 1, 1]} : vector<2x14x168xf32> to vector<2x14x162xf32>
    %33 = arith.maximumf %31, %32 : vector<2x14x162xf32>
    %c0_21 = arith.constant 0 : index
    %c0_22 = arith.constant 0 : index
    %c0_23 = arith.constant 0 : index
    %34 = vector.load %arg13[%c0_21, %c0_22, %c0_23] : memref<2x14x162xf32, #tpu.memory_space<vmem>>, vector<2x14x162xf32>
    tpu.vector_store %arg13[%c0_21, %c0_22, %c0_23], %33 {strides = array<i32>} : memref<2x14x162xf32, #tpu.memory_space<vmem>>, vector<2x14x162xf32>,
    %c0_24 = arith.constant 0 : index
    %c0_25 = arith.constant 0 : index
    %c0_26 = arith.constant 0 : index
    %35 = vector.load %arg13[%c0_24, %c0_25, %c0_26] : memref<2x14x162xf32, #tpu.memory_space<vmem>>, vector<2x10x162xf32>
    %c0_27 = arith.constant 0 : index
    %c0_28 = arith.constant 0 : index
    %c0_29 = arith.constant 0 : index
    %36 = vector.load %arg4[%c0_27, %c0_28, %c0_29] : memref<5x162x160xbf16, #tpu.memory_space<vmem>>, vector<1x162x160xbf16>
    %37 = vector.shape_cast %36 : vector<1x162x160xbf16> to vector<162x160xbf16>
    %38 = vector.shape_cast %37 : vector<162x160xbf16> to vector<1x162x160xbf16>
    %39 = vector.broadcast %38 : vector<1x162x160xbf16> to vector<2x162x160xbf16>
    %40 = arith.truncf %35 : vector<2x10x162xf32> to vector<2x10x162xbf16>
    %cst_30 = arith.constant dense<0.000000e+00> : vector<2x10x160xf32>
    %41 = tpu.matmul %40, %39, %cst_30 {dimension_numbers = #tpu.dot_dimension_numbers<[2], [1], [1], [2], [0, 0, 0, 1, 1, 2], [0], [0]>} : vector<2x10x162xbf16>, vector<2x162x160xbf16>, vector<2x10x160xf32> -> vector<2x10x160xf32>
    %c0_31 = arith.constant 0 : index
    %c1_32 = arith.constant 1 : index
    %c0_33 = arith.constant 0 : index
    %42 = vector.load %arg13[%c0_31, %c1_32, %c0_33] : memref<2x14x162xf32, #tpu.memory_space<vmem>>, vector<2x10x162xf32>
    %c1_34 = arith.constant 1 : index
    %c0_35 = arith.constant 0 : index
    %c0_36 = arith.constant 0 : index
    %43 = vector.load %arg4[%c1_34, %c0_35, %c0_36] : memref<5x162x160xbf16, #tpu.memory_space<vmem>>, vector<1x162x160xbf16>
    %44 = vector.shape_cast %43 : vector<1x162x160xbf16> to vector<162x160xbf16>
    %45 = vector.shape_cast %44 : vector<162x160xbf16> to vector<1x162x160xbf16>
    %46 = vector.broadcast %45 : vector<1x162x160xbf16> to vector<2x162x160xbf16>
    %47 = arith.truncf %42 : vector<2x10x162xf32> to vector<2x10x162xbf16>
    %cst_37 = arith.constant dense<0.000000e+00> : vector<2x10x160xf32>
    %48 = tpu.matmul %47, %46, %cst_37 {dimension_numbers = #tpu.dot_dimension_numbers<[2], [1], [1], [2], [0, 0, 0, 1, 1, 2], [0], [0]>} : vector<2x10x162xbf16>, vector<2x162x160xbf16>, vector<2x10x160xf32> -> vector<2x10x160xf32>
    %49 = arith.addf %41, %48 : vector<2x10x160xf32>
    %c0_38 = arith.constant 0 : index
    %c2_39 = arith.constant 2 : index
    %c0_40 = arith.constant 0 : index
    %50 = vector.load %arg13[%c0_38, %c2_39, %c0_40] : memref<2x14x162xf32, #tpu.memory_space<vmem>>, vector<2x10x162xf32>
    %c2_41 = arith.constant 2 : index
    %c0_42 = arith.constant 0 : index
    %c0_43 = arith.constant 0 : index
    %51 = vector.load %arg4[%c2_41, %c0_42, %c0_43] : memref<5x162x160xbf16, #tpu.memory_space<vmem>>, vector<1x162x160xbf16>
    %52 = vector.shape_cast %51 : vector<1x162x160xbf16> to vector<162x160xbf16>
    %53 = vector.shape_cast %52 : vector<162x160xbf16> to vector<1x162x160xbf16>
    %54 = vector.broadcast %53 : vector<1x162x160xbf16> to vector<2x162x160xbf16>
    %55 = arith.truncf %50 : vector<2x10x162xf32> to vector<2x10x162xbf16>
    %cst_44 = arith.constant dense<0.000000e+00> : vector<2x10x160xf32>
    %56 = tpu.matmul %55, %54, %cst_44 {dimension_numbers = #tpu.dot_dimension_numbers<[2], [1], [1], [2], [0, 0, 0, 1, 1, 2], [0], [0]>} : vector<2x10x162xbf16>, vector<2x162x160xbf16>, vector<2x10x160xf32> -> vector<2x10x160xf32>
    %57 = arith.addf %49, %56 : vector<2x10x160xf32>
    %c0_45 = arith.constant 0 : index
    %c3 = arith.constant 3 : index
    %c0_46 = arith.constant 0 : index
    %58 = vector.load %arg13[%c0_45, %c3, %c0_46] : memref<2x14x162xf32, #tpu.memory_space<vmem>>, vector<2x10x162xf32>
    %c3_47 = arith.constant 3 : index
    %c0_48 = arith.constant 0 : index
    %c0_49 = arith.constant 0 : index
    %59 = vector.load %arg4[%c3_47, %c0_48, %c0_49] : memref<5x162x160xbf16, #tpu.memory_space<vmem>>, vector<1x162x160xbf16>
    %60 = vector.shape_cast %59 : vector<1x162x160xbf16> to vector<162x160xbf16>
    %61 = vector.shape_cast %60 : vector<162x160xbf16> to vector<1x162x160xbf16>
    %62 = vector.broadcast %61 : vector<1x162x160xbf16> to vector<2x162x160xbf16>
    %63 = arith.truncf %58 : vector<2x10x162xf32> to vector<2x10x162xbf16>
    %cst_50 = arith.constant dense<0.000000e+00> : vector<2x10x160xf32>
    %64 = tpu.matmul %63, %62, %cst_50 {dimension_numbers = #tpu.dot_dimension_numbers<[2], [1], [1], [2], [0, 0, 0, 1, 1, 2], [0], [0]>} : vector<2x10x162xbf16>, vector<2x162x160xbf16>, vector<2x10x160xf32> -> vector<2x10x160xf32>
    %65 = arith.addf %57, %64 : vector<2x10x160xf32>
    %c0_51 = arith.constant 0 : index
    %c4 = arith.constant 4 : index
    %c0_52 = arith.constant 0 : index
    %66 = vector.load %arg13[%c0_51, %c4, %c0_52] : memref<2x14x162xf32, #tpu.memory_space<vmem>>, vector<2x10x162xf32>
    %c4_53 = arith.constant 4 : index
    %c0_54 = arith.constant 0 : index
    %c0_55 = arith.constant 0 : index
    %67 = vector.load %arg4[%c4_53, %c0_54, %c0_55] : memref<5x162x160xbf16, #tpu.memory_space<vmem>>, vector<1x162x160xbf16>
    %68 = vector.shape_cast %67 : vector<1x162x160xbf16> to vector<162x160xbf16>
    %69 = vector.shape_cast %68 : vector<162x160xbf16> to vector<1x162x160xbf16>
    %70 = vector.broadcast %69 : vector<1x162x160xbf16> to vector<2x162x160xbf16>
    %71 = arith.truncf %66 : vector<2x10x162xf32> to vector<2x10x162xbf16>
    %cst_56 = arith.constant dense<0.000000e+00> : vector<2x10x160xf32>
    %72 = tpu.matmul %71, %70, %cst_56 {dimension_numbers = #tpu.dot_dimension_numbers<[2], [1], [1], [2], [0, 0, 0, 1, 1, 2], [0], [0]>} : vector<2x10x162xbf16>, vector<2x162x160xbf16>, vector<2x10x160xf32> -> vector<2x10x160xf32>
    %73 = arith.addf %65, %72 : vector<2x10x160xf32>
    %c0_57 = arith.constant 0 : index
    %c0_58 = arith.constant 0 : index
    %c0_59 = arith.constant 0 : index
    %74 = vector.load %arg5[%c0_57, %c0_58, %c0_59] : memref<1x1x160xf32, #tpu.memory_space<vmem>>, vector<1x1x160xf32>
    %75 = vector.broadcast %74 : vector<1x1x160xf32> to vector<2x10x160xf32>
    %76 = arith.addf %73, %75 : vector<2x10x160xf32>
    %cst_60 = arith.constant 0.000000e+00 : f32
    %77 = vector.broadcast %cst_60 : f32 to vector<2x10x160xf32>
    %78 = arith.maximumf %76, %77 : vector<2x10x160xf32>
    %c0_61 = arith.constant 0 : index
    %c0_62 = arith.constant 0 : index
    %c0_63 = arith.constant 0 : index
    %79 = vector.load %arg14[%c0_61, %c0_62, %c0_63] : memref<2x10x160xf32, #tpu.memory_space<vmem>>, vector<2x10x160xf32>
    tpu.vector_store %arg14[%c0_61, %c0_62, %c0_63], %78 {strides = array<i32>} : memref<2x10x160xf32, #tpu.memory_space<vmem>>, vector<2x10x160xf32>,
    %cst_64 = arith.constant 0.000000e+00 : f32
    %80 = vector.broadcast %cst_64 : f32 to vector<2x1x120xf32>
    %c0_65 = arith.constant 0 : index
    %c0_66 = arith.constant 0 : index
    %c0_67 = arith.constant 0 : index
    %81 = vector.load %arg14[%c0_65, %c0_66, %c0_67] : memref<2x10x160xf32, #tpu.memory_space<vmem>>, vector<2x1x160xf32>
    %c0_68 = arith.constant 0 : index
    %c1_69 = arith.constant 1 : index
    %c0_70 = arith.constant 0 : index
    %82 = vector.load %arg14[%c0_68, %c1_69, %c0_70] : memref<2x10x160xf32, #tpu.memory_space<vmem>>, vector<2x1x160xf32>
    %83 = arith.maximumf %81, %82 : vector<2x1x160xf32>
    %84 = vector.extract_strided_slice %83 {offsets = [0, 0, 0], sizes = [2, 1, 144], strides = [1, 1, 1]} : vector<2x1x160xf32> to vector<2x1x144xf32>
    %85 = vector.extract_strided_slice %83 {offsets = [0, 0, 16], sizes = [2, 1, 144], strides = [1, 1, 1]} : vector<2x1x160xf32> to vector<2x1x144xf32>
    %86 = arith.maximumf %84, %85 : vector<2x1x144xf32>
    %c0_71 = arith.constant 0 : index
    %c0_72 = arith.constant 0 : index
    %c0_73 = arith.constant 0 : index
    %87 = vector.load %arg6[%c0_71, %c0_72, %c0_73] : memref<5x144x120xbf16, #tpu.memory_space<vmem>>, vector<1x144x120xbf16>
    %88 = vector.shape_cast %87 : vector<1x144x120xbf16> to vector<144x120xbf16>
    %89 = vector.shape_cast %88 : vector<144x120xbf16> to vector<1x144x120xbf16>
    %90 = vector.broadcast %89 : vector<1x144x120xbf16> to vector<2x144x120xbf16>
    %91 = arith.truncf %86 : vector<2x1x144xf32> to vector<2x1x144xbf16>
    %cst_74 = arith.constant dense<0.000000e+00> : vector<2x1x120xf32>
    %92 = tpu.matmul %91, %90, %cst_74 {dimension_numbers = #tpu.dot_dimension_numbers<[2], [1], [1], [2], [0, 0, 0, 1, 1, 2], [0], [0]>} : vector<2x1x144xbf16>, vector<2x144x120xbf16>, vector<2x1x120xf32> -> vector<2x1x120xf32>
    %93 = arith.addf %80, %92 : vector<2x1x120xf32>
    %c0_75 = arith.constant 0 : index
    %c2_76 = arith.constant 2 : index
    %c0_77 = arith.constant 0 : index
    %94 = vector.load %arg14[%c0_75, %c2_76, %c0_77] : memref<2x10x160xf32, #tpu.memory_space<vmem>>, vector<2x1x160xf32>
    %c0_78 = arith.constant 0 : index
    %c3_79 = arith.constant 3 : index
    %c0_80 = arith.constant 0 : index
    %95 = vector.load %arg14[%c0_78, %c3_79, %c0_80] : memref<2x10x160xf32, #tpu.memory_space<vmem>>, vector<2x1x160xf32>
    %96 = arith.maximumf %94, %95 : vector<2x1x160xf32>
    %97 = vector.extract_strided_slice %96 {offsets = [0, 0, 0], sizes = [2, 1, 144], strides = [1, 1, 1]} : vector<2x1x160xf32> to vector<2x1x144xf32>
    %98 = vector.extract_strided_slice %96 {offsets = [0, 0, 16], sizes = [2, 1, 144], strides = [1, 1, 1]} : vector<2x1x160xf32> to vector<2x1x144xf32>
    %99 = arith.maximumf %97, %98 : vector<2x1x144xf32>
    %c1_81 = arith.constant 1 : index
    %c0_82 = arith.constant 0 : index
    %c0_83 = arith.constant 0 : index
    %100 = vector.load %arg6[%c1_81, %c0_82, %c0_83] : memref<5x144x120xbf16, #tpu.memory_space<vmem>>, vector<1x144x120xbf16>
    %101 = vector.shape_cast %100 : vector<1x144x120xbf16> to vector<144x120xbf16>
    %102 = vector.shape_cast %101 : vector<144x120xbf16> to vector<1x144x120xbf16>
    %103 = vector.broadcast %102 : vector<1x144x120xbf16> to vector<2x144x120xbf16>
    %104 = arith.truncf %99 : vector<2x1x144xf32> to vector<2x1x144xbf16>
    %cst_84 = arith.constant dense<0.000000e+00> : vector<2x1x120xf32>
    %105 = tpu.matmul %104, %103, %cst_84 {dimension_numbers = #tpu.dot_dimension_numbers<[2], [1], [1], [2], [0, 0, 0, 1, 1, 2], [0], [0]>} : vector<2x1x144xbf16>, vector<2x144x120xbf16>, vector<2x1x120xf32> -> vector<2x1x120xf32>
    %106 = arith.addf %93, %105 : vector<2x1x120xf32>
    %c0_85 = arith.constant 0 : index
    %c4_86 = arith.constant 4 : index
    %c0_87 = arith.constant 0 : index
    %107 = vector.load %arg14[%c0_85, %c4_86, %c0_87] : memref<2x10x160xf32, #tpu.memory_space<vmem>>, vector<2x1x160xf32>
    %c0_88 = arith.constant 0 : index
    %c5 = arith.constant 5 : index
    %c0_89 = arith.constant 0 : index
    %108 = vector.load %arg14[%c0_88, %c5, %c0_89] : memref<2x10x160xf32, #tpu.memory_space<vmem>>, vector<2x1x160xf32>
    %109 = arith.maximumf %107, %108 : vector<2x1x160xf32>
    %110 = vector.extract_strided_slice %109 {offsets = [0, 0, 0], sizes = [2, 1, 144], strides = [1, 1, 1]} : vector<2x1x160xf32> to vector<2x1x144xf32>
    %111 = vector.extract_strided_slice %109 {offsets = [0, 0, 16], sizes = [2, 1, 144], strides = [1, 1, 1]} : vector<2x1x160xf32> to vector<2x1x144xf32>
    %112 = arith.maximumf %110, %111 : vector<2x1x144xf32>
    %c2_90 = arith.constant 2 : index
    %c0_91 = arith.constant 0 : index
    %c0_92 = arith.constant 0 : index
    %113 = vector.load %arg6[%c2_90, %c0_91, %c0_92] : memref<5x144x120xbf16, #tpu.memory_space<vmem>>, vector<1x144x120xbf16>
    %114 = vector.shape_cast %113 : vector<1x144x120xbf16> to vector<144x120xbf16>
    %115 = vector.shape_cast %114 : vector<144x120xbf16> to vector<1x144x120xbf16>
    %116 = vector.broadcast %115 : vector<1x144x120xbf16> to vector<2x144x120xbf16>
    %117 = arith.truncf %112 : vector<2x1x144xf32> to vector<2x1x144xbf16>
    %cst_93 = arith.constant dense<0.000000e+00> : vector<2x1x120xf32>
    %118 = tpu.matmul %117, %116, %cst_93 {dimension_numbers = #tpu.dot_dimension_numbers<[2], [1], [1], [2], [0, 0, 0, 1, 1, 2], [0], [0]>} : vector<2x1x144xbf16>, vector<2x144x120xbf16>, vector<2x1x120xf32> -> vector<2x1x120xf32>
    %119 = arith.addf %106, %118 : vector<2x1x120xf32>
    %c0_94 = arith.constant 0 : index
    %c6 = arith.constant 6 : index
    %c0_95 = arith.constant 0 : index
    %120 = vector.load %arg14[%c0_94, %c6, %c0_95] : memref<2x10x160xf32, #tpu.memory_space<vmem>>, vector<2x1x160xf32>
    %c0_96 = arith.constant 0 : index
    %c7 = arith.constant 7 : index
    %c0_97 = arith.constant 0 : index
    %121 = vector.load %arg14[%c0_96, %c7, %c0_97] : memref<2x10x160xf32, #tpu.memory_space<vmem>>, vector<2x1x160xf32>
    %122 = arith.maximumf %120, %121 : vector<2x1x160xf32>
    %123 = vector.extract_strided_slice %122 {offsets = [0, 0, 0], sizes = [2, 1, 144], strides = [1, 1, 1]} : vector<2x1x160xf32> to vector<2x1x144xf32>
    %124 = vector.extract_strided_slice %122 {offsets = [0, 0, 16], sizes = [2, 1, 144], strides = [1, 1, 1]} : vector<2x1x160xf32> to vector<2x1x144xf32>
    %125 = arith.maximumf %123, %124 : vector<2x1x144xf32>
    %c3_98 = arith.constant 3 : index
    %c0_99 = arith.constant 0 : index
    %c0_100 = arith.constant 0 : index
    %126 = vector.load %arg6[%c3_98, %c0_99, %c0_100] : memref<5x144x120xbf16, #tpu.memory_space<vmem>>, vector<1x144x120xbf16>
    %127 = vector.shape_cast %126 : vector<1x144x120xbf16> to vector<144x120xbf16>
    %128 = vector.shape_cast %127 : vector<144x120xbf16> to vector<1x144x120xbf16>
    %129 = vector.broadcast %128 : vector<1x144x120xbf16> to vector<2x144x120xbf16>
    %130 = arith.truncf %125 : vector<2x1x144xf32> to vector<2x1x144xbf16>
    %cst_101 = arith.constant dense<0.000000e+00> : vector<2x1x120xf32>
    %131 = tpu.matmul %130, %129, %cst_101 {dimension_numbers = #tpu.dot_dimension_numbers<[2], [1], [1], [2], [0, 0, 0, 1, 1, 2], [0], [0]>} : vector<2x1x144xbf16>, vector<2x144x120xbf16>, vector<2x1x120xf32> -> vector<2x1x120xf32>
    %132 = arith.addf %119, %131 : vector<2x1x120xf32>
    %c0_102 = arith.constant 0 : index
    %c8 = arith.constant 8 : index
    %c0_103 = arith.constant 0 : index
    %133 = vector.load %arg14[%c0_102, %c8, %c0_103] : memref<2x10x160xf32, #tpu.memory_space<vmem>>, vector<2x1x160xf32>
    %c0_104 = arith.constant 0 : index
    %c9 = arith.constant 9 : index
    %c0_105 = arith.constant 0 : index
    %134 = vector.load %arg14[%c0_104, %c9, %c0_105] : memref<2x10x160xf32, #tpu.memory_space<vmem>>, vector<2x1x160xf32>
    %135 = arith.maximumf %133, %134 : vector<2x1x160xf32>
    %136 = vector.extract_strided_slice %135 {offsets = [0, 0, 0], sizes = [2, 1, 144], strides = [1, 1, 1]} : vector<2x1x160xf32> to vector<2x1x144xf32>
    %137 = vector.extract_strided_slice %135 {offsets = [0, 0, 16], sizes = [2, 1, 144], strides = [1, 1, 1]} : vector<2x1x160xf32> to vector<2x1x144xf32>
    %138 = arith.maximumf %136, %137 : vector<2x1x144xf32>
    %c4_106 = arith.constant 4 : index
    %c0_107 = arith.constant 0 : index
    %c0_108 = arith.constant 0 : index
    %139 = vector.load %arg6[%c4_106, %c0_107, %c0_108] : memref<5x144x120xbf16, #tpu.memory_space<vmem>>, vector<1x144x120xbf16>
    %140 = vector.shape_cast %139 : vector<1x144x120xbf16> to vector<144x120xbf16>
    %141 = vector.shape_cast %140 : vector<144x120xbf16> to vector<1x144x120xbf16>
    %142 = vector.broadcast %141 : vector<1x144x120xbf16> to vector<2x144x120xbf16>
    %143 = arith.truncf %138 : vector<2x1x144xf32> to vector<2x1x144xbf16>
    %cst_109 = arith.constant dense<0.000000e+00> : vector<2x1x120xf32>
    %144 = tpu.matmul %143, %142, %cst_109 {dimension_numbers = #tpu.dot_dimension_numbers<[2], [1], [1], [2], [0, 0, 0, 1, 1, 2], [0], [0]>} : vector<2x1x144xbf16>, vector<2x144x120xbf16>, vector<2x1x120xf32> -> vector<2x1x120xf32>
    %145 = arith.addf %132, %144 : vector<2x1x120xf32>
    %c0_110 = arith.constant 0 : index
    %c0_111 = arith.constant 0 : index
    %c0_112 = arith.constant 0 : index
    %146 = vector.load %arg7[%c0_110, %c0_111, %c0_112] : memref<1x1x120xf32, #tpu.memory_space<vmem>>, vector<1x1x120xf32>
    %147 = vector.broadcast %146 : vector<1x1x120xf32> to vector<2x1x120xf32>
    %148 = arith.addf %145, %147 : vector<2x1x120xf32>
    %cst_113 = arith.constant 0.000000e+00 : f32
    %149 = vector.broadcast %cst_113 : f32 to vector<2x1x120xf32>
    %150 = arith.maximumf %148, %149 : vector<2x1x120xf32>
    %c0_114 = arith.constant 0 : index
    %c0_115 = arith.constant 0 : index
    %151 = vector.load %arg8[%c0_114, %c0_115] : memref<120x84xbf16, #tpu.memory_space<vmem>>, vector<120x84xbf16>
    %152 = vector.shape_cast %151 : vector<120x84xbf16> to vector<1x120x84xbf16>
    %153 = vector.broadcast %152 : vector<1x120x84xbf16> to vector<2x120x84xbf16>
    %154 = arith.truncf %150 : vector<2x1x120xf32> to vector<2x1x120xbf16>
    %cst_116 = arith.constant dense<0.000000e+00> : vector<2x1x84xf32>
    %155 = tpu.matmul %154, %153, %cst_116 {dimension_numbers = #tpu.dot_dimension_numbers<[2], [1], [1], [2], [0, 0, 0, 1, 1, 2], [0], [0]>} : vector<2x1x120xbf16>, vector<2x120x84xbf16>, vector<2x1x84xf32> -> vector<2x1x84xf32>
    %c0_117 = arith.constant 0 : index
    %c0_118 = arith.constant 0 : index
    %c0_119 = arith.constant 0 : index
    %156 = vector.load %arg9[%c0_117, %c0_118, %c0_119] : memref<1x1x84xf32, #tpu.memory_space<vmem>>, vector<1x1x84xf32>
    %157 = vector.broadcast %156 : vector<1x1x84xf32> to vector<2x1x84xf32>
    %158 = arith.addf %155, %157 : vector<2x1x84xf32>
    %cst_120 = arith.constant 0.000000e+00 : f32
    %159 = vector.broadcast %cst_120 : f32 to vector<2x1x84xf32>
    %160 = arith.maximumf %158, %159 : vector<2x1x84xf32>
    %c0_121 = arith.constant 0 : index
    %c0_122 = arith.constant 0 : index
    %161 = vector.load %arg10[%c0_121, %c0_122] : memref<84x10xbf16, #tpu.memory_space<vmem>>, vector<84x10xbf16>
    %162 = vector.shape_cast %161 : vector<84x10xbf16> to vector<1x84x10xbf16>
    %163 = vector.broadcast %162 : vector<1x84x10xbf16> to vector<2x84x10xbf16>
    %164 = arith.truncf %160 : vector<2x1x84xf32> to vector<2x1x84xbf16>
    %cst_123 = arith.constant dense<0.000000e+00> : vector<2x1x10xf32>
    %165 = tpu.matmul %164, %163, %cst_123 {dimension_numbers = #tpu.dot_dimension_numbers<[2], [1], [1], [2], [0, 0, 0, 1, 1, 2], [0], [0]>} : vector<2x1x84xbf16>, vector<2x84x10xbf16>, vector<2x1x10xf32> -> vector<2x1x10xf32>
    %c0_124 = arith.constant 0 : index
    %c0_125 = arith.constant 0 : index
    %c0_126 = arith.constant 0 : index
    %166 = vector.load %arg11[%c0_124, %c0_125, %c0_126] : memref<1x1x10xf32, #tpu.memory_space<vmem>>, vector<1x1x10xf32>
    %167 = vector.broadcast %166 : vector<1x1x10xf32> to vector<2x1x10xf32>
    %168 = arith.addf %165, %167 : vector<2x1x10xf32>
    %c0_127 = arith.constant 0 : index
    %c0_128 = arith.constant 0 : index
    %c0_129 = arith.constant 0 : index
    %169 = vector.load %arg12[%c0_127, %c0_128, %c0_129] : memref<2x1x10xf32, #tpu.memory_space<vmem>>, vector<2x1x10xf32>
    tpu.vector_store %arg12[%c0_127, %c0_128, %c0_129], %168 {strides = array<i32>} : memref<2x1x10xf32, #tpu.memory_space<vmem>>, vector<2x1x10xf32>,
    return
  }
  func.func @transform_0(%arg0: i32) -> (i32, i32, i32) {
    %c0_i32 = arith.constant 0 : i32
    %c0_i32_0 = arith.constant 0 : i32
    %c0_i32_1 = arith.constant 0 : i32
    return %arg0, %c0_i32, %c0_i32_0 : i32, i32, i32
  }
  func.func @transform_1(%arg0: i32) -> (i32, i32, i32) {
    %c0_i32 = arith.constant 0 : i32
    %c0_i32_0 = arith.constant 0 : i32
    %c0_i32_1 = arith.constant 0 : i32
    %c0_i32_2 = arith.constant 0 : i32
    return %c0_i32, %c0_i32_0, %c0_i32_1 : i32, i32, i32
  }
  func.func @transform_2(%arg0: i32) -> (i32, i32, i32) {
    %c0_i32 = arith.constant 0 : i32
    %c0_i32_0 = arith.constant 0 : i32
    %c0_i32_1 = arith.constant 0 : i32
    %c0_i32_2 = arith.constant 0 : i32
    return %c0_i32, %c0_i32_0, %c0_i32_1 : i32, i32, i32
  }
  func.func @transform_3(%arg0: i32) -> (i32, i32, i32) {
    %c0_i32 = arith.constant 0 : i32
    %c0_i32_0 = arith.constant 0 : i32
    %c0_i32_1 = arith.constant 0 : i32
    %c0_i32_2 = arith.constant 0 : i32
    return %c0_i32, %c0_i32_0, %c0_i32_1 : i32, i32, i32
  }
  func.func @transform_4(%arg0: i32) -> (i32, i32, i32) {
    %c0_i32 = arith.constant 0 : i32
    %c0_i32_0 = arith.constant 0 : i32
    %c0_i32_1 = arith.constant 0 : i32
    %c0_i32_2 = arith.constant 0 : i32
    return %c0_i32, %c0_i32_0, %c0_i32_1 : i32, i32, i32
  }
  func.func @transform_5(%arg0: i32) -> (i32, i32, i32) {
    %c0_i32 = arith.constant 0 : i32
    %c0_i32_0 = arith.constant 0 : i32
    %c0_i32_1 = arith.constant 0 : i32
    %c0_i32_2 = arith.constant 0 : i32
    return %c0_i32, %c0_i32_0, %c0_i32_1 : i32, i32, i32
  }
  func.func @transform_6(%arg0: i32) -> (i32, i32, i32) {
    %c0_i32 = arith.constant 0 : i32
    %c0_i32_0 = arith.constant 0 : i32
    %c0_i32_1 = arith.constant 0 : i32
    %c0_i32_2 = arith.constant 0 : i32
    return %c0_i32, %c0_i32_0, %c0_i32_1 : i32, i32, i32
  }
  func.func @transform_7(%arg0: i32) -> (i32, i32) {
    %c0_i32 = arith.constant 0 : i32
    %c0_i32_0 = arith.constant 0 : i32
    %c0_i32_1 = arith.constant 0 : i32
    return %c0_i32, %c0_i32_0 : i32, i32
  }
  func.func @transform_8(%arg0: i32) -> (i32, i32, i32) {
    %c0_i32 = arith.constant 0 : i32
    %c0_i32_0 = arith.constant 0 : i32
    %c0_i32_1 = arith.constant 0 : i32
    %c0_i32_2 = arith.constant 0 : i32
    return %c0_i32, %c0_i32_0, %c0_i32_1 : i32, i32, i32
  }
  func.func @transform_9(%arg0: i32) -> (i32, i32) {
    %c0_i32 = arith.constant 0 : i32
    %c0_i32_0 = arith.constant 0 : i32
    %c0_i32_1 = arith.constant 0 : i32
    return %c0_i32, %c0_i32_0 : i32, i32
  }
  func.func @transform_10(%arg0: i32) -> (i32, i32, i32) {
    %c0_i32 = arith.constant 0 : i32
    %c0_i32_0 = arith.constant 0 : i32
    %c0_i32_1 = arith.constant 0 : i32
    %c0_i32_2 = arith.constant 0 : i32
    return %c0_i32, %c0_i32_0, %c0_i32_1 : i32, i32, i32
  }
  func.func @transform_11(%arg0: i32) -> (i32, i32, i32) {
    %c0_i32 = arith.constant 0 : i32
    %c0_i32_0 = arith.constant 0 : i32
    %c0_i32_1 = arith.constant 0 : i32
    return %arg0, %c0_i32, %c0_i32_0 : i32, i32, i32
  }
}

</mosaic_0001>

<bundles_post_ra>
// kernel: lenet_forward.1
= control target key start
LH: loop header
LB: loop body
LE: loop exit
PB: predicated region body
PF: predicated region fallthrough
CT: control target
= control target key end

     0   :  { %v5362_v1 = vmov 0   ;;  %vm368_vm0 = vcmask 523264   ;;  %s7525_s0 = inlined_call_operand.vmem [shape: f32[2,16,192], index: 0, kind: input, shape index: {}]   ;;  %s7526_s1 = inlined_call_operand.vmem [shape: bf16[3,192,336], index: 1, kind: input, shape index: {}]   ;;  %s7527_s2 = inlined_call_operand.vmem [shape: f32[1,1,336], index: 2, kind: input, shape index: {}]   ;;  %s7528_s3 = inlined_call_operand.vmem [shape: bf16[5,162,160], index: 3, kind: input, shape index: {}]   ;;  %s7529_s4 = inlined_call_operand.vmem [shape: f32[1,1,160], index: 4, kind: input, shape index: {}]   ;;  %s7530_s5 = inlined_call_operand.vmem [shape: bf16[5,144,120], index: 5, kind: input, shape index: {}]   ;;  %s7531_s6 = inlined_call_operand.vmem [shape: f32[1,1,120], index: 6, kind: input, shape index: {}]   ;;  %s7532_s7 = inlined_call_operand.vmem [shape: bf16[120,84], index: 7, kind: input, shape index: {}]   ;;  %s7533_s8 = inlined_call_operand.vmem [shape: f32[1,1,84], index: 8, kind: input, shape index: {}]   ;;  %s7534_s9 = inlined_call_operand.vmem [shape: bf16[84,10], index: 9, kind: input, shape index: {}]   ;;  %s7535_s10 = inlined_call_operand.vmem [shape: f32[1,1,10], index: 10, kind: input, shape index: {}]   ;;  %s7536_s11 = inlined_call_operand.hbm [shape: f32[2,1,10], index: 11, kind: output, shape index: {}]  }
   0x1   :  { %v5434_v0 = vld [vmem:[%s7526_s1 + $0x124] ss:$12 sps:$4 sm:$0xff]   ;;  %415 = vmatprep.subr.bf16.mxu1 %v5362_v1  ;;  %v5440_v2 = vld [vmem:[%s7526_s1 + $0x128] ss:$12 sps:$4 sm:$0xff]   ;;  %v5446_v3 = vld [vmem:[%s7526_s1 + $0x120] ss:$12 sps:$4 sm:$0xff]  }
   0x2   :  { %372 = vmatprep.subr.bf16.mxu0 %v5434_v0  ;;  %416 = vmatpush1.bf16.msra.mxu1 %v5440_v2  ;;  %v5452_v4 = vld [vmem:[%s7526_s1 + $0x13c] ss:$12 sps:$4 sm:$0xff]   ;;  %v5459_v5 = vld [vmem:[%s7526_s1 + $0x140] ss:$12 sps:$4 sm:$0xff]   ;;  %v5464_v6 = vld [vmem:[%s7526_s1 + $0x138] ss:$12 sps:$4 sm:$0xff]  }
   0x3   :  { %373 = vmatpush1.bf16.msra.mxu0 %v5446_v3  ;;  %417 = vmatprep.subr.bf16.mxu1 %v5362_v1  ;;  %v5470_v7 = vld [vmem:[%s7526_s1 + $0x154] ss:$12 sps:$4 sm:$0xff]   ;;  %v5476_v8 = vld [vmem:[%s7526_s1 + $0x158] ss:$12 sps:$4 sm:$0xff]   ;;  %v5483_v9 = vld [vmem:[%s7526_s1 + $0x150] ss:$12 sps:$4 sm:$0xff]  }
   0x4   :  { %374 = vmatprep.subr.bf16.mxu0 %v5452_v4  ;;  %v5489_v10 = vld [vmem:[%s7526_s1 + $0x16c] ss:$12 sps:$4 sm:$0xff]   ;;  %v5495_v11 = vld [vmem:[%s7526_s1 + $0x170] ss:$12 sps:$4 sm:$0xff]   ;;  %v5502_v12 = vld [vmem:[%s7526_s1 + $0x168] ss:$12 sps:$4 sm:$0xff]  }
   0x5   :  { %v5508_v13 = vld [vmem:[%s7526_s1 + $0x184] ss:$12 sps:$4 sm:$0xff]   ;;  %v5514_v14 = vld [vmem:[%s7526_s1 + $0x188] ss:$12 sps:$4 sm:$0xff]   ;;  %v5521_v15 = vld [vmem:[%s7526_s1 + $0x180] ss:$12 sps:$4 sm:$0xff]  }
   0x6   :  { %418 = vmatpush1.bf16.msra.mxu1 %v5459_v5  ;;  %v5527_v16 = vld [vmem:[%s7526_s1 + $0x19c] ss:$12 sps:$4 sm:$0xff]   ;;  %v5533_v17 = vld [vmem:[%s7526_s1 + $0x1a0] ss:$12 sps:$4 sm:$0xff]   ;;  %v5540_v18 = vld [vmem:[%s7526_s1 + $0x198] ss:$12 sps:$4 sm:$0xff]  }
   0x7   :  { %375 = vmatpush1.bf16.msra.mxu0 %v5464_v6  ;;  %419 = vmatprep.subr.bf16.mxu1 %v5362_v1  ;;  %v5546_v19 = vld [vmem:[%s7526_s1 + $0x1b4] ss:$12 sps:$4 sm:$0xff]   ;;  %v5552_v20 = vld [vmem:[%s7526_s1 + $0x1b8] ss:$12 sps:$4 sm:$0xff]   ;;  %v5559_v21 = vld [vmem:[%s7526_s1 + $0x1b0] ss:$12 sps:$4 sm:$0xff]  }
   0x8   :  { %376 = vmatprep.subr.bf16.mxu0 %v5470_v7  ;;  %v5565_v22 = vld [vmem:[%s7526_s1 + $0x1cc] ss:$12 sps:$4 sm:$0xff]   ;;  %v5571_v23 = vld [vmem:[%s7526_s1 + $0x1d0] ss:$12 sps:$4 sm:$0xff]   ;;  %v5578_v24 = vld [vmem:[%s7526_s1 + $0x1c8] ss:$12 sps:$4 sm:$0xff]  }
   0x9   :  { %v101_v25 = vld [vmem:[%s7525_s0 + $0x8] sm:$0xfe]  ;;  %v103_v26 = vld [vmem:[%s7525_s0 + $0x18] sm:$0x7f]  ;;  %v5590_v27 = vld [vmem:[%s7526_s1 + $0x1e4] ss:$12 sps:$4 sm:$0xff]  }
   0xa   :  { %420 = vmatpush1.bf16.msra.mxu1 %v5476_v8  ;;  %v158_v28 = vpack.c.bf16 %v103_v26, %v101_v25  ;;  %v5595_v29 = vld [vmem:[%s7526_s1 + $0x1e8] ss:$12 sps:$4 sm:$0xff]   ;;  %v100_v30 = vld [vmem:[%s7525_s0] sm:$0xfe]  ;;  %v107_v39 = vld [vmem:[%s7525_s0 + $0x38] sm:$0x7f] }
   0xb   :  { %377 = vmatpush1.bf16.msra.mxu0 %v5483_v9  ;;  %421 = vmatprep.subr.bf16.mxu1 %v5362_v1  ;;  %v102_v33 = vld [vmem:[%s7525_s0 + $0x10] sm:$0x7f]  ;;  %v5609_v34 = vld [vmem:[%s7526_s1 + $0x1e0] ss:$12 sps:$4 sm:$0xff]   ;;  %v5615_v35 = vld [vmem:[%s7526_s1 + $0x1fc] ss:$12 sps:$4 sm:$0xff]  }
   0xc   :  { %378 = vmatprep.subr.bf16.mxu0 %v5489_v10  ;;  %v169_v31 = vshrl.u32 %v158_v28, 16  ;;  %v171_v32 = vshll.u32 %v158_v28, 16  ;;  %v157_v37 = vpack.c.bf16 %v102_v33, %v100_v30  ;;  %v105_v38 = vld [vmem:[%s7525_s0 + $0x28] sm:$0xfe]  ;;  %v5634_v42 = vld [vmem:[%s7526_s1 + $0x1f8] ss:$12 sps:$4 sm:$0xff]  }
   0xd   :  { %v5627_v40 = vld [vmem:[%s7526_s1 + $0x200] ss:$12 sps:$4 sm:$0xff]   ;;  %v160_v44 = vpack.c.bf16 %v107_v39, %v105_v38  ;;  %v5648_v46 = vld [vmem:[%s7526_s1 + $0x218] ss:$12 sps:$4 sm:$0xff]   ;;  %v5655_v47 = vld [vmem:[%s7526_s1 + $0x210] ss:$12 sps:$4 sm:$0xff]  }
   0xe   :  { %422 = vmatpush1.bf16.msra.mxu1 %v5495_v11  ;;  %v173_v36 = vrot.slane %v171_v32, 1  ;;  %v5640_v43 = vld [vmem:[%s7526_s1 + $0x214] ss:$12 sps:$4 sm:$0xff]   ;;  %v164_v45 = vshll.u32 %v157_v37, 16  ;;  %v5661_v48 = vld [vmem:[%s7526_s1 + $0x22c] ss:$12 sps:$4 sm:$0xff]  }
   0xf   :  { %379 = vmatpush1.bf16.msra.mxu0 %v5502_v12  ;;  %423 = vmatprep.subr.bf16.mxu1 %v5362_v1  ;;  %v466_v49 = vshll.u32 %v160_v44, 16  ;;  %v162_v50 = vshrl.u32 %v157_v37, 16  ;;  %v5667_v52 = vld [vmem:[%s7526_s1 + $0x230] ss:$12 sps:$4 sm:$0xff]   ;;  %v5674_v53 = vld [vmem:[%s7526_s1 + $0x228] ss:$12 sps:$4 sm:$0xff]  }
  0x10   :  { %380 = vmatprep.subr.bf16.mxu0 %v5508_v13  ;;  %v174_v41 = vor.u32 %v173_v36, %v169_v31  ;;  %v166_v51 = vrot.slane %v164_v45, 1  ;;  %v464_v54 = vshrl.u32 %v160_v44, 16  ;;  %v104_v58 = vld [vmem:[%s7525_s0 + $0x20] sm:$0xfe]  ;;  %v106_v59 = vld [vmem:[%s7525_s0 + $0x30] sm:$0x7f] }
  0x11   :  { %v468_v55 = vrot.slane %v466_v49, 1  ;;  %v159_v60 = vpack.c.bf16 %v106_v59, %v104_v58  ;;  %v5868_v25 = vld [vmem:[%s7526_s1 + $0x90] ss:$12 sps:$4 sm:$0xff]   ;;  %v5874_v26 = vld [vmem:[%s7526_s1 + $0xac] ss:$12 sps:$4 sm:$0xff]  }
  0x12   :  { %424 = vmatpush1.bf16.msra.mxu1 %v5514_v14  ;;  %4299 = vmatprep.mubr.msk.bf16.mxu1 %vm368_vm0, %v174_v41  ;;  %v167_v56 = vor.u32 %v166_v51, %v162_v50  ;;  %v5887_v28 = vld [vmem:[%s7526_s1 + $0xa8] ss:$12 sps:$4 sm:$0xff]   ;;  %v5906_v31 = vld [vmem:[%s7526_s1 + $0xc0] ss:$12 sps:$4 sm:$0xff]   ;;  %v5939_v36 = vld [vmem:[%s7526_s1 + $0xf8] ss:$12 sps:$4 sm:$0xff]  }
  0x13   :  { %381 = vmatpush1.bf16.msra.mxu0 %v5521_v15  ;;  %425 = vmatprep.subr.bf16.mxu1 %v5362_v1  ;;  %v469_v57 = vor.u32 %v468_v55, %v464_v54  ;;  %v459_v61 = vshll.u32 %v159_v60, 16  ;;  %v457_v62 = vshrl.u32 %v159_v60, 16  ;;  %v5901_v30 = vld [vmem:[%s7526_s1 + $0xc8] ss:$12 sps:$4 sm:$0xff]   ;;  %v5920_v33 = vld [vmem:[%s7526_s1 + $0xe0] ss:$12 sps:$4 sm:$0xff]  }
  0x14   :  { %382 = vmatprep.subr.bf16.mxu0 %v5527_v16  ;;  %4298 = vmatprep.mubr.msk.bf16.mxu0 %vm368_vm0, %v174_v41  ;;  %v5912_v32 = vld [vmem:[%s7526_s1 + $0xdc] ss:$12 sps:$4 sm:$0xff]   ;;  %v5950_v38 = vld [vmem:[%s7526_s1 + $0x10c] ss:$12 sps:$4 sm:$0xff]   ;;  %v42_v41 = vld [vmem:[%s7525_s0 + $0x10] sm:$0x3f] }
  0x15   :  { %v461_v63 = vrot.slane %v459_v61, 1  ;;  %v5944_v37 = vld [vmem:[%s7526_s1 + $0xf0] ss:$12 sps:$4 sm:$0xff]  }
  0x16   :  { %426 = vmatpush1.bf16.msra.mxu1 %v5533_v17  ;;  %v5958_v39 = vld [vmem:[%s7526_s1 + $0x110] ss:$12 sps:$4 sm:$0xff]  }
  0x17   :  { %383 = vmatpush1.bf16.msra.mxu0 %v5540_v18  ;;  %427 = vmatprep.subr.bf16.mxu1 %v5362_v1  ;;  %v47_v44 = vld [vmem:[%s7525_s0 + $0x38] sm:$0x3f] }
  0x18   :  { %384 = vmatprep.subr.bf16.mxu0 %v5546_v19 }
  0x1a   :  { %428 = vmatpush1.bf16.msra.mxu1 %v5552_v20 }
  0x1b   :  { %385 = vmatpush1.bf16.msra.mxu0 %v5559_v21  ;;  %429 = vmatprep.subr.bf16.mxu1 %v5362_v1 }
  0x1c   :  { %386 = vmatprep.subr.bf16.mxu0 %v5565_v22 }
  0x1e   :  { %430 = vmatpush1.bf16.msra.mxu1 %v5571_v23 }
  0x1f   :  { %387 = vmatpush1.bf16.msra.mxu0 %v5578_v24  ;;  %431 = vmatprep.subr.bf16.mxu1 %v5362_v1 }
  0x20   :  { %388 = vmatprep.subr.bf16.mxu0 %v5590_v27 }
  0x22   :  { %432 = vmatpush1.bf16.msra.mxu1 %v5595_v29 }
  0x23   :  { %389 = vmatpush1.bf16.msra.mxu0 %v5609_v34  ;;  %433 = vmatprep.subr.bf16.mxu1 %v5362_v1 }
  0x24   :  { %390 = vmatprep.subr.bf16.mxu0 %v5615_v35 }
  0x26   :  { %434 = vmatpush1.bf16.msra.mxu1 %v5627_v40 }
  0x27   :  { %391 = vmatpush1.bf16.msra.mxu0 %v5634_v42  ;;  %435 = vmatprep.subr.bf16.mxu1 %v5362_v1 }
  0x28   :  { %392 = vmatprep.subr.bf16.mxu0 %v5640_v43 }
  0x2a   :  { %436 = vmatpush1.bf16.msra.mxu1 %v5648_v46 }
  0x2b   :  { %393 = vmatpush1.bf16.msra.mxu0 %v5655_v47  ;;  %437 = vmatprep.subr.bf16.mxu1 %v5362_v1 }
  0x2c   :  { %394 = vmatprep.subr.bf16.mxu0 %v5661_v48 }
  0x2e   :  { %438 = vmatpush1.bf16.msra.mxu1 %v5667_v52 }
  0x2f   :  { %395 = vmatpush1.bf16.msra.mxu0 %v5674_v53  ;;  %517 = vmatprep.subr.bf16.mxu1 %v5362_v1 }
  0x30   :  { %474 = vmatprep.subr.bf16.mxu0 %v5434_v0  ;;  %v5735_v0 = vld [vmem:[%s7526_s1 + $0x4] ss:$12 sps:$4 sm:$0xff]  }
  0x31   :  { %448 = vmatmul.mubr.bf16.vlgmr.msra.gmra.mrb[0].mxu1 %v167_v56 }
  0x32   :  { %518 = vmatpush1.bf16.msra.mxu1 %v5440_v2  ;;  %405 = vmatmul.mubr.bf16.vlgmr.msra.gmra.mrb[0].mxu0 %v167_v56  ;;  %v41_v2 = vld [vmem:[%s7525_s0 + $0x8] sm:$0xff] }
  0x33   :  { %475 = vmatpush1.bf16.msra.mxu0 %v5446_v3  ;;  %519 = vmatprep.subr.bf16.mxu1 %v5362_v1  ;;  %v5744_v3 = vld [vmem:[%s7526_s1 + $0x8] ss:$12 sps:$4 sm:$0xff]  }
  0x34   :  { %476 = vmatprep.subr.bf16.mxu0 %v5452_v4  ;;  %4301 = vmatprep.mubr.msk.bf16.mxu1 %vm368_vm0, %v469_v57  ;;  %v43_v4 = vld [vmem:[%s7525_s0 + $0x18] sm:$0x3f] }
  0x35   :  { %4300 = vmatprep.mubr.msk.bf16.mxu0 %vm368_vm0, %v469_v57 }
  0x36   :  { %520 = vmatpush1.bf16.msra.mxu1 %v5459_v5  ;;  %v462_v5 = vor.u32 %v461_v63, %v457_v62 }
  0x37   :  { %477 = vmatpush1.bf16.msra.mxu0 %v5464_v6  ;;  %521 = vmatprep.subr.bf16.mxu1 %v5362_v1  ;;  %v5755_v6 = vld [vmem:[%s7526_s1] ss:$12 sps:$4 sm:$0xff]  }
  0x38   :  { %478 = vmatprep.subr.bf16.mxu0 %v5470_v7  ;;  %v5760_v7 = vld [vmem:[%s7526_s1 + $0x1c] ss:$12 sps:$4 sm:$0xff]  }
  0x3a   :  { %522 = vmatpush1.bf16.msra.mxu1 %v5476_v8  ;;  %v5766_v8 = vld [vmem:[%s7526_s1 + $0x20] ss:$12 sps:$4 sm:$0xff]  }
  0x3b   :  { %479 = vmatpush1.bf16.msra.mxu0 %v5483_v9  ;;  %523 = vmatprep.subr.bf16.mxu1 %v5362_v1  ;;  %v97_v9 = vpack.c.bf16 %v43_v4, %v41_v2 }
  0x3c   :  { %480 = vmatprep.subr.bf16.mxu0 %v5489_v10  ;;  %v5774_v10 = vld [vmem:[%s7526_s1 + $0x18] ss:$12 sps:$4 sm:$0xff]  }
  0x3e   :  { %524 = vmatpush1.bf16.msra.mxu1 %v5495_v11  ;;  %v5779_v11 = vld [vmem:[%s7526_s1 + $0x34] ss:$12 sps:$4 sm:$0xff]  }
  0x3f   :  { %481 = vmatpush1.bf16.msra.mxu0 %v5502_v12  ;;  %525 = vmatprep.subr.bf16.mxu1 %v5362_v1  ;;  %v5785_v12 = vld [vmem:[%s7526_s1 + $0x38] ss:$12 sps:$4 sm:$0xff]  }
  0x40   :  { %482 = vmatprep.subr.bf16.mxu0 %v5508_v13  ;;  %v5795_v13 = vld [vmem:[%s7526_s1 + $0x30] ss:$12 sps:$4 sm:$0xff]  }
  0x42   :  { %526 = vmatpush1.bf16.msra.mxu1 %v5514_v14  ;;  %v5800_v14 = vld [vmem:[%s7526_s1 + $0x4c] ss:$12 sps:$4 sm:$0xff]  }
  0x43   :  { %483 = vmatpush1.bf16.msra.mxu0 %v5521_v15  ;;  %527 = vmatprep.subr.bf16.mxu1 %v5362_v1  ;;  %v5806_v15 = vld [vmem:[%s7526_s1 + $0x50] ss:$12 sps:$4 sm:$0xff]  }
  0x44   :  { %484 = vmatprep.subr.bf16.mxu0 %v5527_v16  ;;  %v5814_v16 = vld [vmem:[%s7526_s1 + $0x48] ss:$12 sps:$4 sm:$0xff]  }
  0x46   :  { %528 = vmatpush1.bf16.msra.mxu1 %v5533_v17  ;;  %v5820_v17 = vld [vmem:[%s7526_s1 + $0x64] ss:$12 sps:$4 sm:$0xff]  }
  0x47   :  { %485 = vmatpush1.bf16.msra.mxu0 %v5540_v18  ;;  %529 = vmatprep.subr.bf16.mxu1 %v5362_v1  ;;  %v5825_v18 = vld [vmem:[%s7526_s1 + $0x60] ss:$12 sps:$4 sm:$0xff]  }
  0x48   :  { %486 = vmatprep.subr.bf16.mxu0 %v5546_v19  ;;  %v5830_v19 = vld [vmem:[%s7526_s1 + $0x68] ss:$12 sps:$4 sm:$0xff]  }
  0x4a   :  { %530 = vmatpush1.bf16.msra.mxu1 %v5552_v20  ;;  %v5836_v20 = vld [vmem:[%s7526_s1 + $0x7c] ss:$12 sps:$4 sm:$0xff]  }
  0x4b   :  { %487 = vmatpush1.bf16.msra.mxu0 %v5559_v21  ;;  %531 = vmatprep.subr.bf16.mxu1 %v5362_v1  ;;  %v5844_v21 = vld [vmem:[%s7526_s1 + $0x80] ss:$12 sps:$4 sm:$0xff]  }
  0x4c   :  { %488 = vmatprep.subr.bf16.mxu0 %v5565_v22  ;;  %v5849_v22 = vld [vmem:[%s7526_s1 + $0x78] ss:$12 sps:$4 sm:$0xff]  }
  0x4e   :  { %532 = vmatpush1.bf16.msra.mxu1 %v5571_v23  ;;  %v5855_v23 = vld [vmem:[%s7526_s1 + $0x94] ss:$12 sps:$4 sm:$0xff]  }
  0x4f   :  { %489 = vmatpush1.bf16.msra.mxu0 %v5578_v24  ;;  %533 = vmatprep.subr.bf16.mxu1 %v5362_v1  ;;  %v5863_v24 = vld [vmem:[%s7526_s1 + $0x98] ss:$12 sps:$4 sm:$0xff]  }
  0x50   :  { %490 = vmatprep.subr.bf16.mxu0 %v5590_v27  ;;  %v5882_v27 = vld [vmem:[%s7526_s1 + $0xb0] ss:$12 sps:$4 sm:$0xff]  }
  0x52   :  { %534 = vmatpush1.bf16.msra.mxu1 %v5595_v29  ;;  %v5893_v29 = vld [vmem:[%s7526_s1 + $0xc4] ss:$12 sps:$4 sm:$0xff]  }
  0x53   :  { %491 = vmatpush1.bf16.msra.mxu0 %v5609_v34  ;;  %535 = vmatprep.subr.bf16.mxu1 %v5362_v1  ;;  %v5925_v34 = vld [vmem:[%s7526_s1 + $0xd8] ss:$12 sps:$4 sm:$0xff]  }
  0x54   :  { %492 = vmatprep.subr.bf16.mxu0 %v5615_v35  ;;  %v5931_v35 = vld [vmem:[%s7526_s1 + $0xf4] ss:$12 sps:$4 sm:$0xff]  }
  0x56   :  { %536 = vmatpush1.bf16.msra.mxu1 %v5627_v40  ;;  %v40_v40 = vld [vmem:[%s7525_s0] sm:$0xff] }
  0x57   :  { %493 = vmatpush1.bf16.msra.mxu0 %v5634_v42  ;;  %537 = vmatprep.subr.bf16.mxu1 %v5362_v1  ;;  %v5969_v42 = vld [vmem:[%s7526_s1 + $0x108] ss:$12 sps:$4 sm:$0xff]   ;;  %v96_v45 = vpack.c.bf16 %v42_v41, %v40_v40 }
  0x58   :  { %494 = vmatprep.subr.bf16.mxu0 %v5640_v43  ;;  %v45_v43 = vld [vmem:[%s7525_s0 + $0x28] sm:$0xff] }
  0x5a   :  { %538 = vmatpush1.bf16.msra.mxu1 %v5648_v46  ;;  %v99_v46 = vpack.c.bf16 %v47_v44, %v45_v43 }
  0x5b   :  { %495 = vmatpush1.bf16.msra.mxu0 %v5655_v47  ;;  %539 = vmatprep.subr.bf16.mxu1 %v5362_v1 }
  0x5c   :  { %496 = vmatprep.subr.bf16.mxu0 %v5661_v48 }
  0x5e   :  { %540 = vmatpush1.bf16.msra.mxu1 %v5667_v52 }
  0x5f   :  { %497 = vmatpush1.bf16.msra.mxu0 %v5674_v53  ;;  %796 = vmatprep.subr.bf16.mxu1 %v5362_v1 }
  0x60   :  { %753 = vmatprep.subr.bf16.mxu0 %v5735_v0 }
  0x61   :  { %550 = vmatmul.mubr.bf16.vlgmr.msra.gmra.mrb[4].mxu1 %v462_v5 }
  0x62   :  { %797 = vmatpush1.bf16.msra.mxu1 %v5744_v3  ;;  %507 = vmatmul.mubr.bf16.vlgmr.msra.gmra.mrb[4].mxu0 %v462_v5 }
  0x63   :  { %754 = vmatpush1.bf16.msra.mxu0 %v5755_v6  ;;  %798 = vmatprep.subr.bf16.mxu1 %v5362_v1 }
  0x64   :  { %755 = vmatprep.subr.bf16.mxu0 %v5760_v7  ;;  %4339 = vmatprep.mubr.msk.bf16.mxu1 %vm368_vm0, %v97_v9 }
  0x65   :  { %4338 = vmatprep.mubr.msk.bf16.mxu0 %vm368_vm0, %v97_v9 }
  0x66   :  { %799 = vmatpush1.bf16.msra.mxu1 %v5766_v8 }
  0x67   :  { %756 = vmatpush1.bf16.msra.mxu0 %v5774_v10  ;;  %800 = vmatprep.subr.bf16.mxu1 %v5362_v1 }
  0x68   :  { %757 = vmatprep.subr.bf16.mxu0 %v5779_v11 }
  0x6a   :  { %801 = vmatpush1.bf16.msra.mxu1 %v5785_v12 }
  0x6b   :  { %758 = vmatpush1.bf16.msra.mxu0 %v5795_v13  ;;  %802 = vmatprep.subr.bf16.mxu1 %v5362_v1 }
  0x6c   :  { %759 = vmatprep.subr.bf16.mxu0 %v5800_v14 }
  0x6e   :  { %803 = vmatpush1.bf16.msra.mxu1 %v5806_v15 }
  0x6f   :  { %760 = vmatpush1.bf16.msra.mxu0 %v5814_v16  ;;  %804 = vmatprep.subr.bf16.mxu1 %v5362_v1 }
  0x70   :  { %761 = vmatprep.subr.bf16.mxu0 %v5820_v17 }
  0x72   :  { %805 = vmatpush1.bf16.msra.mxu1 %v5830_v19 }
  0x73   :  { %762 = vmatpush1.bf16.msra.mxu0 %v5825_v18  ;;  %806 = vmatprep.subr.bf16.mxu1 %v5362_v1 }
  0x74   :  { %763 = vmatprep.subr.bf16.mxu0 %v5836_v20 }
  0x76   :  { %807 = vmatpush1.bf16.msra.mxu1 %v5844_v21 }
  0x77   :  { %764 = vmatpush1.bf16.msra.mxu0 %v5849_v22  ;;  %808 = vmatprep.subr.bf16.mxu1 %v5362_v1 }
  0x78   :  { %765 = vmatprep.subr.bf16.mxu0 %v5855_v23 }
  0x7a   :  { %809 = vmatpush1.bf16.msra.mxu1 %v5863_v24 }
  0x7b   :  { %766 = vmatpush1.bf16.msra.mxu0 %v5868_v25  ;;  %810 = vmatprep.subr.bf16.mxu1 %v5362_v1 }
  0x7c   :  { %767 = vmatprep.subr.bf16.mxu0 %v5874_v26 }
  0x7e   :  { %811 = vmatpush1.bf16.msra.mxu1 %v5882_v27 }
  0x7f   :  { %768 = vmatpush1.bf16.msra.mxu0 %v5887_v28  ;;  %812 = vmatprep.subr.bf16.mxu1 %v5362_v1 }
  0x80   :  { %769 = vmatprep.subr.bf16.mxu0 %v5893_v29 }
  0x82   :  { %813 = vmatpush1.bf16.msra.mxu1 %v5901_v30 }
  0x83   :  { %770 = vmatpush1.bf16.msra.mxu0 %v5906_v31  ;;  %814 = vmatprep.subr.bf16.mxu1 %v5362_v1 }
  0x84   :  { %771 = vmatprep.subr.bf16.mxu0 %v5912_v32 }
  0x86   :  { %815 = vmatpush1.bf16.msra.mxu1 %v5920_v33 }
  0x87   :  { %772 = vmatpush1.bf16.msra.mxu0 %v5925_v34  ;;  %816 = vmatprep.subr.bf16.mxu1 %v5362_v1 }
  0x88   :  { %773 = vmatprep.subr.bf16.mxu0 %v5931_v35 }
  0x8a   :  { %817 = vmatpush1.bf16.msra.mxu1 %v5939_v36 }
  0x8b   :  { %774 = vmatpush1.bf16.msra.mxu0 %v5944_v37  ;;  %818 = vmatprep.subr.bf16.mxu1 %v5362_v1 }
  0x8c   :  { %775 = vmatprep.subr.bf16.mxu0 %v5950_v38 }
  0x8e   :  { %819 = vmatpush1.bf16.msra.mxu1 %v5958_v39 }
  0x8f   :  { %776 = vmatpush1.bf16.msra.mxu0 %v5969_v42  ;;  %883 = vmatprep.subr.bf16.mxu1 %v5362_v1 }
  0x90   :  { %840 = vmatprep.subr.bf16.mxu0 %v5735_v0 }
  0x91   :  { %829 = vmatmul.mubr.bf16.vlgmr.msra.gmra.mrb[8].mxu1 %v96_v45 }
  0x92   :  { %884 = vmatpush1.bf16.msra.mxu1 %v5744_v3  ;;  %786 = vmatmul.mubr.bf16.vlgmr.msra.gmra.mrb[0].mxu0 %v96_v45 }
  0x93   :  { %841 = vmatpush1.bf16.msra.mxu0 %v5755_v6  ;;  %885 = vmatprep.subr.bf16.mxu1 %v5362_v1 }
  0x94   :  { %842 = vmatprep.subr.bf16.mxu0 %v5760_v7  ;;  %4341 = vmatprep.mubr.msk.bf16.mxu1 %vm368_vm0, %v99_v46 }
  0x95   :  { %4340 = vmatprep.mubr.msk.bf16.mxu0 %vm368_vm0, %v99_v46 }
  0x96   :  { %886 = vmatpush1.bf16.msra.mxu1 %v5766_v8 }
  0x97   :  { %843 = vmatpush1.bf16.msra.mxu0 %v5774_v10  ;;  %887 = vmatprep.subr.bf16.mxu1 %v5362_v1 }
  0x98   :  { %844 = vmatprep.subr.bf16.mxu0 %v5779_v11 }
  0x9a   :  { %888 = vmatpush1.bf16.msra.mxu1 %v5785_v12 }
  0x9b   :  { %845 = vmatpush1.bf16.msra.mxu0 %v5795_v13  ;;  %889 = vmatprep.subr.bf16.mxu1 %v5362_v1 }
  0x9c   :  { %846 = vmatprep.subr.bf16.mxu0 %v5800_v14 }
  0x9e   :  { %890 = vmatpush1.bf16.msra.mxu1 %v5806_v15 }
  0x9f   :  { %847 = vmatpush1.bf16.msra.mxu0 %v5814_v16  ;;  %891 = vmatprep.subr.bf16.mxu1 %v5362_v1 }
  0xa0   :  { %848 = vmatprep.subr.bf16.mxu0 %v5820_v17 }
  0xa2   :  { %892 = vmatpush1.bf16.msra.mxu1 %v5830_v19 }
  0xa3   :  { %849 = vmatpush1.bf16.msra.mxu0 %v5825_v18  ;;  %893 = vmatprep.subr.bf16.mxu1 %v5362_v1 }
  0xa4   :  { %850 = vmatprep.subr.bf16.mxu0 %v5836_v20 }
  0xa5   :  { %16 = vsyncpa [#allocation5], 0  ;;  %v925_v47 = vld [vmem:[%s7525_s0 + $0x8] sm:$0xfc]  ;;  %v927_v48 = vld [vmem:[%s7525_s0 + $0x18] sm:$0xff]  ;;  %vm1438_vm1 = vcmask 719872  }
  0xa6   :  { %894 = vmatpush1.bf16.msra.mxu1 %v5844_v21  ;;  %v44_v49 = vld [vmem:[%s7525_s0 + $0x20] sm:$0xff]  ;;  %v46_v50 = vld [vmem:[%s7525_s0 + $0x30] sm:$0x3f]  ;;  %v982_v52 = vpack.c.bf16 %v927_v48, %v925_v47  ;;  %v6065_v56 = vld [vmem:[%s7526_s1 + $0x25c] ss:$12 sps:$4 sm:$0xff]   ;;  %s5364_s14 = smov 122  }
  0xa7   :  { %851 = vmatpush1.bf16.msra.mxu0 %v5849_v22  ;;  %895 = vmatprep.subr.bf16.mxu1 %v5362_v1  ;;  %v6046_v51 = vld [vmem:[%s7526_s1 + $0x244] ss:$12 sps:$4 sm:$0xff]   ;;  %v98_v53 = vpack.c.bf16 %v46_v50, %v44_v49  ;;  %v6052_v54 = vld [vmem:[%s7526_s1 + $0x248] ss:$12 sps:$4 sm:$0xff]   ;;  %v6059_v55 = vld [vmem:[%s7526_s1 + $0x240] ss:$12 sps:$4 sm:$0xff]  }
  0xa8   :  { %852 = vmatprep.subr.bf16.mxu0 %v5855_v23  ;;  %v988_v57 = vrot.slane %v982_v52, 1  ;;  %v6071_v58 = vld [vmem:[%s7526_s1 + $0x260] ss:$12 sps:$4 sm:$0xff]   ;;  %v6078_v59 = vld [vmem:[%s7526_s1 + $0x258] ss:$12 sps:$4 sm:$0xff]   ;;  %v930_v40 = vld [vmem:[%s7525_s0 + $0x30] sm:$0xff] }
  0xa9   :  { %v6084_v60 = vld [vmem:[%s7526_s1 + $0x274] ss:$12 sps:$4 sm:$0xff]   ;;  %v6092_v61 = vld [vmem:[%s7526_s1 + $0x278] ss:$12 sps:$4 sm:$0xff]   ;;  %v6099_v62 = vld [vmem:[%s7526_s1 + $0x270] ss:$12 sps:$4 sm:$0xff]  }
  0xaa   :  { %896 = vmatpush1.bf16.msra.mxu1 %v5863_v24  ;;  %v6105_v63 = vld [vmem:[%s7526_s1 + $0x28c] ss:$12 sps:$4 sm:$0xff]   ;;  %v6111_v0 = vld [vmem:[%s7526_s1 + $0x290] ss:$12 sps:$4 sm:$0xff]   ;;  %v6118_v2 = vld [vmem:[%s7526_s1 + $0x288] ss:$12 sps:$4 sm:$0xff]  }
  0xab   :  { %853 = vmatpush1.bf16.msra.mxu0 %v5868_v25  ;;  %897 = vmatprep.subr.bf16.mxu1 %v5362_v1  ;;  %v6124_v3 = vld [vmem:[%s7526_s1 + $0x2a4] ss:$12 sps:$4 sm:$0xff]   ;;  %v6130_v4 = vld [vmem:[%s7526_s1 + $0x2a8] ss:$12 sps:$4 sm:$0xff]   ;;  %v6137_v5 = vld [vmem:[%s7526_s1 + $0x2a0] ss:$12 sps:$4 sm:$0xff]  }
  0xac   :  { %854 = vmatprep.subr.bf16.mxu0 %v5874_v26  ;;  %v6143_v6 = vld [vmem:[%s7526_s1 + $0x2bc] ss:$12 sps:$4 sm:$0xff]   ;;  %v6149_v7 = vld [vmem:[%s7526_s1 + $0x2c0] ss:$12 sps:$4 sm:$0xff]   ;;  %v6156_v8 = vld [vmem:[%s7526_s1 + $0x2b8] ss:$12 sps:$4 sm:$0xff]  }
  0xad   :  { %v6162_v9 = vld [vmem:[%s7526_s1 + $0x2d4] ss:$12 sps:$4 sm:$0xff]   ;;  %v6168_v10 = vld [vmem:[%s7526_s1 + $0x2d8] ss:$12 sps:$4 sm:$0xff]   ;;  %v6175_v11 = vld [vmem:[%s7526_s1 + $0x2d0] ss:$12 sps:$4 sm:$0xff]  }
  0xae   :  { %898 = vmatpush1.bf16.msra.mxu1 %v5882_v27  ;;  %v6181_v12 = vld [vmem:[%s7526_s1 + $0x2ec] ss:$12 sps:$4 sm:$0xff]   ;;  %v6187_v13 = vld [vmem:[%s7526_s1 + $0x2f0] ss:$12 sps:$4 sm:$0xff]   ;;  %v6194_v14 = vld [vmem:[%s7526_s1 + $0x2e8] ss:$12 sps:$4 sm:$0xff]  }
  0xaf   :  { %855 = vmatpush1.bf16.msra.mxu0 %v5887_v28  ;;  %899 = vmatprep.subr.bf16.mxu1 %v5362_v1  ;;  %v6200_v15 = vld [vmem:[%s7526_s1 + $0x304] ss:$12 sps:$4 sm:$0xff]   ;;  %v6206_v16 = vld [vmem:[%s7526_s1 + $0x308] ss:$12 sps:$4 sm:$0xff]   ;;  %v6213_v17 = vld [vmem:[%s7526_s1 + $0x300] ss:$12 sps:$4 sm:$0xff]  }
  0xb0   :  { %856 = vmatprep.subr.bf16.mxu0 %v5893_v29  ;;  %v6219_v18 = vld [vmem:[%s7526_s1 + $0x31c] ss:$12 sps:$4 sm:$0xff]   ;;  %v6225_v19 = vld [vmem:[%s7526_s1 + $0x320] ss:$12 sps:$4 sm:$0xff]   ;;  %v6232_v20 = vld [vmem:[%s7526_s1 + $0x318] ss:$12 sps:$4 sm:$0xff]  }
  0xb1   :  { %v6238_v21 = vld [vmem:[%s7526_s1 + $0x334] ss:$12 sps:$4 sm:$0xff]   ;;  %v6244_v22 = vld [vmem:[%s7526_s1 + $0x338] ss:$12 sps:$4 sm:$0xff]   ;;  %v6257_v25 = vld [vmem:[%s7526_s1 + $0x330] ss:$12 sps:$4 sm:$0xff]  }
  0xb2   :  { %900 = vmatpush1.bf16.msra.mxu1 %v5901_v30  ;;  %v924_v23 = vld [vmem:[%s7525_s0] sm:$0xfc]  ;;  %v926_v24 = vld [vmem:[%s7525_s0 + $0x10] sm:$0xff]  ;;  %v6263_v26 = vld [vmem:[%s7526_s1 + $0x34c] ss:$12 sps:$4 sm:$0xff]   ;;  %vm1704_vm2 = vcmask 1040384  }
  0xb3   :  { %857 = vmatpush1.bf16.msra.mxu0 %v5906_v31  ;;  %901 = vmatprep.subr.bf16.mxu1 %v5362_v1  ;;  %v981_v27 = vpack.c.bf16 %v926_v24, %v924_v23  ;;  %v929_v28 = vld [vmem:[%s7525_s0 + $0x28] sm:$0xfc]  ;;  %v931_v29 = vld [vmem:[%s7525_s0 + $0x38] sm:$0xff]  ;;  %vm1483_vm3 = vcmask 998400   ;;  %vm1505_vm4 = vcmask 277504   ;;  %vm1508_vm5 = vcmask 275456  }
  0xb4   :  { %858 = vmatprep.subr.bf16.mxu0 %v5912_v32  ;;  %v6275_v30 = vld [vmem:[%s7526_s1 + $0x350] ss:$12 sps:$4 sm:$0xff]   ;;  %v6282_v31 = vld [vmem:[%s7526_s1 + $0x348] ss:$12 sps:$4 sm:$0xff]   ;;  %v984_v32 = vpack.c.bf16 %v931_v29, %v929_v28  ;;  %vm2836_vm6 = vcmask 261120   ;;  %vm2839_vm7 = vcmask 254976  }
  0xb5   :  { %v5119_v29 = vld [vmem:[%s7528_s3 + $0xa8] ss:$8 sps:$4 sm:$0xff]   ;;  %s5365_s22 = smov 112   ;;  %vm2862_vm8 = vcmask 916480   ;;  %vm3036_vm9 = vcmask 130048   ;;  %vm3968_vm10 = vcmask 1043456  }
  0xb6   :  { %902 = vmatpush1.bf16.msra.mxu1 %v5920_v33  ;;  %v987_v33 = vrot.slane %v981_v27, 1  ;;  %vm5367_vm11 = vmmov 0   ;;  %vm3964_vm12 = vcmask 982016   ;;  %vm4108_vm13 = vcmask 1041408  }
  0xb7   :  { %859 = vmatpush1.bf16.msra.mxu0 %v5925_v34  ;;  %903 = vmatprep.subr.bf16.mxu1 %v5362_v1  ;;  %v1272_v34 = vrot.slane %v984_v32, 1  ;;  %vm4104_vm14 = vcmask 687104   ;;  %vm4195_vm15 = vcmask 73728  }
  0xb8   :  { %860 = vmatprep.subr.bf16.mxu0 %v5931_v35 }
  0xba   :  { %904 = vmatpush1.bf16.msra.mxu1 %v5939_v36 }
  0xbb   :  { %861 = vmatpush1.bf16.msra.mxu0 %v5944_v37  ;;  %905 = vmatprep.subr.bf16.mxu1 %v5362_v1 }
  0xbc   :  { %862 = vmatprep.subr.bf16.mxu0 %v5950_v38 }
  0xbe   :  { %906 = vmatpush1.bf16.msra.mxu1 %v5958_v39  ;;  %v928_v39 = vld [vmem:[%s7525_s0 + $0x20] sm:$0xfc] }
  0xbf   :  { %863 = vmatpush1.bf16.msra.mxu0 %v5969_v42  ;;  %1228 = vmatprep.subr.bf16.mxu1 %v5362_v1  ;;  %v983_v41 = vpack.c.bf16 %v930_v40, %v928_v39 }
  0xc0   :  { %1185 = vmatprep.subr.bf16.mxu0 %v6046_v51 }
  0xc1   :  { %916 = vmatmul.mubr.bf16.vlgmr.msra.gmra.mrb[12].mxu1 %v98_v53  ;;  %v1271_v42 = vrot.slane %v983_v41, 1 }
  0xc2   :  { %1229 = vmatpush1.bf16.msra.mxu1 %v6052_v54  ;;  %873 = vmatmul.mubr.bf16.vlgmr.msra.gmra.mrb[4].mxu0 %v98_v53 }
  0xc3   :  { %1186 = vmatpush1.bf16.msra.mxu0 %v6059_v55  ;;  %1230 = vmatprep.subr.bf16.mxu1 %v5362_v1 }
  0xc4   :  { %1187 = vmatprep.subr.bf16.mxu0 %v6065_v56  ;;  %4427 = vmatprep.mubr.msk.bf16.mxu1 %vm368_vm0, %v988_v57 }
  0xc5   :  { %4426 = vmatprep.mubr.msk.bf16.mxu0 %vm368_vm0, %v988_v57 }
  0xc6   :  { %1231 = vmatpush1.bf16.msra.mxu1 %v6071_v58 }
  0xc7   :  { %1188 = vmatpush1.bf16.msra.mxu0 %v6078_v59  ;;  %1232 = vmatprep.subr.bf16.mxu1 %v5362_v1 }
  0xc8   :  { %1189 = vmatprep.subr.bf16.mxu0 %v6084_v60 }
  0xca   :  { %1233 = vmatpush1.bf16.msra.mxu1 %v6092_v61 }
  0xcb   :  { %1190 = vmatpush1.bf16.msra.mxu0 %v6099_v62  ;;  %1234 = vmatprep.subr.bf16.mxu1 %v5362_v1 }
  0xcc   :  { %1191 = vmatprep.subr.bf16.mxu0 %v6105_v63 }
  0xce   :  { %1235 = vmatpush1.bf16.msra.mxu1 %v6111_v0 }
  0xcf   :  { %1192 = vmatpush1.bf16.msra.mxu0 %v6118_v2  ;;  %1236 = vmatprep.subr.bf16.mxu1 %v5362_v1 }
  0xd0   :  { %1193 = vmatprep.subr.bf16.mxu0 %v6124_v3 }
  0xd2   :  { %1237 = vmatpush1.bf16.msra.mxu1 %v6130_v4 }
  0xd3   :  { %1194 = vmatpush1.bf16.msra.mxu0 %v6137_v5  ;;  %1238 = vmatprep.subr.bf16.mxu1 %v5362_v1 }
  0xd4   :  { %1195 = vmatprep.subr.bf16.mxu0 %v6143_v6 }
  0xd6   :  { %1239 = vmatpush1.bf16.msra.mxu1 %v6149_v7 }
  0xd7   :  { %1196 = vmatpush1.bf16.msra.mxu0 %v6156_v8  ;;  %1240 = vmatprep.subr.bf16.mxu1 %v5362_v1 }
  0xd8   :  { %1197 = vmatprep.subr.bf16.mxu0 %v6162_v9 }
  0xda   :  { %1241 = vmatpush1.bf16.msra.mxu1 %v6168_v10 }
  0xdb   :  { %1198 = vmatpush1.bf16.msra.mxu0 %v6175_v11  ;;  %1242 = vmatprep.subr.bf16.mxu1 %v5362_v1 }
  0xdc   :  { %1199 = vmatprep.subr.bf16.mxu0 %v6181_v12 }
  0xde   :  { %1243 = vmatpush1.bf16.msra.mxu1 %v6187_v13 }
  0xdf   :  { %1200 = vmatpush1.bf16.msra.mxu0 %v6194_v14  ;;  %1244 = vmatprep.subr.bf16.mxu1 %v5362_v1 }
  0xe0   :  { %1201 = vmatprep.subr.bf16.mxu0 %v6200_v15 }
  0xe2   :  { %1245 = vmatpush1.bf16.msra.mxu1 %v6206_v16 }
  0xe3   :  { %1202 = vmatpush1.bf16.msra.mxu0 %v6213_v17  ;;  %1246 = vmatprep.subr.bf16.mxu1 %v5362_v1 }
  0xe4   :  { %1203 = vmatprep.subr.bf16.mxu0 %v6219_v18 }
  0xe6   :  { %1247 = vmatpush1.bf16.msra.mxu1 %v6225_v19 }
  0xe7   :  { %1204 = vmatpush1.bf16.msra.mxu0 %v6232_v20  ;;  %1248 = vmatprep.subr.bf16.mxu1 %v5362_v1 }
  0xe8   :  { %1205 = vmatprep.subr.bf16.mxu0 %v6238_v21 }
  0xea   :  { %1249 = vmatpush1.bf16.msra.mxu1 %v6244_v22 }
  0xeb   :  { %1206 = vmatpush1.bf16.msra.mxu0 %v6257_v25  ;;  %1250 = vmatprep.subr.bf16.mxu1 %v5362_v1 }
  0xec   :  { %1207 = vmatprep.subr.bf16.mxu0 %v6263_v26 }
  0xee   :  { %1251 = vmatpush1.bf16.msra.mxu1 %v6275_v30 }
  0xef   :  { %1208 = vmatpush1.bf16.msra.mxu0 %v6282_v31  ;;  %1320 = vmatprep.subr.bf16.mxu1 %v5362_v1 }
  0xf0   :  { %1277 = vmatprep.subr.bf16.mxu0 %v6046_v51 }
  0xf1   :  { %1261 = vmatmul.mubr.bf16.vlgmr.msra.gmra.mrb[16].mxu1 %v987_v33 }
  0xf2   :  { %1218 = vmatmul.mubr.bf16.vlgmr.msra.gmra.mrb[0].mxu0 %v987_v33  ;;  %1321 = vmatpush1.bf16.msra.mxu1 %v6052_v54 }
  0xf3   :  { %1278 = vmatpush1.bf16.msra.mxu0 %v6059_v55  ;;  %1322 = vmatprep.subr.bf16.mxu1 %v5362_v1 }
  0xf4   :  { %1279 = vmatprep.subr.bf16.mxu0 %v6065_v56  ;;  %4429 = vmatprep.mubr.msk.bf16.mxu1 %vm368_vm0, %v1272_v34 }
  0xf5   :  { %4428 = vmatprep.mubr.msk.bf16.mxu0 %vm368_vm0, %v1272_v34  ;;  %v5124_v34 = vld [vmem:[%s7528_s3 + $0xbc] ss:$8 sps:$4 sm:$0xff]  }
  0xf6   :  { %1323 = vmatpush1.bf16.msra.mxu1 %v6071_v58 }
  0xf7   :  { %1280 = vmatpush1.bf16.msra.mxu0 %v6078_v59  ;;  %1324 = vmatprep.subr.bf16.mxu1 %v5362_v1  ;;  %v1375_v59 = vlaneseq }
  0xf8   :  { %1281 = vmatprep.subr.bf16.mxu0 %v6084_v60 }
  0xf9   :  { %v1376_v60 = vshrl.u32 %v1375_v59, 7  ;;  %v5142_v59 = vld [vmem:[%s7528_s3 + $0x11c] ss:$8 sps:$4 sm:$0xff]  }
  0xfa   :  { %1325 = vmatpush1.bf16.msra.mxu1 %v6092_v61 }
  0xfb   :  { %1282 = vmatpush1.bf16.msra.mxu0 %v6099_v62  ;;  %1326 = vmatprep.subr.bf16.mxu1 %v5362_v1  ;;  %v6343_v61 = vsub.s32 0, %v1376_v60  ;;  %v1373_v62 = vld [vmem:[%s7527_s2] sm:$0x7]  ;;  %s5363_s2 = smov 88  }
  0xfc   :  { %1283 = vmatprep.subr.bf16.mxu0 %v6105_v63  ;;  %v6348_v63 = vsub.s32 1, %v1376_v60 }
  0xfe   :  { %1327 = vmatpush1.bf16.msra.mxu1 %v6111_v0  ;;  %v1385_v0 = vsub.s32 2, %v1376_v60 }
  0xff   :  { %1284 = vmatpush1.bf16.msra.mxu0 %v6118_v2  ;;  %1328 = vmatprep.subr.bf16.mxu1 %v5362_v1  ;;  %v1378_v2 = vrot.slane %v1373_v62, %v6343_v61 }
 0x100   :  { %1285 = vmatprep.subr.bf16.mxu0 %v6124_v3  ;;  %v1382_v3 = vrot.slane %v1373_v62, %v6348_v63 }
 0x102   :  { %1329 = vmatpush1.bf16.msra.mxu1 %v6130_v4 }
 0x103   :  { %1286 = vmatpush1.bf16.msra.mxu0 %v6137_v5  ;;  %1330 = vmatprep.subr.bf16.mxu1 %v5362_v1 }
 0x104   :  { %v449_v35 = vpop.f32.mrb[0].mxu1  ;;  %1287 = vmatprep.subr.bf16.mxu0 %v6143_v6  ;;  %v1386_v6 = vrot.slane %v1373_v62, %v1385_v0  ;;  %v5140_v62 = vld [vmem:[%s7528_s3 + $0x118] ss:$8 sps:$4 sm:$0xff]  }
 0x105   :  { %v451_v36 = vpop.f32.mrb[1].mxu1 }
 0x106   :  { %v452_v37 = vpop.f32.mrb[2].mxu1  ;;  %1331 = vmatpush1.bf16.msra.mxu1 %v6149_v7 }
 0x107   :  { %v454_v38 = vpop.f32.mrb[3].mxu1  ;;  %1288 = vmatpush1.bf16.msra.mxu0 %v6156_v8  ;;  %1332 = vmatprep.subr.bf16.mxu1 %v5362_v1 }
 0x108   :  { %1289 = vmatprep.subr.bf16.mxu0 %v6162_v9 }
 0x10a   :  { %1333 = vmatpush1.bf16.msra.mxu1 %v6168_v10 }
 0x10b   :  { %1290 = vmatpush1.bf16.msra.mxu0 %v6175_v11  ;;  %1334 = vmatprep.subr.bf16.mxu1 %v5362_v1 }
 0x10c   :  { %1291 = vmatprep.subr.bf16.mxu0 %v6181_v12 }
 0x10e   :  { %1335 = vmatpush1.bf16.msra.mxu1 %v6187_v13 }
 0x10f   :  { %1292 = vmatpush1.bf16.msra.mxu0 %v6194_v14  ;;  %1336 = vmatprep.subr.bf16.mxu1 %v5362_v1 }
 0x110   :  { %1293 = vmatprep.subr.bf16.mxu0 %v6200_v15 }
 0x112   :  { %1337 = vmatpush1.bf16.msra.mxu1 %v6206_v16 }
 0x113   :  { %1294 = vmatpush1.bf16.msra.mxu0 %v6213_v17  ;;  %1338 = vmatprep.subr.bf16.mxu1 %v5362_v1 }
 0x114   :  { %1295 = vmatprep.subr.bf16.mxu0 %v6219_v18 }
 0x116   :  { %1339 = vmatpush1.bf16.msra.mxu1 %v6225_v19 }
 0x117   :  { %1296 = vmatpush1.bf16.msra.mxu0 %v6232_v20  ;;  %1340 = vmatprep.subr.bf16.mxu1 %v5362_v1 }
 0x118   :  { %1297 = vmatprep.subr.bf16.mxu0 %v6238_v21 }
 0x11a   :  { %1341 = vmatpush1.bf16.msra.mxu1 %v6244_v22 }
 0x11b   :  { %1298 = vmatpush1.bf16.msra.mxu0 %v6257_v25  ;;  %1342 = vmatprep.subr.bf16.mxu1 %v5362_v1 }
 0x11c   :  { %1299 = vmatprep.subr.bf16.mxu0 %v6263_v26 }
 0x11e   :  { %1343 = vmatpush1.bf16.msra.mxu1 %v6275_v30  ;;  %v5121_v30 = vld [vmem:[%s7528_s3 + $0xac] ss:$8 sps:$4 sm:$0xff]  }
 0x11f   :  { %1300 = vmatpush1.bf16.msra.mxu0 %v6282_v31  ;;  %1772 = vmatprep.subr.bf16.mxu1 %v5121_v30 }
 0x120   :  { %1711 = vmatprep.subr.bf16.mxu0 %v5121_v30 }
 0x121   :  { %1353 = vmatmul.mubr.bf16.vlgmr.msra.gmra.mrb[20].mxu1 %v1271_v42 }
 0x122   :  { %1310 = vmatmul.mubr.bf16.vlgmr.msra.gmra.mrb[4].mxu0 %v1271_v42  ;;  %v5122_v42 = vld [vmem:[%s7528_s3 + $0xb8] ss:$8 sps:$4 sm:$0xff]   ;;  %1773 = vmatpush1.bf16.msra.mxu1 %v5119_v29 }
 0x123   :  { %1712 = vmatpush1.bf16.msra.mxu0 %v5119_v29  ;;  %1774 = vmatprep.subr.bf16.mxu1 %v5124_v34 }
 0x124   :  { %1713 = vmatprep.subr.bf16.mxu0 %v5124_v34 }
 0x126   :  { %1775 = vmatpush1.bf16.msra.mxu1 %v5122_v42 }
 0x127   :  { %1714 = vmatpush1.bf16.msra.mxu0 %v5122_v42 }
 0x134   :  { %v551_v43 = vpop.f32.mrb[4].mxu1 }
 0x135   :  { %v553_v44 = vpop.f32.mrb[5].mxu1 }
 0x136   :  { %v554_v45 = vpop.f32.mrb[6].mxu1 }
 0x137   :  { %v556_v46 = vpop.f32.mrb[7].mxu1 }
 0x164   :  { %v830_v47 = vpop.f32.mrb[8].mxu1 }
 0x165   :  { %v831_v48 = vadd.f32 %v830_v47, %v449_v35  ;;  %v832_v49 = vpop.f32.mrb[9].mxu1  ;;  %v5127_v47 = vld [vmem:[%s7528_s3 + $0xcc] ss:$8 sps:$4 sm:$0xff]  }
 0x166   :  { %v833_v50 = vpop.f32.mrb[10].mxu1  ;;  %1715 = vmatprep.subr.bf16.mxu0 %v5127_v47  ;;  %1776 = vmatprep.subr.bf16.mxu1 %v5127_v47 }
 0x167   :  { %v834_v51 = vadd.f32 %v833_v50, %v452_v37  ;;  %v835_v52 = vpop.f32.mrb[11].mxu1 }
 0x168   :  { %v5128_v52 = vld [vmem:[%s7528_s3 + $0xd8] ss:$8 sps:$4 sm:$0xff]  }
 0x194   :  { %v917_v53 = vpop.f32.mrb[12].mxu1 }
 0x195   :  { %v918_v54 = vadd.f32 %v917_v53, %v551_v43  ;;  %v919_v55 = vpop.f32.mrb[13].mxu1  ;;  %v5133_v53 = vld [vmem:[%s7528_s3 + $0xec] ss:$8 sps:$4 sm:$0xff]  }
 0x196   :  { %v920_v56 = vpop.f32.mrb[14].mxu1  ;;  %v5136_v55 = vld [vmem:[%s7528_s3 + $0xfc] ss:$8 sps:$4 sm:$0xff]  }
 0x197   :  { %v921_v57 = vadd.f32 %v920_v56, %v554_v45  ;;  %v922_v58 = vpop.f32.mrb[15].mxu1  ;;  %v5134_v56 = vld [vmem:[%s7528_s3 + $0xf8] ss:$8 sps:$4 sm:$0xff]  }
 0x198   :  { %v5137_v58 = vld [vmem:[%s7528_s3 + $0x108] ss:$8 sps:$4 sm:$0xff]  }
 0x1c4   :  { %v1262_v4 = vpop.f32.mrb[16].mxu1 }
 0x1c5   :  { %v1363_v5 = vadd.f32 %v1262_v4, %v831_v48  ;;  %v1219_v7 = vpop.f32.mrb[0].mxu0  ;;  %v1264_v8 = vpop.f32.mrb[17].mxu1  ;;  %v5125_v48 = vld [vmem:[%s7528_s3 + $0xc8] ss:$8 sps:$4 sm:$0xff]   ;;  %v5148_v4 = vld [vmem:[%s7528_s3 + $0x13c] ss:$8 sps:$4 sm:$0xff]  }
 0x1c6   :  { %v6352_v9 = vadd.f32 %v1378_v2, %v1219_v7  ;;  %v1221_v10 = vpop.f32.mrb[1].mxu0  ;;  %v1265_v11 = vpop.f32.mrb[18].mxu1  ;;  %1716 = vmatpush1.bf16.msra.mxu0 %v5125_v48  ;;  %1777 = vmatpush1.bf16.msra.mxu1 %v5125_v48  ;;  %v4450_v7 = vld [vmem:[%s7528_s3 + $0x148] sm:$0x11] }
 0x1c7   :  { %v6354_v12 = vadd.f32 %v1382_v3, %v1221_v10  ;;  %v1366_v13 = vadd.f32 %v1265_v11, %v834_v51  ;;  %v1223_v14 = vpop.f32.mrb[2].mxu0  ;;  %v1267_v15 = vpop.f32.mrb[19].mxu1  ;;  %v1392_v18 = vadd.f32 %v1386_v6, %v1363_v5  ;;  %v5130_v51 = vld [vmem:[%s7528_s3 + $0xdc] ss:$8 sps:$4 sm:$0xff]  }
 0x1c8   :  { %v6356_v16 = vadd.f32 %v1378_v2, %v1223_v14  ;;  %v1225_v17 = vpop.f32.mrb[3].mxu0  ;;  %1717 = vmatprep.subr.bf16.mxu0 %v5130_v51  ;;  %1778 = vmatprep.subr.bf16.mxu1 %v5130_v51  ;;  %v1402_v5 = vmax.f32 %v6352_v9, 0.0  ;;  %v5146_v14 = vld [vmem:[%s7528_s3 + $0x138] ss:$8 sps:$4 sm:$0xff]   ;;  %v4472_v15 = vcombine.high %v4450_v7, %v4450_v7 }
 0x1c9   :  { %v1403_v19 = vmax.f32 %v6354_v12, 0.0  ;;  %v6359_v20 = vadd.f32 %v1382_v3, %v1225_v17  ;;  %v1395_v21 = vadd.f32 %v1386_v6, %v1366_v13  ;;  %v1404_v23 = vmax.f32 %v1392_v18, 0.0 }
 0x1ca   :  { %1718 = vmatpush1.bf16.msra.mxu0 %v5128_v52  ;;  %1779 = vmatpush1.bf16.msra.mxu1 %v5128_v52  ;;  %v4471_v17 = vcombine.low %v4450_v7, %v4450_v7  ;;  %v1405_v18 = vmax.f32 %v6356_v16, 0.0  ;;  %v5153_v16 = vld [vmem:[%s7528_s3 + $0x4] ss:$8 sps:$4 sm:$0xff]   ;;  %v6552_v7 = vld [vmem:[%s7528_s3 + $0x40] ss:$8 sps:$4 sm:$0xff]  }
 0x1cb   :  { %v1406_v22 = vmax.f32 %v6359_v20, 0.0  ;;  %1422 = vrot.lane.b32.xlu0 %v1403_v19, %s5363_s2  ;;  %v1407_v24 = vmax.f32 %v1395_v21, 0.0  ;;  %1719 = vmatprep.subr.bf16.mxu0 %v5133_v53 }
 0x1cc   :  { %1780 = vmatprep.subr.bf16.mxu1 %v5133_v53  ;;  %v1706_v21 = vsel %vm1704_vm2, %v4471_v17, 0  ;;  %v6578_v17 = vld [vmem:[%s7528_s3 + $0x60] ss:$8 sps:$4 sm:$0xff]  }
 0x1cd   :  { %1426 = vrot.lane.b32.xlu1 %v1406_v22, %s5363_s2 }
 0x1cf   :  { %1424 = vrot.lane.b32.xlu0 %v1404_v23, %s5363_s2 }
 0x1d1   :  { %1428 = vrot.lane.b32.xlu1 %v1407_v24, %s5363_s2 }
 0x1f4   :  { %v1354_v25 = vpop.f32.mrb[20].mxu1 }
 0x1f5   :  { %v1369_v26 = vadd.f32 %v1354_v25, %v918_v54  ;;  %v1311_v27 = vpop.f32.mrb[4].mxu0  ;;  %v1356_v28 = vpop.f32.mrb[21].mxu1  ;;  %v5131_v54 = vld [vmem:[%s7528_s3 + $0xe8] ss:$8 sps:$4 sm:$0xff]  }
 0x1f6   :  { %v6376_v31 = vadd.f32 %v1378_v2, %v1311_v27  ;;  %v1313_v32 = vpop.f32.mrb[5].mxu0  ;;  %v1357_v33 = vpop.f32.mrb[22].mxu1  ;;  %1720 = vmatpush1.bf16.msra.mxu0 %v5131_v54  ;;  %1781 = vmatpush1.bf16.msra.mxu1 %v5131_v54 }
 0x1f7   :  { %v1398_v35 = vadd.f32 %v1386_v6, %v1369_v26  ;;  %v6381_v36 = vadd.f32 %v1382_v3, %v1313_v32  ;;  %v1372_v37 = vadd.f32 %v1357_v33, %v921_v57  ;;  %v1315_v38 = vpop.f32.mrb[6].mxu0  ;;  %v1359_v39 = vpop.f32.mrb[23].mxu1  ;;  %1721 = vmatprep.subr.bf16.mxu0 %v5136_v55  ;;  %1782 = vmatprep.subr.bf16.mxu1 %v5136_v55  ;;  %v5139_v57 = vld [vmem:[%s7528_s3 + $0x10c] ss:$8 sps:$4 sm:$0xff]  }
 0x1f8   :  { %v6383_v40 = vadd.f32 %v1378_v2, %v1315_v38  ;;  %v1317_v41 = vpop.f32.mrb[7].mxu0  ;;  %v5143_v2 = vld [vmem:[%s7528_s3 + $0x128] ss:$8 sps:$4 sm:$0xff]   ;;  %v1408_v20 = vmax.f32 %v6376_v31, 0.0 }
 0x1f9   :  { %v1410_v43 = vmax.f32 %v1398_v35, 0.0  ;;  %v1409_v44 = vmax.f32 %v6381_v36, 0.0  ;;  %v1401_v45 = vadd.f32 %v1386_v6, %v1372_v37  ;;  %v6389_v46 = vadd.f32 %v1382_v3, %v1317_v41  ;;  %v5145_v3 = vld [vmem:[%s7528_s3 + $0x12c] ss:$8 sps:$4 sm:$0xff]  }
 0x1fa   :  { %1722 = vmatpush1.bf16.msra.mxu0 %v5134_v56  ;;  %1783 = vmatpush1.bf16.msra.mxu1 %v5134_v56  ;;  %v1411_v27 = vmax.f32 %v6383_v40, 0.0 }
 0x1fb   :  { %1432 = vrot.lane.b32.xlu1 %v1410_v43, %s5363_s2  ;;  %1430 = vrot.lane.b32.xlu0 %v1409_v44, %s5363_s2  ;;  %v1413_v49 = vmax.f32 %v1401_v45, 0.0  ;;  %v1412_v50 = vmax.f32 %v6389_v46, 0.0 }
 0x1fc   :  { %1723 = vmatprep.subr.bf16.mxu0 %v5139_v57  ;;  %1784 = vmatprep.subr.bf16.mxu1 %v5139_v57  ;;  %v6503_v57 = vld [vmem:[%s7528_s3] ss:$8 sps:$4 sm:$0xff]  }
 0x1fe   :  { %1724 = vmatpush1.bf16.msra.mxu0 %v5137_v58  ;;  %1785 = vmatpush1.bf16.msra.mxu1 %v5137_v58 }
 0x1ff   :  { %1436 = vrot.lane.b32.xlu1 %v1413_v49, %s5363_s2  ;;  %1434 = vrot.lane.b32.xlu0 %v1412_v50, %s5363_s2 }
 0x200   :  { %1725 = vmatprep.subr.bf16.mxu0 %v5142_v59  ;;  %1786 = vmatprep.subr.bf16.mxu1 %v5142_v59 }
 0x202   :  { %1726 = vmatpush1.bf16.msra.mxu0 %v5140_v62  ;;  %1787 = vmatpush1.bf16.msra.mxu1 %v5140_v62 }
 0x203   :  { %1727 = vmatprep.subr.bf16.mxu0 %v5145_v3  ;;  %1788 = vmatprep.subr.bf16.mxu1 %v5145_v3  ;;  %v6528_v3 = vld [vmem:[%s7528_s3 + $0x20] ss:$8 sps:$4 sm:$0xff]  }
 0x206   :  { %1728 = vmatpush1.bf16.msra.mxu0 %v5143_v2  ;;  %1789 = vmatpush1.bf16.msra.mxu1 %v5143_v2  ;;  %v6522_v2 = vld [vmem:[%s7528_s3 + $0x24] ss:$8 sps:$4 sm:$0xff]  }
 0x207   :  { %1729 = vmatprep.subr.bf16.mxu0 %v5148_v4  ;;  %1790 = vmatprep.subr.bf16.mxu1 %v5148_v4  ;;  %v6534_v4 = vld [vmem:[%s7528_s3 + $0x34] ss:$8 sps:$4 sm:$0xff]  }
 0x20a   :  { %1730 = vmatpush1.bf16.msra.mxu0 %v5146_v14  ;;  %1791 = vmatpush1.bf16.msra.mxu1 %v5146_v14 }
 0x20b   :  { %4473 = vmatprep.subr.msk.bf16.mxu0 %vm1704_vm2, %v4472_v15  ;;  %4475 = vmatprep.subr.msk.bf16.mxu1 %vm1704_vm2, %v4472_v15 }
 0x20e   :  { %1732 = vmatpush1.bf16.msra.mxu0 %v1706_v21  ;;  %1793 = vmatpush1.bf16.msra.mxu1 %v1706_v21 }
 0x20f   :  { %1929 = vmatprep.subr.bf16.mxu0 %v5153_v16  ;;  %1975 = vmatprep.subr.bf16.mxu1 %v5153_v16 }
 0x23d   :  { %v1423_v60 = vpop.permute.xlu0 %1422 }
 0x23f   :  { %v1427_v0 = vpop.permute.xlu1 %1426 }
 0x241   :  { %v1425_v6 = vpop.permute.xlu0 %1424 }
 0x242   :  { %v1439_v8 = vsel %vm1438_vm1, %v1423_v60, %v1425_v6  ;;  %v1452_v10 = vmax.f32 %v1403_v19, %v1425_v6  ;;  %v6509_v60 = vld [vmem:[%s7528_s3 + $0x14] ss:$8 sps:$4 sm:$0xff]   ;;  %v6546_v6 = vld [vmem:[%s7528_s3 + $0x44] ss:$8 sps:$4 sm:$0xff]  }
 0x243   :  { %v1451_v11 = vmax.f32 %v1402_v5, %v1439_v8  ;;  %v1429_v13 = vpop.permute.xlu1 %1428  ;;  %v6540_v5 = vld [vmem:[%s7528_s3 + $0x30] ss:$8 sps:$4 sm:$0xff]   ;;  %v6558_v8 = vld [vmem:[%s7528_s3 + $0x54] ss:$8 sps:$4 sm:$0xff]  }
 0x244   :  { %v1440_v9 = vsel %vm1438_vm1, %v1427_v0, %v1429_v13  ;;  %1469 = vrot.lane.b32.xlu1 %v1452_v10, %s5364_s14  ;;  %v1454_v12 = vmax.f32 %v1406_v22, %v1429_v13  ;;  %v6516_v0 = vld [vmem:[%s7528_s3 + $0x10] ss:$8 sps:$4 sm:$0xff]  }
 0x245   :  { %1467 = vrot.lane.b32.xlu0 %v1451_v11, %s5364_s14  ;;  %v1453_v19 = vmax.f32 %v1405_v18, %v1440_v9 }
 0x248   :  { %1473 = vrot.lane.b32.xlu1 %v1454_v12, %s5364_s14 }
 0x249   :  { %1471 = vrot.lane.b32.xlu0 %v1453_v19, %s5364_s14 }
 0x26d   :  { %v1433_v22 = vpop.permute.xlu1 %1432  ;;  %v1431_v23 = vpop.permute.xlu0 %1430 }
 0x26e   :  { %v6472_v24 = vmax.f32 %v1409_v44, %v1433_v22  ;;  %v1441_v25 = vsel %vm1438_vm1, %v1431_v23, %v1433_v22  ;;  %v6597_v22 = vld [vmem:[%s7528_s3 + $0x70] ss:$8 sps:$4 sm:$0xff]  }
 0x26f   :  { %v6475_v26 = vmax.f32 %v1408_v20, %v1441_v25  ;;  %v6611_v25 = vld [vmem:[%s7528_s3 + $0x80] ss:$8 sps:$4 sm:$0xff]  }
 0x270   :  { %1477 = vrot.lane.b32.xlu1 %v6472_v24, %s5364_s14 }
 0x271   :  { %v1437_v28 = vpop.permute.xlu1 %1436  ;;  %1475 = vrot.lane.b32.xlu0 %v6475_v26, %s5364_s14  ;;  %v1435_v29 = vpop.permute.xlu0 %1434 }
 0x272   :  { %v6484_v30 = vmax.f32 %v1412_v50, %v1437_v28  ;;  %v1442_v31 = vsel %vm1438_vm1, %v1435_v29, %v1437_v28  ;;  %v6626_v28 = vld [vmem:[%s7528_s3 + $0x90] ss:$8 sps:$4 sm:$0xff]  }
 0x273   :  { %v6487_v32 = vmax.f32 %v1411_v27, %v1442_v31  ;;  %v1542_v27 = vld [vmem:[%s7528_s3 + $0xa0] sm:$0x11] }
 0x274   :  { %1481 = vrot.lane.b32.xlu1 %v6484_v30, %s5364_s14  ;;  %v6629_v31 = vcombine.high %v1542_v27, %v1542_v27 }
 0x275   :  { %1479 = vrot.lane.b32.xlu0 %v6487_v32, %s5364_s14 }
 0x2b6   :  { %v1470_v33 = vpop.permute.xlu1 %1469 }
 0x2b7   :  { %v1497_v34 = vmax.f32 %v1452_v10, %v1470_v33  ;;  %v1468_v35 = vpop.permute.xlu0 %1467  ;;  %v6564_v10 = vld [vmem:[%s7528_s3 + $0x50] ss:$8 sps:$4 sm:$0xff]  }
 0x2b8   :  { %v1484_v36 = vsel %vm1483_vm3, %v1468_v35, %v1470_v33 }
 0x2b9   :  { %1506 = vst.msk [vmem:[#allocation2 + $0x8] sm:$0xff] %vm1505_vm4, %v1497_v34  ;;  %v6495_v37 = vmax.f32 %v1451_v11, %v1484_v36  ;;  %v6570_v11 = vld [vmem:[%s7528_s3 + $0x64] ss:$8 sps:$4 sm:$0xff]  }
 0x2ba   :  { %v1474_v38 = vpop.permute.xlu1 %1473 }
 0x2bb   :  { %1504 = vst [vmem:[#allocation2] sm:$0xff] %v6495_v37  ;;  %v1499_v39 = vmax.f32 %v1454_v12, %v1474_v38  ;;  %v1472_v40 = vpop.permute.xlu0 %1471  ;;  %v6588_v12 = vld [vmem:[%s7528_s3 + $0x74] ss:$8 sps:$4 sm:$0xff]  }
 0x2bc   :  { %v1485_v41 = vsel %vm1483_vm3, %v1472_v40, %v1474_v38 }
 0x2bd   :  { %1509 = vst.msk [vmem:[#allocation2 + $0x18] sm:$0x3f] %vm1508_vm5, %v1499_v39  ;;  %v1498_v42 = vmax.f32 %v1453_v19, %v1485_v41 }
 0x2bf   :  { %1507 = vst [vmem:[#allocation2 + $0x10] sm:$0x3f] %v1498_v42 }
 0x2c0   :  { %v1548_v43 = vld [vmem:[#allocation2 + $0x8] sm:$0xfe] }
 0x2c1   :  { %v1515_v59 = vld [vmem:[#allocation2 + $0x8] sm:$0xff] }
 0x2c2   :  { %v1547_v46 = vld [vmem:[#allocation2] sm:$0xfe] }
 0x2c4   :  { %v1550_v44 = vld [vmem:[#allocation2 + $0x18] sm:$0x7] }
 0x2c5   :  { %v1578_v45 = vpack.c.bf16 %v1550_v44, %v1548_v43  ;;  %v1517_v56 = vld [vmem:[#allocation2 + $0x18] sm:$0x3]  ;;  %v6640_v43 = vld [vmem:[%s7528_s3 + $0x154] ss:$8 sps:$4 sm:$0xff]  }
 0x2c6   :  { %v1549_v47 = vld [vmem:[#allocation2 + $0x10] sm:$0x7]  ;;  %v1544_v62 = vpack.c.bf16 %v1517_v56, %v1515_v59  ;;  %v2021_v39 = vld [vmem:[#allocation2 + $0x18] sm:$0xf]  ;;  %v6654_v56 = vld [vmem:[%s7528_s3 + $0x164] ss:$8 sps:$4 sm:$0xff]  }
 0x2c7   :  { %v1591_v48 = vshll.u32 %v1578_v45, 16  ;;  %v1577_v49 = vpack.c.bf16 %v1549_v47, %v1547_v46  ;;  %v1589_v50 = vshrl.u32 %v1578_v45, 16  ;;  %v1516_v45 = vld [vmem:[#allocation2 + $0x10] sm:$0x3]  ;;  %v2019_v46 = vld [vmem:[#allocation2 + $0x8] sm:$0xfc] }
 0x2c9   :  { %v1593_v51 = vrot.slane %v1591_v48, 1  ;;  %v1584_v52 = vshll.u32 %v1577_v49, 16  ;;  %v1582_v54 = vshrl.u32 %v1577_v49, 16 }
 0x2cb   :  { %v1594_v53 = vor.u32 %v1593_v51, %v1589_v50  ;;  %v1586_v55 = vrot.slane %v1584_v52, 1  ;;  %v2049_v50 = vpack.c.bf16 %v2021_v39, %v2019_v46  ;;  %v6646_v51 = vld [vmem:[%s7528_s3 + $0x150] ss:$8 sps:$4 sm:$0xff]   ;;  %v6811_v39 = vld [vmem:[%s7528_s3 + $0x20c] ss:$8 sps:$4 sm:$0xff]  }
 0x2cc   :  { %v6863_v46 = vld [vmem:[%s7528_s3 + $0x238] ss:$8 sps:$4 sm:$0xff]  }
 0x2cd   :  { %4474 = vmatprep.mubr.msk.bf16.mxu0 %vm1505_vm4, %v1594_v53  ;;  %v1587_v58 = vor.u32 %v1586_v55, %v1582_v54  ;;  %v1543_v53 = vpack.c.bf16 %v1516_v45, %v6495_v37  ;;  %v6661_v37 = vld [vmem:[%s7528_s3 + $0x160] ss:$8 sps:$4 sm:$0xff]   ;;  %v6855_v45 = vld [vmem:[%s7528_s3 + $0x23c] ss:$8 sps:$4 sm:$0xff]  }
 0x2cf   :  { %1744 = vmatmul.mubr.bf16.vlgmr.msra.gmra.mrb[8].mxu0 %v1587_v58  ;;  %v2055_v58 = vrot.slane %v2049_v50, 1  ;;  %v6891_v50 = vld [vmem:[%s7528_s3 + $0x258] ss:$8 sps:$4 sm:$0xff]  }
 0x2d0   :  { %1930 = vmatpush1.bf16.msra.mxu0 %v6503_v57  ;;  %4500 = vmatprep.mubr.msk.bf16.mxu0 %vm1505_vm4, %v1544_v62  ;;  %v6668_v62 = vld [vmem:[%s7528_s3 + $0x174] ss:$8 sps:$4 sm:$0xff]  }
 0x2d1   :  { %1931 = vmatprep.subr.bf16.mxu0 %v6509_v60 }
 0x2d4   :  { %1932 = vmatpush1.bf16.msra.mxu0 %v6516_v0 }
 0x2d5   :  { %1933 = vmatprep.subr.bf16.mxu0 %v6522_v2 }
 0x2d8   :  { %1934 = vmatpush1.bf16.msra.mxu0 %v6528_v3 }
 0x2d9   :  { %1935 = vmatprep.subr.bf16.mxu0 %v6534_v4 }
 0x2dc   :  { %1936 = vmatpush1.bf16.msra.mxu0 %v6540_v5 }
 0x2dd   :  { %1937 = vmatprep.subr.bf16.mxu0 %v6546_v6 }
 0x2e0   :  { %1938 = vmatpush1.bf16.msra.mxu0 %v6552_v7 }
 0x2e1   :  { %1939 = vmatprep.subr.bf16.mxu0 %v6558_v8 }
 0x2e2   :  { %v1478_v13 = vpop.permute.xlu1 %1477 }
 0x2e3   :  { %v1501_v14 = vmax.f32 %v6472_v24, %v1478_v13  ;;  %v1476_v9 = vpop.permute.xlu0 %1475  ;;  %v6605_v24 = vld [vmem:[%s7528_s3 + $0x84] ss:$8 sps:$4 sm:$0xff]  }
 0x2e4   :  { %1940 = vmatpush1.bf16.msra.mxu0 %v6564_v10  ;;  %v1486_v15 = vsel %vm1483_vm3, %v1476_v9, %v1478_v13  ;;  %v6684_v13 = vld [vmem:[%s7528_s3 + $0x184] ss:$8 sps:$4 sm:$0xff]  }
 0x2e5   :  { %1511 = vst.msk [vmem:[#allocation2 + $0x28] sm:$0xff] %vm1505_vm4, %v1501_v14  ;;  %v6582_v18 = vmax.f32 %v6475_v26, %v1486_v15  ;;  %1941 = vmatprep.subr.bf16.mxu0 %v6570_v11  ;;  %v6617_v26 = vld [vmem:[%s7528_s3 + $0x94] ss:$8 sps:$4 sm:$0xff]   ;;  %v6768_v9 = vld [vmem:[%s7528_s3 + $0x1e4] ss:$8 sps:$4 sm:$0xff]  }
 0x2e6   :  { %v1482_v19 = vpop.permute.xlu1 %1481  ;;  %v2276_v14 = vld [vmem:[#allocation2 + $0x18] sm:$0x1f]  ;;  %v4523_v15 = vld [vmem:[%s7528_s3 + $0x1f0] sm:$0x11] }
 0x2e7   :  { %1510 = vst [vmem:[#allocation2 + $0x20] sm:$0xff] %v6582_v18  ;;  %v1503_v21 = vmax.f32 %v6484_v30, %v1482_v19  ;;  %v1480_v16 = vpop.permute.xlu0 %1479 }
 0x2e8   :  { %1942 = vmatpush1.bf16.msra.mxu0 %v6578_v17  ;;  %v1487_v20 = vsel %vm1483_vm3, %v1480_v16, %v1482_v19  ;;  %v6778_v19 = vld [vmem:[%s7528_s3 + $0x1e0] ss:$8 sps:$4 sm:$0xff]   ;;  %v4544_v16 = vcombine.low %v4523_v15, %v4523_v15 }
 0x2e9   :  { %1513 = vst.msk [vmem:[#allocation2 + $0x38] sm:$0x3f] %vm1508_vm5, %v1503_v21  ;;  %v1502_v23 = vmax.f32 %v6487_v32, %v1487_v20  ;;  %1943 = vmatprep.subr.bf16.mxu0 %v6588_v12  ;;  %v4497_v32 = vcombine.low %v1542_v27, %v1542_v27  ;;  %v6782_v21 = vcombine.high %v4523_v15, %v4523_v15  ;;  %v2020_v20 = vld [vmem:[#allocation2 + $0x10] sm:$0xf] }
 0x2eb   :  { %1512 = vst [vmem:[#allocation2 + $0x30] sm:$0x3f] %v1502_v23  ;;  %v6635_v40 = vsel %vm1704_vm2, %v4497_v32, 0 }
 0x2ec   :  { %1944 = vmatpush1.bf16.msra.mxu0 %v6597_v22  ;;  %v1552_v29 = vld [vmem:[#allocation2 + $0x28] sm:$0xfe] }
 0x2ed   :  { %1945 = vmatprep.subr.bf16.mxu0 %v6605_v24  ;;  %v1519_v55 = vld [vmem:[#allocation2 + $0x28] sm:$0xff] }
 0x2ee   :  { %v1551_v34 = vld [vmem:[#allocation2 + $0x20] sm:$0xfe] }
 0x2f0   :  { %1946 = vmatpush1.bf16.msra.mxu0 %v6611_v25  ;;  %v1554_v30 = vld [vmem:[#allocation2 + $0x38] sm:$0x7] }
 0x2f1   :  { %1947 = vmatprep.subr.bf16.mxu0 %v6617_v26  ;;  %v1580_v33 = vpack.c.bf16 %v1554_v30, %v1552_v29  ;;  %v1521_v52 = vld [vmem:[#allocation2 + $0x38] sm:$0x3]  ;;  %v6796_v29 = vld [vmem:[%s7528_s3 + $0x1fc] ss:$8 sps:$4 sm:$0xff]   ;;  %v2023_v30 = vld [vmem:[#allocation2 + $0x28] sm:$0xfc] }
 0x2f2   :  { %v1553_v35 = vld [vmem:[#allocation2 + $0x30] sm:$0x7]  ;;  %v1546_v59 = vpack.c.bf16 %v1521_v52, %v1519_v55  ;;  %v2280_v55 = vld [vmem:[#allocation2 + $0x38] sm:$0x1f] }
 0x2f3   :  { %v1764_v36 = vshll.u32 %v1580_v33, 16  ;;  %v1579_v38 = vpack.c.bf16 %v1553_v35, %v1551_v34  ;;  %v1762_v41 = vshrl.u32 %v1580_v33, 16  ;;  %v6905_v52 = vld [vmem:[%s7528_s3 + $0x268] ss:$8 sps:$4 sm:$0xff]  }
 0x2f4   :  { %1948 = vmatpush1.bf16.msra.mxu0 %v6626_v28 }
 0x2f5   :  { %4499 = vmatprep.subr.msk.bf16.mxu0 %vm1704_vm2, %v6629_v31  ;;  %v1766_v42 = vrot.slane %v1764_v36, 1  ;;  %v1757_v44 = vshll.u32 %v1579_v38, 16  ;;  %v1755_v48 = vshrl.u32 %v1579_v38, 16  ;;  %v6805_v36 = vld [vmem:[%s7528_s3 + $0x1f8] ss:$8 sps:$4 sm:$0xff]  }
 0x2f7   :  { %v1767_v47 = vor.u32 %v1766_v42, %v1762_v41  ;;  %v1759_v49 = vrot.slane %v1757_v44, 1  ;;  %v6827_v41 = vld [vmem:[%s7528_s3 + $0x21c] ss:$8 sps:$4 sm:$0xff]   ;;  %v6835_v42 = vld [vmem:[%s7528_s3 + $0x218] ss:$8 sps:$4 sm:$0xff]  }
 0x2f8   :  { %1950 = vmatpush1.bf16.msra.mxu0 %v6635_v40  ;;  %v6849_v44 = vld [vmem:[%s7528_s3 + $0x228] ss:$8 sps:$4 sm:$0xff]  }
 0x2f9   :  { %4476 = vmatprep.mubr.msk.bf16.mxu1 %vm1505_vm4, %v1767_v47  ;;  %2171 = vmatprep.subr.bf16.mxu0 %v6640_v43  ;;  %v1760_v54 = vor.u32 %v1759_v49, %v1755_v48  ;;  %v6869_v47 = vld [vmem:[%s7528_s3 + $0x24c] ss:$8 sps:$4 sm:$0xff]   ;;  %v6877_v48 = vld [vmem:[%s7528_s3 + $0x248] ss:$8 sps:$4 sm:$0xff]   ;;  %v6883_v49 = vld [vmem:[%s7528_s3 + $0x25c] ss:$8 sps:$4 sm:$0xff]  }
 0x2fb   :  { %1962 = vmatmul.mubr.bf16.vlgmr.msra.gmra.mrb[8].mxu0 %v1543_v53  ;;  %1805 = vmatmul.mubr.bf16.vlgmr.msra.gmra.mrb[24].mxu1 %v1760_v54  ;;  %v6911_v53 = vld [vmem:[%s7528_s3 + $0x27c] ss:$8 sps:$4 sm:$0xff]   ;;  %v2275_v54 = vld [vmem:[#allocation2 + $0x10] sm:$0x1f] }
 0x2fc   :  { %1976 = vmatpush1.bf16.msra.mxu1 %v6503_v57  ;;  %2172 = vmatpush1.bf16.msra.mxu0 %v6646_v51  ;;  %v6677_v57 = vld [vmem:[%s7528_s3 + $0x170] ss:$8 sps:$4 sm:$0xff]  }
 0x2fd   :  { %4547 = vmatprep.mubr.msk.bf16.mxu0 %vm1505_vm4, %v2055_v58  ;;  %4502 = vmatprep.mubr.msk.bf16.mxu1 %vm1505_vm4, %v1546_v59  ;;  %v2273_v58 = vld [vmem:[#allocation2] sm:$0xf8]  ;;  %v6925_v59 = vld [vmem:[%s7528_s3 + $0x28c] ss:$8 sps:$4 sm:$0xff]  }
 0x2fe   :  { %1977 = vmatprep.subr.bf16.mxu1 %v6509_v60  ;;  %2173 = vmatprep.subr.bf16.mxu0 %v6654_v56  ;;  %v6691_v60 = vld [vmem:[%s7528_s3 + $0x180] ss:$8 sps:$4 sm:$0xff]  }
 0x300   :  { %1978 = vmatpush1.bf16.msra.mxu1 %v6516_v0  ;;  %2174 = vmatpush1.bf16.msra.mxu0 %v6661_v37  ;;  %v6698_v0 = vld [vmem:[%s7528_s3 + $0x194] ss:$8 sps:$4 sm:$0xff]  }
 0x301   :  { %1979 = vmatprep.subr.bf16.mxu1 %v6522_v2  ;;  %2175 = vmatprep.subr.bf16.mxu0 %v6668_v62  ;;  %v6705_v2 = vld [vmem:[%s7528_s3 + $0x190] ss:$8 sps:$4 sm:$0xff]  }
 0x304   :  { %1980 = vmatpush1.bf16.msra.mxu1 %v6528_v3  ;;  %2176 = vmatpush1.bf16.msra.mxu0 %v6677_v57  ;;  %v6712_v3 = vld [vmem:[%s7528_s3 + $0x1a4] ss:$8 sps:$4 sm:$0xff]  }
 0x305   :  { %1981 = vmatprep.subr.bf16.mxu1 %v6534_v4  ;;  %2177 = vmatprep.subr.bf16.mxu0 %v6684_v13  ;;  %v6719_v4 = vld [vmem:[%s7528_s3 + $0x1a0] ss:$8 sps:$4 sm:$0xff]  }
 0x308   :  { %1982 = vmatpush1.bf16.msra.mxu1 %v6540_v5  ;;  %2178 = vmatpush1.bf16.msra.mxu0 %v6691_v60  ;;  %v6726_v5 = vld [vmem:[%s7528_s3 + $0x1b4] ss:$8 sps:$4 sm:$0xff]  }
 0x309   :  { %1983 = vmatprep.subr.bf16.mxu1 %v6546_v6  ;;  %2179 = vmatprep.subr.bf16.mxu0 %v6698_v0  ;;  %v6733_v6 = vld [vmem:[%s7528_s3 + $0x1b0] ss:$8 sps:$4 sm:$0xff]  }
 0x30c   :  { %1984 = vmatpush1.bf16.msra.mxu1 %v6552_v7  ;;  %2180 = vmatpush1.bf16.msra.mxu0 %v6705_v2  ;;  %v6740_v7 = vld [vmem:[%s7528_s3 + $0x1c4] ss:$8 sps:$4 sm:$0xff]  }
 0x30d   :  { %1985 = vmatprep.subr.bf16.mxu1 %v6558_v8  ;;  %2181 = vmatprep.subr.bf16.mxu0 %v6712_v3  ;;  %v6747_v8 = vld [vmem:[%s7528_s3 + $0x1c0] ss:$8 sps:$4 sm:$0xff]  }
 0x310   :  { %1986 = vmatpush1.bf16.msra.mxu1 %v6564_v10  ;;  %2182 = vmatpush1.bf16.msra.mxu0 %v6719_v4  ;;  %v6754_v10 = vld [vmem:[%s7528_s3 + $0x1d4] ss:$8 sps:$4 sm:$0xff]  }
 0x311   :  { %1987 = vmatprep.subr.bf16.mxu1 %v6570_v11  ;;  %2183 = vmatprep.subr.bf16.mxu0 %v6726_v5  ;;  %v6761_v11 = vld [vmem:[%s7528_s3 + $0x1d0] ss:$8 sps:$4 sm:$0xff]  }
 0x314   :  { %1988 = vmatpush1.bf16.msra.mxu1 %v6578_v17  ;;  %2184 = vmatpush1.bf16.msra.mxu0 %v6733_v6  ;;  %v2274_v17 = vld [vmem:[#allocation2 + $0x8] sm:$0xf8] }
 0x315   :  { %1989 = vmatprep.subr.bf16.mxu1 %v6588_v12  ;;  %2185 = vmatprep.subr.bf16.mxu0 %v6740_v7  ;;  %v2304_v12 = vpack.c.bf16 %v2276_v14, %v2274_v17  ;;  %v6953_v17 = vld [vmem:[%s7528_s3 + $0x2a4] ss:$8 sps:$4 sm:$0xff]  }
 0x317   :  { %v2316_v23 = vshrl.u32 %v2304_v12, 16 }
 0x318   :  { %1990 = vmatpush1.bf16.msra.mxu1 %v6597_v22  ;;  %2186 = vmatpush1.bf16.msra.mxu0 %v6747_v8  ;;  %v2025_v22 = vld [vmem:[#allocation2 + $0x38] sm:$0xf] }
 0x319   :  { %1991 = vmatprep.subr.bf16.mxu1 %v6605_v24  ;;  %2187 = vmatprep.subr.bf16.mxu0 %v6754_v10  ;;  %v2319_v24 = vshll.u32 %v2304_v12, 16  ;;  %v2051_v32 = vpack.c.bf16 %v2025_v22, %v2023_v30  ;;  %v2318_v33 = vrot.slane %v2316_v23, 1  ;;  %v6961_v22 = vld [vmem:[%s7528_s3 + $0x2a0] ss:$8 sps:$4 sm:$0xff]  }
 0x31a   :  { %v6991_v30 = vld [vmem:[%s7528_s3 + $0x2c0] ss:$8 sps:$4 sm:$0xff]  }
 0x31b   :  { %v2321_v34 = vrot.slane %v2319_v24, 2  ;;  %v2217_v38 = vrot.slane %v2051_v32, 1  ;;  %v7005_v32 = vld [vmem:[%s7528_s3 + $0x2d0] ss:$8 sps:$4 sm:$0xff]  }
 0x31c   :  { %1992 = vmatpush1.bf16.msra.mxu1 %v6611_v25  ;;  %2188 = vmatpush1.bf16.msra.mxu0 %v6761_v11  ;;  %v2018_v25 = vld [vmem:[#allocation2] sm:$0xfc] }
 0x31d   :  { %1993 = vmatprep.subr.bf16.mxu1 %v6617_v26  ;;  %2189 = vmatprep.subr.bf16.mxu0 %v6768_v9  ;;  %v6791_v26 = vsel %vm1704_vm2, %v4544_v16, 0  ;;  %v2048_v27 = vpack.c.bf16 %v2020_v20, %v2018_v25  ;;  %v2553_v16 = vld [vmem:[#allocation2 + $0x8] sm:$0xf0]  ;;  %v6967_v25 = vld [vmem:[%s7528_s3 + $0x2b4] ss:$8 sps:$4 sm:$0xff]  }
 0x31f   :  { %v2054_v35 = vrot.slane %v2048_v27, 1  ;;  %v6975_v27 = vld [vmem:[%s7528_s3 + $0x2b0] ss:$8 sps:$4 sm:$0xff]  }
 0x320   :  { %1994 = vmatpush1.bf16.msra.mxu1 %v6626_v28  ;;  %2190 = vmatpush1.bf16.msra.mxu0 %v6778_v19  ;;  %v1520_v28 = vld [vmem:[#allocation2 + $0x30] sm:$0x3] }
 0x321   :  { %4501 = vmatprep.subr.msk.bf16.mxu1 %vm1704_vm2, %v6629_v31  ;;  %4546 = vmatprep.subr.msk.bf16.mxu0 %vm1704_vm2, %v6782_v21  ;;  %v1545_v31 = vpack.c.bf16 %v1520_v28, %v6582_v18  ;;  %v6820_v18 = vld [vmem:[%s7528_s3 + $0x208] ss:$8 sps:$4 sm:$0xff]   ;;  %v6997_v28 = vld [vmem:[%s7528_s3 + $0x2d4] ss:$8 sps:$4 sm:$0xff]  }
 0x324   :  { %1996 = vmatpush1.bf16.msra.mxu1 %v6635_v40  ;;  %2192 = vmatpush1.bf16.msra.mxu0 %v6791_v26  ;;  %v2322_v40 = vor.u32 %v2321_v34, %v2318_v33  ;;  %v7011_v33 = vld [vmem:[%s7528_s3 + $0x2e4] ss:$8 sps:$4 sm:$0xff]   ;;  %v7019_v34 = vld [vmem:[%s7528_s3 + $0x2e0] ss:$8 sps:$4 sm:$0xff]  }
 0x325   :  { %2222 = vmatprep.subr.bf16.mxu1 %v6640_v43  ;;  %2438 = vmatprep.subr.bf16.mxu0 %v6796_v29  ;;  %v6841_v43 = vld [vmem:[%s7528_s3 + $0x22c] ss:$8 sps:$4 sm:$0xff]  }
 0x327   :  { %2008 = vmatmul.mubr.bf16.vlgmr.msra.gmra.mrb[24].mxu1 %v1545_v31  ;;  %2204 = vmatmul.mubr.bf16.vlgmr.msra.gmra.mrb[8].mxu0 %v2054_v35  ;;  %v7025_v31 = vld [vmem:[%s7528_s3 + $0x2f4] ss:$8 sps:$4 sm:$0xff]   ;;  %v7033_v35 = vld [vmem:[%s7528_s3 + $0x2f0] ss:$8 sps:$4 sm:$0xff]  }
 0x328   :  { %2223 = vmatpush1.bf16.msra.mxu1 %v6646_v51  ;;  %4549 = vmatprep.mubr.msk.bf16.mxu1 %vm1505_vm4, %v2217_v38  ;;  %v6897_v51 = vld [vmem:[%s7528_s3 + $0x26c] ss:$8 sps:$4 sm:$0xff]   ;;  %v5265_v38 = vld [vmem:[%s7528_s3 + $0x300] ss:$8 sps:$4 sm:$0xff]  }
 0x329   :  { %2439 = vmatpush1.bf16.msra.mxu0 %v6805_v36  ;;  %4594 = vmatprep.mubr.msk.bf16.mxu0 %vm1505_vm4, %v2322_v40  ;;  %v5268_v40 = vld [vmem:[%s7528_s3 + $0x310] ss:$8 sps:$4 sm:$0xff]  }
 0x32a   :  { %2224 = vmatprep.subr.bf16.mxu1 %v6654_v56  ;;  %2440 = vmatprep.subr.bf16.mxu0 %v6811_v39  ;;  %v6919_v56 = vld [vmem:[%s7528_s3 + $0x278] ss:$8 sps:$4 sm:$0xff]  }
 0x32c   :  { %2225 = vmatpush1.bf16.msra.mxu1 %v6661_v37  ;;  %v2303_v37 = vpack.c.bf16 %v2275_v54, %v2273_v58 }
 0x32d   :  { %2441 = vmatpush1.bf16.msra.mxu0 %v6820_v18  ;;  %2226 = vmatprep.subr.bf16.mxu1 %v6668_v62  ;;  %v2278_v62 = vld [vmem:[#allocation2 + $0x28] sm:$0xf8] }
 0x32e   :  { %2442 = vmatprep.subr.bf16.mxu0 %v6827_v41 }
 0x330   :  { %2227 = vmatpush1.bf16.msra.mxu1 %v6677_v57  ;;  %v4570_v57 = vld [vmem:[%s7528_s3 + $0x298] sm:$0x11] }
 0x331   :  { %2443 = vmatpush1.bf16.msra.mxu0 %v6835_v42  ;;  %2228 = vmatprep.subr.bf16.mxu1 %v6684_v13  ;;  %v2306_v13 = vpack.c.bf16 %v2280_v55, %v2278_v62 }
 0x332   :  { %2444 = vmatprep.subr.bf16.mxu0 %v6841_v43 }
 0x334   :  { %2229 = vmatpush1.bf16.msra.mxu1 %v6691_v60  ;;  %v6936_v60 = vld [vmem:[%s7528_s3 + $0x288] ss:$8 sps:$4 sm:$0xff]  }
 0x335   :  { %2445 = vmatpush1.bf16.msra.mxu0 %v6849_v44  ;;  %2230 = vmatprep.subr.bf16.mxu1 %v6698_v0  ;;  %v6939_v0 = vcombine.high %v4570_v57, %v4570_v57 }
 0x336   :  { %2446 = vmatprep.subr.bf16.mxu0 %v6855_v45 }
 0x338   :  { %2231 = vmatpush1.bf16.msra.mxu1 %v6705_v2  ;;  %v4591_v2 = vcombine.low %v4570_v57, %v4570_v57 }
 0x339   :  { %2447 = vmatpush1.bf16.msra.mxu0 %v6863_v46  ;;  %2232 = vmatprep.subr.bf16.mxu1 %v6712_v3  ;;  %v2024_v3 = vld [vmem:[#allocation2 + $0x30] sm:$0xf] }
 0x33a   :  { %2448 = vmatprep.subr.bf16.mxu0 %v6869_v47  ;;  %v6948_v14 = vsel %vm1704_vm2, %v4591_v2, 0  ;;  %v2556_v2 = vld [vmem:[#allocation2 + $0x20] sm:$0xf0] }
 0x33c   :  { %2233 = vmatpush1.bf16.msra.mxu1 %v6719_v4  ;;  %v2308_v4 = vshrl.u32 %v2303_v37, 16 }
 0x33d   :  { %2449 = vmatpush1.bf16.msra.mxu0 %v6877_v48  ;;  %2234 = vmatprep.subr.bf16.mxu1 %v6726_v5  ;;  %v2311_v5 = vshll.u32 %v2303_v37, 16  ;;  %v2557_v37 = vld [vmem:[#allocation2 + $0x28] sm:$0xf0] }
 0x33e   :  { %2450 = vmatprep.subr.bf16.mxu0 %v6883_v49 }
 0x33f   :  { %v2313_v15 = vrot.slane %v2311_v5, 2  ;;  %v5279_v5 = vld [vmem:[%s7530_s5 + $0x48] sm:$0xff]  }
 0x340   :  { %2235 = vmatpush1.bf16.msra.mxu1 %v6733_v6  ;;  %v2490_v6 = vshrl.u32 %v2306_v13, 16 }
 0x341   :  { %2451 = vmatpush1.bf16.msra.mxu0 %v6891_v50  ;;  %2236 = vmatprep.subr.bf16.mxu1 %v6740_v7  ;;  %v2493_v7 = vshll.u32 %v2306_v13, 16 }
 0x342   :  { %2452 = vmatprep.subr.bf16.mxu0 %v6897_v51  ;;  %v2492_v12 = vrot.slane %v2490_v6, 1  ;;  %v5280_v6 = vld [vmem:[%s7530_s5 + $0x50] sm:$0xff]  }
 0x344   :  { %2237 = vmatpush1.bf16.msra.mxu1 %v6747_v8  ;;  %v2022_v8 = vld [vmem:[#allocation2 + $0x20] sm:$0xfc] }
 0x345   :  { %2453 = vmatpush1.bf16.msra.mxu0 %v6905_v52  ;;  %2238 = vmatprep.subr.bf16.mxu1 %v6754_v10  ;;  %v2050_v10 = vpack.c.bf16 %v2024_v3, %v2022_v8  ;;  %v5282_v8 = vld [vmem:[%s7530_s5 + $0x60] sm:$0xff]  }
 0x346   :  { %2454 = vmatprep.subr.bf16.mxu0 %v6911_v53 }
 0x347   :  { %v2216_v20 = vrot.slane %v2050_v10, 1  ;;  %v5283_v10 = vld [vmem:[%s7530_s5 + $0x68] sm:$0xff]  }
 0x348   :  { %2239 = vmatpush1.bf16.msra.mxu1 %v6761_v11  ;;  %v2555_v11 = vld [vmem:[#allocation2 + $0x18] sm:$0x3f] }
 0x349   :  { %2455 = vmatpush1.bf16.msra.mxu0 %v6919_v56  ;;  %2240 = vmatprep.subr.bf16.mxu1 %v6768_v9  ;;  %v2310_v9 = vrot.slane %v2308_v4, 1 }
 0x34a   :  { %2456 = vmatprep.subr.bf16.mxu0 %v6925_v59 }
 0x34b   :  { %v2314_v23 = vor.u32 %v2313_v15, %v2310_v9 }
 0x34c   :  { %2241 = vmatpush1.bf16.msra.mxu1 %v6778_v19  ;;  %v2495_v19 = vrot.slane %v2493_v7, 2  ;;  %v5281_v7 = vld [vmem:[%s7530_s5 + $0x58] sm:$0xff]  }
 0x34d   :  { %2457 = vmatpush1.bf16.msra.mxu0 %v6936_v60  ;;  %4548 = vmatprep.subr.msk.bf16.mxu1 %vm1704_vm2, %v6782_v21  ;;  %v2583_v21 = vpack.c.bf16 %v2555_v11, %v2553_v16  ;;  %v5284_v11 = vld [vmem:[%s7530_s5 + $0x70] sm:$0xff]  }
 0x34e   :  { %4593 = vmatprep.subr.msk.bf16.mxu0 %vm1704_vm2, %v6939_v0  ;;  %v2496_v24 = vor.u32 %v2495_v19, %v2492_v12 }
 0x350   :  { %2243 = vmatpush1.bf16.msra.mxu1 %v6791_v26  ;;  %v2589_v26 = vrot.slane %v2583_v21, 2 }
 0x351   :  { %2459 = vmatpush1.bf16.msra.mxu0 %v6948_v14  ;;  %2501 = vmatprep.subr.bf16.mxu1 %v6796_v29  ;;  %v6982_v29 = vld [vmem:[%s7528_s3 + $0x2c4] ss:$8 sps:$4 sm:$0xff]  }
 0x352   :  { %2705 = vmatprep.subr.bf16.mxu0 %v6953_v17 }
 0x353   :  { %2255 = vmatmul.mubr.bf16.vlgmr.msra.gmra.mrb[24].mxu1 %v2216_v20 }
 0x354   :  { %2471 = vmatmul.mubr.bf16.vlgmr.msra.gmra.mrb[8].mxu0 %v2314_v23  ;;  %2502 = vmatpush1.bf16.msra.mxu1 %v6805_v36  ;;  %v7039_v36 = vld [vmem:[%s7528_s3 + $0x304] ss:$8 sps:$4 sm:$0xff]  }
 0x355   :  { %4596 = vmatprep.mubr.msk.bf16.mxu1 %vm1505_vm4, %v2496_v24  ;;  %2706 = vmatpush1.bf16.msra.mxu0 %v6961_v22 }
 0x356   :  { %4641 = vmatprep.mubr.msk.bf16.mxu0 %vm1505_vm4, %v2589_v26  ;;  %2503 = vmatprep.subr.bf16.mxu1 %v6811_v39  ;;  %v5270_v39 = vld [vmem:[%s7528_s3 + $0x314] ss:$8 sps:$4 sm:$0xff]  }
 0x357   :  { %2707 = vmatprep.subr.bf16.mxu0 %v6967_v25 }
 0x358   :  { %2504 = vmatpush1.bf16.msra.mxu1 %v6820_v18  ;;  %v5273_v18 = vld [vmem:[%s7528_s3 + $0x324] ss:$8 sps:$4 sm:$0xff]  }
 0x359   :  { %2708 = vmatpush1.bf16.msra.mxu0 %v6975_v27  ;;  %2505 = vmatprep.subr.bf16.mxu1 %v6827_v41  ;;  %v2279_v41 = vld [vmem:[#allocation2 + $0x30] sm:$0x1f] }
 0x35a   :  { %2709 = vmatprep.subr.bf16.mxu0 %v6982_v29 }
 0x35c   :  { %2506 = vmatpush1.bf16.msra.mxu1 %v6835_v42  ;;  %v2277_v42 = vld [vmem:[#allocation2 + $0x20] sm:$0xf8] }
 0x35d   :  { %2710 = vmatpush1.bf16.msra.mxu0 %v6991_v30  ;;  %2507 = vmatprep.subr.bf16.mxu1 %v6841_v43  ;;  %v5271_v43 = vld [vmem:[%s7528_s3 + $0x320] ss:$8 sps:$4 sm:$0xff]  }
 0x35e   :  { %2711 = vmatprep.subr.bf16.mxu0 %v6997_v28 }
 0x360   :  { %2508 = vmatpush1.bf16.msra.mxu1 %v6849_v44  ;;  %v2305_v44 = vpack.c.bf16 %v2279_v41, %v2277_v42 }
 0x361   :  { %2712 = vmatpush1.bf16.msra.mxu0 %v7005_v32  ;;  %2509 = vmatprep.subr.bf16.mxu1 %v6855_v45  ;;  %v5276_v45 = vld [vmem:[%s7528_s3 + $0x334] ss:$8 sps:$4 sm:$0xff]  }
 0x362   :  { %2713 = vmatprep.subr.bf16.mxu0 %v7011_v33 }
 0x364   :  { %2510 = vmatpush1.bf16.msra.mxu1 %v6863_v46  ;;  %v4617_v46 = vld [vmem:[%s7528_s3 + $0x340] sm:$0x11] }
 0x365   :  { %2714 = vmatpush1.bf16.msra.mxu0 %v7019_v34  ;;  %2511 = vmatprep.subr.bf16.mxu1 %v6869_v47  ;;  %v5274_v47 = vld [vmem:[%s7528_s3 + $0x330] ss:$8 sps:$4 sm:$0xff]  }
 0x366   :  { %2715 = vmatprep.subr.bf16.mxu0 %v7025_v31 }
 0x368   :  { %2512 = vmatpush1.bf16.msra.mxu1 %v6877_v48  ;;  %v2482_v48 = vshrl.u32 %v2305_v44, 16 }
 0x369   :  { %2716 = vmatpush1.bf16.msra.mxu0 %v7033_v35  ;;  %2513 = vmatprep.subr.bf16.mxu1 %v6883_v49  ;;  %v2485_v49 = vshll.u32 %v2305_v44, 16 }
 0x36a   :  { %2717 = vmatprep.subr.bf16.mxu0 %v7039_v36  ;;  %v2484_v54 = vrot.slane %v2482_v48, 1 }
 0x36b   :  { %v2487_v55 = vrot.slane %v2485_v49, 2 }
 0x36c   :  { %2514 = vmatpush1.bf16.msra.mxu1 %v6891_v50  ;;  %v4639_v50 = vcombine.high %v4617_v46, %v4617_v46 }
 0x36d   :  { %2718 = vmatpush1.bf16.msra.mxu0 %v5265_v38  ;;  %2515 = vmatprep.subr.bf16.mxu1 %v6897_v51  ;;  %v4638_v51 = vcombine.low %v4617_v46, %v4617_v46  ;;  %v2488_v57 = vor.u32 %v2487_v55, %v2484_v54 }
 0x36e   :  { %2719 = vmatprep.subr.bf16.mxu0 %v5270_v39 }
 0x36f   :  { %v2700_v58 = vsel %vm1704_vm2, %v4638_v51, 0 }
 0x370   :  { %2516 = vmatpush1.bf16.msra.mxu1 %v6905_v52  ;;  %v2554_v52 = vld [vmem:[#allocation2 + $0x10] sm:$0x3f] }
 0x371   :  { %2720 = vmatpush1.bf16.msra.mxu0 %v5268_v40  ;;  %2517 = vmatprep.subr.bf16.mxu1 %v6911_v53  ;;  %v2559_v53 = vld [vmem:[#allocation2 + $0x38] sm:$0x3f] }
 0x372   :  { %2721 = vmatprep.subr.bf16.mxu0 %v5273_v18  ;;  %v2585_v62 = vpack.c.bf16 %v2559_v53, %v2557_v37 }
 0x374   :  { %2518 = vmatpush1.bf16.msra.mxu1 %v6919_v56  ;;  %v2552_v56 = vld [vmem:[#allocation2] sm:$0xf0] }
 0x375   :  { %2722 = vmatpush1.bf16.msra.mxu0 %v5271_v43  ;;  %2519 = vmatprep.subr.bf16.mxu1 %v6925_v59  ;;  %v2582_v59 = vpack.c.bf16 %v2554_v52, %v2552_v56 }
 0x376   :  { %2723 = vmatprep.subr.bf16.mxu0 %v5276_v45 }
 0x377   :  { %v2588_v13 = vrot.slane %v2582_v59, 2 }
 0x378   :  { %2520 = vmatpush1.bf16.msra.mxu1 %v6936_v60  ;;  %v2751_v60 = vrot.slane %v2585_v62, 2 }
 0x379   :  { %2724 = vmatpush1.bf16.msra.mxu0 %v5274_v47  ;;  %4595 = vmatprep.subr.msk.bf16.mxu1 %vm1704_vm2, %v6939_v0  ;;  %v2558_v0 = vld [vmem:[#allocation2 + $0x30] sm:$0x3f] }
 0x37a   :  { %4640 = vmatprep.subr.msk.bf16.mxu0 %vm1704_vm2, %v4639_v50  ;;  %v2584_v3 = vpack.c.bf16 %v2558_v0, %v2556_v2 }
 0x37c   :  { %2522 = vmatpush1.bf16.msra.mxu1 %v6948_v14  ;;  %v2750_v4 = vrot.slane %v2584_v3, 2  ;;  %v2807_v14 = vld [vmem:[%s7529_s4] sm:$0x3] }
 0x37d   :  { %2726 = vmatpush1.bf16.msra.mxu0 %v2700_v58  ;;  %2756 = vmatprep.subr.bf16.mxu1 %v6953_v17  ;;  %v2812_v9 = vrot.slane %v2807_v14, %v6343_v61  ;;  %v2816_v15 = vrot.slane %v2807_v14, %v6348_v63 }
 0x37e   :  { %3040 = vmatprep.subr.bf16.mxu0 %v5362_v1 }
 0x37f   :  { %2534 = vmatmul.mubr.bf16.vlgmr.msra.gmra.mrb[24].mxu1 %v2488_v57 }
 0x380   :  { %2738 = vmatmul.mubr.bf16.vlgmr.msra.gmra.mrb[8].mxu0 %v2588_v13  ;;  %2757 = vmatpush1.bf16.msra.mxu1 %v6961_v22 }
 0x381   :  { %4643 = vmatprep.mubr.msk.bf16.mxu1 %vm1505_vm4, %v2751_v60  ;;  %2758 = vmatprep.subr.bf16.mxu1 %v6967_v25 }
 0x382   :  { %3041 = vmatpush1.bf16.msra.mxu0 %v5279_v5 }
 0x383   :  { %3042 = vmatprep.subr.bf16.mxu0 %v5362_v1 }
 0x384   :  { %2759 = vmatpush1.bf16.msra.mxu1 %v6975_v27 }
 0x385   :  { %2760 = vmatprep.subr.bf16.mxu1 %v6982_v29 }
 0x386   :  { %3043 = vmatpush1.bf16.msra.mxu0 %v5280_v6 }
 0x387   :  { %3044 = vmatprep.subr.bf16.mxu0 %v5362_v1 }
 0x388   :  { %2761 = vmatpush1.bf16.msra.mxu1 %v6991_v30 }
 0x389   :  { %2762 = vmatprep.subr.bf16.mxu1 %v6997_v28 }
 0x38a   :  { %3045 = vmatpush1.bf16.msra.mxu0 %v5281_v7 }
 0x38b   :  { %3046 = vmatprep.subr.bf16.mxu0 %v5362_v1 }
 0x38c   :  { %2763 = vmatpush1.bf16.msra.mxu1 %v7005_v32 }
 0x38d   :  { %2764 = vmatprep.subr.bf16.mxu1 %v7011_v33 }
 0x38e   :  { %3047 = vmatpush1.bf16.msra.mxu0 %v5282_v8 }
 0x38f   :  { %3048 = vmatprep.subr.bf16.mxu0 %v5362_v1 }
 0x390   :  { %2765 = vmatpush1.bf16.msra.mxu1 %v7019_v34 }
 0x391   :  { %2766 = vmatprep.subr.bf16.mxu1 %v7025_v31 }
 0x392   :  { %3049 = vmatpush1.bf16.msra.mxu0 %v5283_v10 }
 0x393   :  { %3050 = vmatprep.subr.bf16.mxu0 %v5362_v1 }
 0x394   :  { %2767 = vmatpush1.bf16.msra.mxu1 %v7033_v35 }
 0x395   :  { %2768 = vmatprep.subr.bf16.mxu1 %v7039_v36 }
 0x396   :  { %3051 = vmatpush1.bf16.msra.mxu0 %v5284_v11 }
 0x397   :  { %3052 = vmatprep.subr.bf16.mxu0 %v5362_v1 }
 0x398   :  { %2769 = vmatpush1.bf16.msra.mxu1 %v5265_v38 }
 0x399   :  { %2770 = vmatprep.subr.bf16.mxu1 %v5270_v39 }
 0x39c   :  { %2771 = vmatpush1.bf16.msra.mxu1 %v5268_v40 }
 0x39d   :  { %2772 = vmatprep.subr.bf16.mxu1 %v5273_v18  ;;  %v5285_v18 = vld [vmem:[%s7530_s5 + $0x78] sm:$0xff]  }
 0x39e   :  { %3053 = vmatpush1.bf16.msra.mxu0 %v5285_v18 }
 0x39f   :  { %3054 = vmatprep.subr.bf16.mxu0 %v5362_v1 }
 0x3a0   :  { %2773 = vmatpush1.bf16.msra.mxu1 %v5271_v43  ;;  %v5286_v43 = vld [vmem:[%s7530_s5 + $0x80] sm:$0xff]  }
 0x3a1   :  { %2774 = vmatprep.subr.bf16.mxu1 %v5276_v45 }
 0x3a2   :  { %3055 = vmatpush1.bf16.msra.mxu0 %v5286_v43 }
 0x3a3   :  { %3056 = vmatprep.subr.bf16.mxu0 %v5362_v1 }
 0x3a4   :  { %2775 = vmatpush1.bf16.msra.mxu1 %v5274_v47 }
 0x3a5   :  { %4642 = vmatprep.subr.msk.bf16.mxu1 %vm1704_vm2, %v4639_v50 }
 0x3a8   :  { %2777 = vmatpush1.bf16.msra.mxu1 %v2700_v58 }
 0x3a9   :  { %3083 = vmatprep.subr.bf16.mxu1 %v5362_v1 }
 0x3ab   :  { %2789 = vmatmul.mubr.bf16.vlgmr.msra.gmra.mrb[24].mxu1 %v2750_v4 }
 0x3ac   :  { %3084 = vmatpush1.bf16.msra.mxu1 %v5279_v5 }
 0x3ad   :  { %3085 = vmatprep.subr.bf16.mxu1 %v5362_v1 }
 0x3b0   :  { %3086 = vmatpush1.bf16.msra.mxu1 %v5280_v6  ;;  %v5287_v6 = vld [vmem:[%s7530_s5 + $0x88] sm:$0xff]  }
 0x3b1   :  { %3087 = vmatprep.subr.bf16.mxu1 %v5362_v1  ;;  %3057 = vmatpush1.bf16.msra.mxu0 %v5287_v6 }
 0x3b2   :  { %3180 = vmatprep.subr.bf16.mxu0 %v5362_v1 }
 0x3b4   :  { %3088 = vmatpush1.bf16.msra.mxu1 %v5281_v7 }
 0x3b5   :  { %3089 = vmatprep.subr.bf16.mxu1 %v5362_v1 }
 0x3b8   :  { %3090 = vmatpush1.bf16.msra.mxu1 %v5282_v8 }
 0x3b9   :  { %3091 = vmatprep.subr.bf16.mxu1 %v5362_v1 }
 0x3bc   :  { %3092 = vmatpush1.bf16.msra.mxu1 %v5283_v10 }
 0x3bd   :  { %3093 = vmatprep.subr.bf16.mxu1 %v5362_v1 }
 0x3c0   :  { %3094 = vmatpush1.bf16.msra.mxu1 %v5284_v11 }
 0x3c1   :  { %3095 = vmatprep.subr.bf16.mxu1 %v5362_v1 }
 0x3c4   :  { %3096 = vmatpush1.bf16.msra.mxu1 %v5285_v18 }
 0x3c5   :  { %3097 = vmatprep.subr.bf16.mxu1 %v5362_v1 }
 0x3c8   :  { %3098 = vmatpush1.bf16.msra.mxu1 %v5286_v43 }
 0x3c9   :  { %3099 = vmatprep.subr.bf16.mxu1 %v5362_v1 }
 0x3cc   :  { %3100 = vmatpush1.bf16.msra.mxu1 %v5287_v6 }
 0x3cd   :  { %3223 = vmatprep.subr.bf16.mxu1 %v5362_v1 }
 0x453   :  { %v2739_v17 = vpop.f32.mrb[8].mxu0 }
 0x454   :  { %v2819_v12 = vadd.f32 %v2812_v9, %v2739_v17  ;;  %v2741_v19 = vpop.f32.mrb[9].mxu0 }
 0x455   :  { %v2820_v16 = vadd.f32 %v2816_v15, %v2741_v19  ;;  %v2743_v21 = vpop.f32.mrb[10].mxu0 }
 0x456   :  { %v2827_v20 = vmax.f32 %v2819_v12, 0.0  ;;  %v2821_v22 = vadd.f32 %v2812_v9, %v2743_v21  ;;  %v2745_v23 = vpop.f32.mrb[11].mxu0 }
 0x457   :  { %v2828_v24 = vmax.f32 %v2820_v16, 0.0  ;;  %v2822_v25 = vadd.f32 %v2816_v15, %v2745_v23 }
 0x458   :  { %2835 = vst [vmem:[#allocation3] sm:$0xff] %v2827_v20  ;;  %v2829_v26 = vmax.f32 %v2821_v22, 0.0 }
 0x459   :  { %2837 = vst.msk [vmem:[#allocation3 + $0x8] sm:$0xff] %vm2836_vm6, %v2828_v24  ;;  %v2830_v27 = vmax.f32 %v2822_v25, 0.0 }
 0x45a   :  { %2838 = vst [vmem:[#allocation3 + $0x10] sm:$0x3] %v2829_v26 }
 0x45b   :  { %2840 = vst.msk [vmem:[#allocation3 + $0x18] sm:$0x3] %vm2839_vm7, %v2830_v27 }
 0x460   :  { %v2914_v41 = vld [vmem:[#allocation3 + $0x2] ss:$8 sm:$0x3]  ;;  %v2918_v42 = vld [vmem:[#allocation3 + $0x3] ss:$8 sm:$0x3] }
 0x461   :  { %v2845_v44 = vld [vmem:[#allocation3] ss:$8 sm:$0x3]  ;;  %v2849_v45 = vld [vmem:[#allocation3 + $0x1] ss:$8 sm:$0x3]  ;;  %v2921_v50 = vmax.f32 %v2914_v41, %v2918_v42 }
 0x462   :  { %v3264_v48 = vld [vmem:[#allocation3 + $0x4] ss:$8 sm:$0x3]  ;;  %v3268_v49 = vld [vmem:[#allocation3 + $0x5] ss:$8 sm:$0x3]  ;;  %v2852_v56 = vmax.f32 %v2845_v44, %v2849_v45 }
 0x463   :  { %v3475_v54 = vld [vmem:[#allocation3 + $0x6] ss:$8 sm:$0x3]  ;;  %v3479_v55 = vld [vmem:[#allocation3 + $0x7] ss:$8 sm:$0x3]  ;;  %v7151_v5 = vmax.f32 %v3264_v48, %v3268_v49 }
 0x464   :  { %v7156_v7 = vmax.f32 %v3475_v54, %v3479_v55  ;;  %v3686_v8 = vld [vmem:[#allocation3 + $0x10] ss:$8 sm:$0x3]  ;;  %v3690_v10 = vld [vmem:[#allocation3 + $0x11] ss:$8 sm:$0x3] }
 0x465   :  { %v5288_v41 = vld [vmem:[%s7530_s5] sm:$0xff]   ;;  %v5289_v48 = vld [vmem:[%s7530_s5 + $0x8] sm:$0xff]   ;;  %v5290_v49 = vld [vmem:[%s7530_s5 + $0x10] sm:$0xff]  }
 0x466   :  { %v5293_v55 = vld [vmem:[%s7530_s5 + $0x28] sm:$0xff]  }
 0x47e   :  { %v2790_v29 = vpop.f32.mrb[24].mxu1 }
 0x47f   :  { %v2823_v30 = vadd.f32 %v2812_v9, %v2790_v29  ;;  %v2792_v28 = vpop.f32.mrb[25].mxu1 }
 0x480   :  { %v2824_v32 = vadd.f32 %v2816_v15, %v2792_v28  ;;  %v2794_v33 = vpop.f32.mrb[26].mxu1 }
 0x481   :  { %v2831_v34 = vmax.f32 %v2823_v30, 0.0  ;;  %v2825_v31 = vadd.f32 %v2812_v9, %v2794_v33  ;;  %v2796_v35 = vpop.f32.mrb[27].mxu1 }
 0x482   :  { %v2832_v36 = vmax.f32 %v2824_v32, 0.0  ;;  %v2826_v38 = vadd.f32 %v2816_v15, %v2796_v35  ;;  %v7166_v15 = vmax.f32 %v3686_v8, %v3690_v10  ;;  %v5297_v8 = vld [vmem:[%s7530_s5 + $0x90] sm:$0xff]  }
 0x483   :  { %2841 = vst [vmem:[#allocation3 + $0x20] sm:$0xff] %v2831_v34  ;;  %v2833_v39 = vmax.f32 %v2825_v31, 0.0 }
 0x484   :  { %2842 = vst.msk [vmem:[#allocation3 + $0x28] sm:$0xff] %vm2836_vm6, %v2832_v36  ;;  %v2834_v40 = vmax.f32 %v2826_v38, 0.0 }
 0x485   :  { %2843 = vst [vmem:[#allocation3 + $0x30] sm:$0x3] %v2833_v39 }
 0x486   :  { %2844 = vst.msk [vmem:[#allocation3 + $0x38] sm:$0x3] %vm2839_vm7, %v2834_v40 }
 0x48b   :  { %v2916_v46 = vld [vmem:[#allocation3 + $0x22] ss:$8 sm:$0x3]  ;;  %v2920_v47 = vld [vmem:[#allocation3 + $0x23] ss:$8 sm:$0x3] }
 0x48c   :  { %v2922_v51 = vmax.f32 %v2916_v46, %v2920_v47  ;;  %v2847_v52 = vld [vmem:[#allocation3 + $0x20] ss:$8 sm:$0x3]  ;;  %v2851_v53 = vld [vmem:[#allocation3 + $0x21] ss:$8 sm:$0x3] }
 0x48d   :  { %v2853_v58 = vmax.f32 %v2847_v52, %v2851_v53  ;;  %v3266_v59 = vld [vmem:[#allocation3 + $0x24] ss:$8 sm:$0x3]  ;;  %v3270_v37 = vld [vmem:[#allocation3 + $0x25] ss:$8 sm:$0x3] }
 0x48e   :  { %v4950_v62 = vpack.i.bf16 %v2922_v51, %v2921_v50  ;;  %v7147_v57 = vmax.f32 %v3266_v59, %v3270_v37  ;;  %v3477_v13 = vld [vmem:[#allocation3 + $0x26] ss:$8 sm:$0x3]  ;;  %v3481_v60 = vld [vmem:[#allocation3 + $0x27] ss:$8 sm:$0x3] }
 0x48f   :  { %v4955_v0 = vpack.i.bf16 %v2853_v58, %v2852_v56  ;;  %v7149_v2 = vmax.f32 %v3477_v13, %v3481_v60  ;;  %v3688_v3 = vld [vmem:[#allocation3 + $0x30] ss:$8 sm:$0x3]  ;;  %v3692_v4 = vld [vmem:[#allocation3 + $0x31] ss:$8 sm:$0x3] }
 0x490   :  { %4951 = vrot.lane.b32.xlu0 %v4950_v62, %s5365_s22  ;;  %v4960_v11 = vpack.i.bf16 %v7147_v57, %v7151_v5  ;;  %v7160_v14 = vmax.f32 %v3688_v3, %v3692_v4  ;;  %v5292_v52 = vld [vmem:[%s7530_s5 + $0x20] sm:$0xff]   ;;  %v5294_v59 = vld [vmem:[%s7530_s5 + $0x30] sm:$0xff]   ;;  %v5295_v13 = vld [vmem:[%s7530_s5 + $0x38] sm:$0xff]  }
 0x491   :  { %4956 = vrot.lane.b32.xlu1 %v4955_v0, %s5365_s22  ;;  %v4965_v9 = vpack.i.bf16 %v7149_v2, %v7156_v7  ;;  %v5296_v3 = vld [vmem:[%s7530_s5 + $0x40] sm:$0xff]  }
 0x492   :  { %v4970_v17 = vpack.i.bf16 %v7160_v14, %v7166_v15 }
 0x494   :  { %4961 = vrot.lane.b32.xlu0 %v4960_v11, %s5365_s22 }
 0x495   :  { %4966 = vrot.lane.b32.xlu1 %v4965_v9, %s5365_s22 }
 0x498   :  { %4971 = vrot.lane.b32.xlu0 %v4970_v17, %s5365_s22 }
 0x502   :  { %v4952_v12 = vpop.permute.xlu0 %4951 }
 0x503   :  { %v4954_v19 = vunpack.i.h.bf16 %v4952_v12  ;;  %v4953_v16 = vunpack.i.l.bf16 %v4952_v12  ;;  %v4957_v21 = vpop.permute.xlu1 %4956  ;;  %v5298_v12 = vld [vmem:[%s7530_s5 + $0x98] sm:$0xff]  }
 0x504   :  { %v4959_v20 = vunpack.i.h.bf16 %v4957_v21  ;;  %v4958_v22 = vunpack.i.l.bf16 %v4957_v21  ;;  %v5301_v21 = vld [vmem:[%s7530_s5 + $0xb0] sm:$0xff]  }
 0x505   :  { %v2930_v23 = vrot.slane %v4954_v19, 1  ;;  %v2929_v24 = vrot.slane %v4953_v16, 1 }
 0x506   :  { %v2861_v25 = vrot.slane %v4959_v20, 1  ;;  %v2860_v26 = vrot.slane %v4958_v22, 1 }
 0x507   :  { %v2932_v27 = vsel %vm2862_vm8, %v4954_v19, %v2930_v23  ;;  %v2931_v29 = vsel %vm2862_vm8, %v4953_v16, %v2929_v24  ;;  %v5299_v19 = vld [vmem:[%s7530_s5 + $0xa0] sm:$0xff]   ;;  %v5300_v16 = vld [vmem:[%s7530_s5 + $0xa8] sm:$0xff]   ;;  %v5302_v23 = vld [vmem:[%s7530_s5 + $0xb8] sm:$0xff]  }
 0x508   :  { %v2936_v30 = vmax.f32 %v2922_v51, %v2932_v27  ;;  %v2935_v28 = vmax.f32 %v2921_v50, %v2931_v29  ;;  %v2864_v32 = vsel %vm2862_vm8, %v4959_v20, %v2861_v25  ;;  %v2863_v33 = vsel %vm2862_vm8, %v4958_v22, %v2860_v26  ;;  %v5291_v50 = vld [vmem:[%s7530_s5 + $0x18] sm:$0xff]   ;;  %v4962_v51 = vpop.permute.xlu0 %4961  ;;  %v4967_v20 = vpop.permute.xlu1 %4966  ;;  %v5303_v26 = vld [vmem:[%s7530_s5 + $0xc0] sm:$0xff]  }
 0x509   :  { %v7176_v35 = vmax.f32 %v2853_v58, %v2864_v32  ;;  %v7178_v36 = vmax.f32 %v2852_v56, %v2863_v33  ;;  %v4963_v53 = vunpack.i.l.bf16 %v4962_v51  ;;  %v4964_v54 = vunpack.i.h.bf16 %v4962_v51 }
 0x50a   :  { %v2965_v34 = vrot.slane %v2935_v28, %v6348_v63  ;;  %v2973_v31 = vrot.slane %v2936_v30, %v6348_v63  ;;  %v2961_v40 = vrot.slane %v2935_v28, %v6343_v61  ;;  %v2969_v18 = vrot.slane %v2936_v30, %v6343_v61  ;;  %v5304_v30 = vld [vmem:[%s7530_s5 + $0xc8] sm:$0xff]  }
 0x50b   :  { %v2896_v44 = vrot.slane %v7178_v36, %v6348_v63  ;;  %v2904_v45 = vrot.slane %v7176_v35, %v6348_v63  ;;  %v3279_v56 = vrot.slane %v4963_v53, 1  ;;  %v3280_v58 = vrot.slane %v4964_v54, 1 }
 0x50c   :  { %v2979_v38 = vpack.c.bf16 %v2965_v34, %v2965_v34  ;;  %v2981_v39 = vpack.c.bf16 %v2973_v31, %v2973_v31  ;;  %v2978_v42 = vpack.c.bf16 %v2961_v40, %v2961_v40  ;;  %v2980_v43 = vpack.c.bf16 %v2969_v18, %v2969_v18  ;;  %v5305_v34 = vld [vmem:[%s7530_s5 + $0xd0] sm:$0xff]  }
 0x50d   :  { %v2910_v46 = vpack.c.bf16 %v2896_v44, %v2896_v44  ;;  %v2912_v47 = vpack.c.bf16 %v2904_v45, %v2904_v45  ;;  %v3281_v37 = vsel %vm2862_vm8, %v4963_v53, %v3279_v56  ;;  %v3282_v62 = vsel %vm2862_vm8, %v4964_v54, %v3280_v58  ;;  %v5310_v44 = vld [vmem:[%s7530_s5 + $0xf8] sm:$0xff]   ;;  %v4972_v45 = vpop.permute.xlu0 %4971  ;;  %v5313_v53 = vld [vmem:[%s7530_s5 + $0x110] sm:$0xff]  }
 0x50e   :  { %4671 = vmatprep.mubr.msk.bf16.mxu0 %vm3036_vm9, %v2979_v38  ;;  %4672 = vmatprep.mubr.msk.bf16.mxu1 %vm3036_vm9, %v2981_v39  ;;  %v7231_v60 = vmax.f32 %v7151_v5, %v3281_v37  ;;  %v7234_v0 = vmax.f32 %v7147_v57, %v3282_v62  ;;  %v2892_v4 = vrot.slane %v7178_v36, %v6343_v61  ;;  %v4968_v22 = vunpack.i.l.bf16 %v4967_v20  ;;  %v5314_v58 = vld [vmem:[%s7530_s5 + $0x118] sm:$0xff]   ;;  %v5315_v37 = vld [vmem:[%s7530_s5 + $0x120] sm:$0xff]  }
 0x50f   :  { %3073 = vmatmul.mubr.bf16.vlgmr.msra.gmra.mrb[12].mxu0 %v2978_v42  ;;  %3116 = vmatmul.mubr.bf16.vlgmr.msra.gmra.mrb[28].mxu1 %v2980_v43  ;;  %v2900_v5 = vrot.slane %v7176_v35, %v6343_v61  ;;  %v4969_v24 = vunpack.i.h.bf16 %v4967_v20  ;;  %v5306_v35 = vld [vmem:[%s7530_s5 + $0xd8] sm:$0xff]   ;;  %v5308_v42 = vld [vmem:[%s7530_s5 + $0xe8] sm:$0xff]   ;;  %v5309_v43 = vld [vmem:[%s7530_s5 + $0xf0] sm:$0xff]  }
 0x510   :  { %3181 = vmatpush1.bf16.msra.mxu0 %v5288_v41  ;;  %3224 = vmatpush1.bf16.msra.mxu1 %v5288_v41  ;;  %v3315_v57 = vrot.slane %v7231_v60, %v6348_v63  ;;  %v3323_v6 = vrot.slane %v7234_v0, %v6348_v63  ;;  %v2909_v10 = vpack.c.bf16 %v2892_v4, %v2892_v4  ;;  %v3490_v25 = vrot.slane %v4968_v22, 1  ;;  %v5307_v41 = vld [vmem:[%s7530_s5 + $0xe0] sm:$0xff]   ;;  %v5316_v4 = vld [vmem:[%s7530_s5 + $0x128] sm:$0xff]   ;;  %v5327_v20 = vld [vmem:[%s7532_s7 + $0x18] sm:$0xff]  }
 0x511   :  { %3182 = vmatprep.subr.bf16.mxu0 %v5362_v1  ;;  %3225 = vmatprep.subr.bf16.mxu1 %v5362_v1  ;;  %v2911_v11 = vpack.c.bf16 %v2900_v5, %v2900_v5  ;;  %v3491_v27 = vrot.slane %v4969_v24, 1  ;;  %v3311_v31 = vrot.slane %v7231_v60, %v6343_v61  ;;  %v5318_v5 = vld [vmem:[%s7530_s5 + $0x138] sm:$0xff]  }
 0x512   :  { %4682 = vmatprep.mubr.msk.bf16.mxu0 %vm3036_vm9, %v2910_v46  ;;  %4683 = vmatprep.mubr.msk.bf16.mxu1 %vm3036_vm9, %v2912_v47  ;;  %v3329_v9 = vpack.c.bf16 %v3315_v57, %v3315_v57  ;;  %v3331_v17 = vpack.c.bf16 %v3323_v6, %v3323_v6  ;;  %v3492_v29 = vsel %vm2862_vm8, %v4968_v22, %v3490_v25  ;;  %v4973_v46 = vunpack.i.l.bf16 %v4972_v45  ;;  %v5311_v47 = vld [vmem:[%s7530_s5 + $0x100] sm:$0xff]   ;;  %v5320_v6 = vld [vmem:[%s7530_s5 + $0x148] sm:$0xff]  }
 0x513   :  { %v3493_v28 = vsel %vm2862_vm8, %v4969_v24, %v3491_v27  ;;  %v7294_v32 = vmax.f32 %v7156_v7, %v3492_v29  ;;  %v3319_v7 = vrot.slane %v7234_v0, %v6343_v61  ;;  %v3328_v38 = vpack.c.bf16 %v3311_v31, %v3311_v31  ;;  %v5319_v57 = vld [vmem:[%s7530_s5 + $0x140] sm:$0xff]  }
 0x514   :  { %3183 = vmatpush1.bf16.msra.mxu0 %v5289_v48  ;;  %3226 = vmatpush1.bf16.msra.mxu1 %v5289_v48  ;;  %v7297_v33 = vmax.f32 %v7149_v2, %v3493_v28  ;;  %v4974_v48 = vunpack.i.h.bf16 %v4972_v45  ;;  %v5328_v22 = vld [vmem:[%s7532_s7 + $0x20] sm:$0xff]  }
 0x515   :  { %3184 = vmatprep.subr.bf16.mxu0 %v5362_v1  ;;  %3227 = vmatprep.subr.bf16.mxu1 %v5362_v1  ;;  %v3526_v2 = vrot.slane %v7294_v32, %v6348_v63  ;;  %v3330_v39 = vpack.c.bf16 %v3319_v7, %v3319_v7 }
 0x516   :  { %v3534_v36 = vrot.slane %v7297_v33, %v6348_v63  ;;  %v3702_v51 = vrot.slane %v4974_v48, 1 }
 0x517   :  { %v3540_v40 = vpack.c.bf16 %v3526_v2, %v3526_v2 }
 0x518   :  { %3185 = vmatpush1.bf16.msra.mxu0 %v5290_v49  ;;  %3228 = vmatpush1.bf16.msra.mxu1 %v5290_v49  ;;  %v3542_v18 = vpack.c.bf16 %v3534_v36, %v3534_v36  ;;  %v3701_v49 = vrot.slane %v4973_v46, 1  ;;  %v3704_v54 = vsel %vm2862_vm8, %v4974_v48, %v3702_v51 }
 0x519   :  { %3186 = vmatprep.subr.bf16.mxu0 %v5362_v1  ;;  %3229 = vmatprep.subr.bf16.mxu1 %v5362_v1  ;;  %v7360_v56 = vmax.f32 %v7160_v14, %v3704_v54 }
 0x51b   :  { %v3745_v62 = vrot.slane %v7360_v56, %v6348_v63 }
 0x51c   :  { %3187 = vmatpush1.bf16.msra.mxu0 %v5291_v50  ;;  %3230 = vmatpush1.bf16.msra.mxu1 %v5291_v50  ;;  %v5312_v50 = vld [vmem:[%s7530_s5 + $0x108] sm:$0xff]  }
 0x51d   :  { %3188 = vmatprep.subr.bf16.mxu0 %v5362_v1  ;;  %3231 = vmatprep.subr.bf16.mxu1 %v5362_v1 }
 0x520   :  { %3189 = vmatpush1.bf16.msra.mxu0 %v5292_v52  ;;  %3232 = vmatpush1.bf16.msra.mxu1 %v5292_v52  ;;  %v3703_v52 = vsel %vm2862_vm8, %v4973_v46, %v3701_v49 }
 0x521   :  { %3190 = vmatprep.subr.bf16.mxu0 %v5362_v1  ;;  %3233 = vmatprep.subr.bf16.mxu1 %v5362_v1 }
 0x524   :  { %3191 = vmatpush1.bf16.msra.mxu0 %v5293_v55  ;;  %3234 = vmatpush1.bf16.msra.mxu1 %v5293_v55  ;;  %v7357_v55 = vmax.f32 %v7166_v15, %v3703_v52  ;;  %v3530_v15 = vrot.slane %v7297_v33, %v6343_v61  ;;  %v5330_v33 = vld [vmem:[%s7532_s7 + $0x30] sm:$0xff]  }
 0x525   :  { %3192 = vmatprep.subr.bf16.mxu0 %v5362_v1  ;;  %3235 = vmatprep.subr.bf16.mxu1 %v5362_v1 }
 0x526   :  { %v3737_v14 = vrot.slane %v7357_v55, %v6348_v63  ;;  %v3541_v60 = vpack.c.bf16 %v3530_v15, %v3530_v15  ;;  %v5317_v63 = vld [vmem:[%s7530_s5 + $0x130] sm:$0xff]  }
 0x528   :  { %3193 = vmatpush1.bf16.msra.mxu0 %v5294_v59  ;;  %3236 = vmatpush1.bf16.msra.mxu1 %v5294_v59  ;;  %v3522_v59 = vrot.slane %v7294_v32, %v6343_v61  ;;  %v3751_v0 = vpack.c.bf16 %v3737_v14, %v3737_v14 }
 0x529   :  { %3194 = vmatprep.subr.bf16.mxu0 %v5362_v1  ;;  %3237 = vmatprep.subr.bf16.mxu1 %v5362_v1 }
 0x52c   :  { %3195 = vmatpush1.bf16.msra.mxu0 %v5295_v13  ;;  %3238 = vmatpush1.bf16.msra.mxu1 %v5295_v13  ;;  %v3539_v13 = vpack.c.bf16 %v3522_v59, %v3522_v59 }
 0x52d   :  { %3196 = vmatprep.subr.bf16.mxu0 %v5362_v1  ;;  %3239 = vmatprep.subr.bf16.mxu1 %v5362_v1 }
 0x530   :  { %3197 = vmatpush1.bf16.msra.mxu0 %v5296_v3  ;;  %3240 = vmatpush1.bf16.msra.mxu1 %v5296_v3  ;;  %v3753_v3 = vpack.c.bf16 %v3745_v62, %v3745_v62 }
 0x531   :  { %3389 = vmatprep.subr.bf16.mxu0 %v5362_v1  ;;  %3432 = vmatprep.subr.bf16.mxu1 %v5362_v1 }
 0x533   :  { %3213 = vmatmul.mubr.bf16.vlgmr.msra.gmra.mrb[16].mxu0 %v2909_v10  ;;  %3256 = vmatmul.mubr.bf16.vlgmr.msra.gmra.mrb[32].mxu1 %v2911_v11  ;;  %v5322_v10 = vld [vmem:[%s7530_s5 + $0x158] sm:$0xff]   ;;  %v5323_v11 = vld [vmem:[%s7530_s5 + $0x160] sm:$0xff]  }
 0x534   :  { %3390 = vmatpush1.bf16.msra.mxu0 %v5297_v8  ;;  %4711 = vmatprep.mubr.msk.bf16.mxu0 %vm3036_vm9, %v3329_v9  ;;  %v3733_v9 = vrot.slane %v7357_v55, %v6343_v61 }
 0x535   :  { %3433 = vmatpush1.bf16.msra.mxu1 %v5297_v8  ;;  %4712 = vmatprep.mubr.msk.bf16.mxu1 %vm3036_vm9, %v3331_v17  ;;  %v5321_v8 = vld [vmem:[%s7530_s5 + $0x150] sm:$0xff]   ;;  %v3741_v17 = vrot.slane %v7360_v56, %v6343_v61 }
 0x536   :  { %3391 = vmatprep.subr.bf16.mxu0 %v5362_v1  ;;  %3434 = vmatprep.subr.bf16.mxu1 %v5362_v1  ;;  %v5326_v61 = vld [vmem:[%s7532_s7 + $0x10] sm:$0xff]  }
 0x538   :  { %3392 = vmatpush1.bf16.msra.mxu0 %v5298_v12 }
 0x539   :  { %3435 = vmatpush1.bf16.msra.mxu1 %v5298_v12  ;;  %3393 = vmatprep.subr.bf16.mxu0 %v5362_v1  ;;  %v3750_v12 = vpack.c.bf16 %v3733_v9, %v3733_v9 }
 0x53a   :  { %3436 = vmatprep.subr.bf16.mxu1 %v5362_v1 }
 0x53c   :  { %3394 = vmatpush1.bf16.msra.mxu0 %v5299_v19 }
 0x53d   :  { %3437 = vmatpush1.bf16.msra.mxu1 %v5299_v19  ;;  %3395 = vmatprep.subr.bf16.mxu0 %v5362_v1  ;;  %v3752_v19 = vpack.c.bf16 %v3741_v17, %v3741_v17 }
 0x53e   :  { %3438 = vmatprep.subr.bf16.mxu1 %v5362_v1 }
 0x540   :  { %3396 = vmatpush1.bf16.msra.mxu0 %v5300_v16 }
 0x541   :  { %3439 = vmatpush1.bf16.msra.mxu1 %v5300_v16  ;;  %3397 = vmatprep.subr.bf16.mxu0 %v5362_v1  ;;  %v5324_v16 = vld [vmem:[%s7532_s7] sm:$0xff]  }
 0x542   :  { %3440 = vmatprep.subr.bf16.mxu1 %v5362_v1 }
 0x544   :  { %3398 = vmatpush1.bf16.msra.mxu0 %v5301_v21 }
 0x545   :  { %3441 = vmatpush1.bf16.msra.mxu1 %v5301_v21  ;;  %3399 = vmatprep.subr.bf16.mxu0 %v5362_v1  ;;  %v5366_v21 = vmov 0.0  }
 0x546   :  { %3442 = vmatprep.subr.bf16.mxu1 %v5362_v1 }
 0x548   :  { %3400 = vmatpush1.bf16.msra.mxu0 %v5302_v23 }
 0x549   :  { %3443 = vmatpush1.bf16.msra.mxu1 %v5302_v23  ;;  %3401 = vmatprep.subr.bf16.mxu0 %v5362_v1 }
 0x54a   :  { %3444 = vmatprep.subr.bf16.mxu1 %v5362_v1 }
 0x54c   :  { %3402 = vmatpush1.bf16.msra.mxu0 %v5303_v26 }
 0x54d   :  { %3445 = vmatpush1.bf16.msra.mxu1 %v5303_v26  ;;  %3403 = vmatprep.subr.bf16.mxu0 %v5362_v1 }
 0x54e   :  { %3446 = vmatprep.subr.bf16.mxu1 %v5362_v1 }
 0x550   :  { %3404 = vmatpush1.bf16.msra.mxu0 %v5304_v30 }
 0x551   :  { %3447 = vmatpush1.bf16.msra.mxu1 %v5304_v30  ;;  %3405 = vmatprep.subr.bf16.mxu0 %v5362_v1  ;;  %v5329_v30 = vld [vmem:[%s7532_s7 + $0x28] sm:$0xff]  }
 0x552   :  { %3448 = vmatprep.subr.bf16.mxu1 %v5362_v1 }
 0x554   :  { %3406 = vmatpush1.bf16.msra.mxu0 %v5305_v34 }
 0x555   :  { %3449 = vmatpush1.bf16.msra.mxu1 %v5305_v34  ;;  %3600 = vmatprep.subr.bf16.mxu0 %v5362_v1  ;;  %v5331_v34 = vld [vmem:[%s7532_s7 + $0x38] ss:$0 sps:$4 sm:$0xff]  }
 0x556   :  { %3643 = vmatprep.subr.bf16.mxu1 %v5362_v1  ;;  %v3970_v31 = vsel %vm3968_vm10, %v5331_v34, 0 }
 0x557   :  { %3422 = vmatmul.mubr.bf16.vlgmr.msra.gmra.mrb[20].mxu0 %v3328_v38 }
 0x558   :  { %3465 = vmatmul.mubr.bf16.vlgmr.msra.gmra.mrb[36].mxu1 %v3330_v39  ;;  %3601 = vmatpush1.bf16.msra.mxu0 %v5306_v35 }
 0x559   :  { %4740 = vmatprep.mubr.msk.bf16.mxu0 %vm3036_vm9, %v3540_v40  ;;  %3644 = vmatpush1.bf16.msra.mxu1 %v5306_v35 }
 0x55a   :  { %4741 = vmatprep.mubr.msk.bf16.mxu1 %vm3036_vm9, %v3542_v18  ;;  %3602 = vmatprep.subr.bf16.mxu0 %v5362_v1 }
 0x55b   :  { %3645 = vmatprep.subr.bf16.mxu1 %v5362_v1 }
 0x55c   :  { %3603 = vmatpush1.bf16.msra.mxu0 %v5307_v41 }
 0x55d   :  { %3646 = vmatpush1.bf16.msra.mxu1 %v5307_v41  ;;  %3604 = vmatprep.subr.bf16.mxu0 %v5362_v1 }
 0x55e   :  { %3647 = vmatprep.subr.bf16.mxu1 %v5362_v1 }
 0x560   :  { %3605 = vmatpush1.bf16.msra.mxu0 %v5308_v42 }
 0x561   :  { %3648 = vmatpush1.bf16.msra.mxu1 %v5308_v42  ;;  %3606 = vmatprep.subr.bf16.mxu0 %v5362_v1 }
 0x562   :  { %3649 = vmatprep.subr.bf16.mxu1 %v5362_v1 }
 0x564   :  { %3607 = vmatpush1.bf16.msra.mxu0 %v5309_v43 }
 0x565   :  { %3650 = vmatpush1.bf16.msra.mxu1 %v5309_v43  ;;  %3608 = vmatprep.subr.bf16.mxu0 %v5362_v1 }
 0x566   :  { %3651 = vmatprep.subr.bf16.mxu1 %v5362_v1 }
 0x568   :  { %3609 = vmatpush1.bf16.msra.mxu0 %v5310_v44 }
 0x569   :  { %3652 = vmatpush1.bf16.msra.mxu1 %v5310_v44  ;;  %3610 = vmatprep.subr.bf16.mxu0 %v5362_v1 }
 0x56a   :  { %3653 = vmatprep.subr.bf16.mxu1 %v5362_v1 }
 0x56c   :  { %3611 = vmatpush1.bf16.msra.mxu0 %v5311_v47 }
 0x56d   :  { %3654 = vmatpush1.bf16.msra.mxu1 %v5311_v47  ;;  %3612 = vmatprep.subr.bf16.mxu0 %v5362_v1 }
 0x56e   :  { %3655 = vmatprep.subr.bf16.mxu1 %v5362_v1 }
 0x570   :  { %3613 = vmatpush1.bf16.msra.mxu0 %v5312_v50 }
 0x571   :  { %3656 = vmatpush1.bf16.msra.mxu1 %v5312_v50  ;;  %3614 = vmatprep.subr.bf16.mxu0 %v5362_v1 }
 0x572   :  { %3657 = vmatprep.subr.bf16.mxu1 %v5362_v1 }
 0x574   :  { %3615 = vmatpush1.bf16.msra.mxu0 %v5313_v53 }
 0x575   :  { %3658 = vmatpush1.bf16.msra.mxu1 %v5313_v53  ;;  %3616 = vmatprep.subr.bf16.mxu0 %v5362_v1 }
 0x576   :  { %3659 = vmatprep.subr.bf16.mxu1 %v5362_v1 }
 0x578   :  { %3617 = vmatpush1.bf16.msra.mxu0 %v5314_v58 }
 0x579   :  { %3660 = vmatpush1.bf16.msra.mxu1 %v5314_v58  ;;  %3811 = vmatprep.subr.bf16.mxu0 %v5362_v1 }
 0x57a   :  { %3854 = vmatprep.subr.bf16.mxu1 %v5362_v1 }
 0x57b   :  { %3633 = vmatmul.mubr.bf16.vlgmr.msra.gmra.mrb[24].mxu0 %v3539_v13 }
 0x57c   :  { %3676 = vmatmul.mubr.bf16.vlgmr.msra.gmra.mrb[40].mxu1 %v3541_v60  ;;  %3812 = vmatpush1.bf16.msra.mxu0 %v5315_v37  ;;  %v3896_v60 = vld [vmem:[%s7531_s6] sm:$0x1] }
 0x57d   :  { %4769 = vmatprep.mubr.msk.bf16.mxu0 %vm3036_vm9, %v3751_v0  ;;  %3855 = vmatpush1.bf16.msra.mxu1 %v5315_v37 }
 0x57e   :  { %4770 = vmatprep.mubr.msk.bf16.mxu1 %vm3036_vm9, %v3753_v3  ;;  %3813 = vmatprep.subr.bf16.mxu0 %v5362_v1 }
 0x57f   :  { %3856 = vmatprep.subr.bf16.mxu1 %v5362_v1 }
 0x580   :  { %3814 = vmatpush1.bf16.msra.mxu0 %v5316_v4 }
 0x581   :  { %3857 = vmatpush1.bf16.msra.mxu1 %v5316_v4  ;;  %3815 = vmatprep.subr.bf16.mxu0 %v5362_v1 }
 0x582   :  { %3858 = vmatprep.subr.bf16.mxu1 %v5362_v1 }
 0x584   :  { %3816 = vmatpush1.bf16.msra.mxu0 %v5317_v63 }
 0x585   :  { %3859 = vmatpush1.bf16.msra.mxu1 %v5317_v63  ;;  %3817 = vmatprep.subr.bf16.mxu0 %v5362_v1 }
 0x586   :  { %3860 = vmatprep.subr.bf16.mxu1 %v5362_v1 }
 0x588   :  { %3818 = vmatpush1.bf16.msra.mxu0 %v5318_v5 }
 0x589   :  { %3861 = vmatpush1.bf16.msra.mxu1 %v5318_v5  ;;  %3819 = vmatprep.subr.bf16.mxu0 %v5362_v1 }
 0x58a   :  { %3862 = vmatprep.subr.bf16.mxu1 %v5362_v1 }
 0x58c   :  { %3820 = vmatpush1.bf16.msra.mxu0 %v5319_v57 }
 0x58d   :  { %3863 = vmatpush1.bf16.msra.mxu1 %v5319_v57  ;;  %3821 = vmatprep.subr.bf16.mxu0 %v5362_v1 }
 0x58e   :  { %3864 = vmatprep.subr.bf16.mxu1 %v5362_v1 }
 0x590   :  { %3822 = vmatpush1.bf16.msra.mxu0 %v5320_v6 }
 0x591   :  { %3865 = vmatpush1.bf16.msra.mxu1 %v5320_v6  ;;  %3823 = vmatprep.subr.bf16.mxu0 %v5362_v1 }
 0x592   :  { %3866 = vmatprep.subr.bf16.mxu1 %v5362_v1 }
 0x594   :  { %3824 = vmatpush1.bf16.msra.mxu0 %v5321_v8 }
 0x595   :  { %3867 = vmatpush1.bf16.msra.mxu1 %v5321_v8  ;;  %3825 = vmatprep.subr.bf16.mxu0 %v5362_v1 }
 0x596   :  { %3868 = vmatprep.subr.bf16.mxu1 %v5362_v1 }
 0x598   :  { %3826 = vmatpush1.bf16.msra.mxu0 %v5322_v10 }
 0x599   :  { %3869 = vmatpush1.bf16.msra.mxu1 %v5322_v10  ;;  %3827 = vmatprep.subr.bf16.mxu0 %v5362_v1 }
 0x59a   :  { %3870 = vmatprep.subr.bf16.mxu1 %v5362_v1  ;;  %v5325_v1 = vld [vmem:[%s7532_s7 + $0x8] sm:$0xff]  }
 0x59c   :  { %3828 = vmatpush1.bf16.msra.mxu0 %v5323_v11 }
 0x59d   :  { %3871 = vmatpush1.bf16.msra.mxu1 %v5323_v11  ;;  %4821 = vmatprep.subr.bf16.mxu0 %v5366_v21 }
 0x59e   :  { %4841 = vmatprep.subr.bf16.mxu1 %v5366_v21 }
 0x59f   :  { %3844 = vmatmul.mubr.bf16.vlgmr.msra.gmra.mrb[28].mxu0 %v3750_v12 }
 0x5a0   :  { %3887 = vmatmul.mubr.bf16.vlgmr.msra.gmra.mrb[44].mxu1 %v3752_v19  ;;  %4822 = vmatpush3.bf16.msra.mxu0 %v5324_v16  ;;  %v5332_v19 = vld [vmem:[%s7534_s9] sm:$0xff]  }
 0x5a1   :  { %4842 = vmatpush3.bf16.msra.mxu1 %v5324_v16  ;;  %4823 = vmatprep.subr.bf16.mxu0 %v5366_v21 }
 0x5a2   :  { %4843 = vmatprep.subr.bf16.mxu1 %v5366_v21  ;;  %4837 = vmatprep.mubr.msk.bf16.mxu0 %vm5367_vm11, %v5366_v21 }
 0x5a3   :  { %4857 = vmatprep.mubr.msk.bf16.mxu1 %vm5367_vm11, %v5366_v21 }
 0x5a4   :  { %4824 = vmatpush3.bf16.msra.mxu0 %v5325_v1 }
 0x5a5   :  { %4844 = vmatpush3.bf16.msra.mxu1 %v5325_v1  ;;  %4825 = vmatprep.subr.bf16.mxu0 %v5366_v21 }
 0x5a6   :  { %4845 = vmatprep.subr.bf16.mxu1 %v5366_v21 }
 0x5a8   :  { %4826 = vmatpush3.bf16.msra.mxu0 %v5326_v61 }
 0x5a9   :  { %4846 = vmatpush3.bf16.msra.mxu1 %v5326_v61  ;;  %4827 = vmatprep.subr.bf16.mxu0 %v5366_v21  ;;  %v5333_v61 = vld [vmem:[%s7534_s9 + $0x8] sm:$0xff]  }
 0x5aa   :  { %4847 = vmatprep.subr.bf16.mxu1 %v5366_v21 }
 0x5ac   :  { %4828 = vmatpush3.bf16.msra.mxu0 %v5327_v20 }
 0x5ad   :  { %4848 = vmatpush3.bf16.msra.mxu1 %v5327_v20  ;;  %4829 = vmatprep.subr.bf16.mxu0 %v5366_v21  ;;  %v5334_v20 = vld [vmem:[%s7534_s9 + $0x10] sm:$0xff]  }
 0x5ae   :  { %4849 = vmatprep.subr.bf16.mxu1 %v5366_v21 }
 0x5b0   :  { %4830 = vmatpush3.bf16.msra.mxu0 %v5328_v22 }
 0x5b1   :  { %4850 = vmatpush3.bf16.msra.mxu1 %v5328_v22  ;;  %4831 = vmatprep.subr.bf16.mxu0 %v5366_v21  ;;  %v5335_v22 = vld [vmem:[%s7534_s9 + $0x18] sm:$0xff]  }
 0x5b2   :  { %4851 = vmatprep.subr.bf16.mxu1 %v5366_v21 }
 0x5b4   :  { %4832 = vmatpush3.bf16.msra.mxu0 %v5329_v30 }
 0x5b5   :  { %4852 = vmatpush3.bf16.msra.mxu1 %v5329_v30  ;;  %4833 = vmatprep.subr.bf16.mxu0 %v5366_v21 }
 0x5b6   :  { %4853 = vmatprep.subr.bf16.mxu1 %v5366_v21 }
 0x5b8   :  { %4834 = vmatpush3.bf16.msra.mxu0 %v5330_v33 }
 0x5b9   :  { %4854 = vmatpush3.bf16.msra.mxu1 %v5330_v33  ;;  %4835 = vmatprep.subr.bf16.mxu0 %v5366_v21 }
 0x5ba   :  { %4855 = vmatprep.subr.bf16.mxu1 %v5366_v21 }
 0x5bc   :  { %4836 = vmatpush3.bf16.msra.mxu0 %v3970_v31 }
 0x5bd   :  { %4856 = vmatpush3.bf16.msra.mxu1 %v3970_v31  ;;  %4861 = vmatprep.subr.bf16.mxu0 %v5366_v21 }
 0x5be   :  { %4877 = vmatprep.subr.bf16.mxu1 %v5366_v21 }
 0x5e2   :  { %v3074_v23 = vpop.f32.mrb[12].mxu0  ;;  %v3117_v24 = vpop.f32.mrb[28].mxu1 }
 0x5e3   :  { %v3076_v25 = vpop.f32.mrb[13].mxu0  ;;  %v3119_v26 = vpop.f32.mrb[29].mxu1 }
 0x5e4   :  { %v3077_v27 = vpop.f32.mrb[14].mxu0  ;;  %v3120_v29 = vpop.f32.mrb[30].mxu1  ;;  %v3918_v26 = vld [vmem:[%s7533_s8] sm:$0x1]  ;;  %s5368_s8 = smov [#allocation4]  }
 0x5e5   :  { %v3078_v28 = vpop.f32.mrb[15].mxu0  ;;  %v3121_v32 = vpop.f32.mrb[31].mxu1  ;;  %s4203_s29 = sshll.u32 %s5368_s8, 4  ;;  %s4204_s29 = int_to_ptr.vmem [resolvable:$true] %s4203_s29 }
 0x5e6   :  { %s5338_s1 = scalar_lea.vmem %s4204_s29, 32  ;;  %p5343_p1 = scmp.lt.s32.totalorder %s4204_s29, %s4204_s29 }
 0x5e7   :  { %p5339_p0 = scmp.ne.s32.totalorder %s4204_s29, %s5338_s1  ;;  %p5344_p2 = scmp.lt.s32.totalorder %s5338_s1, %s5338_s1 }
 0x5e9   :  { %p5345_p3 = por %p5344_p2, %p5343_p1 }
 0x5eb   :  { %p5346_p4 = pnand %p5345_p3, %p5339_p0 }
 0x606   :  { %v3214_v7 = vpop.f32.mrb[16].mxu0  ;;  %v3257_v2 = vpop.f32.mrb[32].mxu1 }
 0x607   :  { %v3215_v35 = vadd.f32 %v3214_v7, %v3074_v23  ;;  %v3258_v36 = vadd.f32 %v3257_v2, %v3117_v24  ;;  %v3216_v38 = vpop.f32.mrb[17].mxu0  ;;  %v3259_v39 = vpop.f32.mrb[33].mxu1  ;;  %v5336_v23 = vld [vmem:[%s7534_s9 + $0x20] sm:$0xff]   ;;  %v5337_v24 = vld [vmem:[%s7534_s9 + $0x28] ss:$0 sps:$4 sm:$0x33]  }
 0x608   :  { %v3217_v40 = vpop.f32.mrb[18].mxu0  ;;  %v3260_v18 = vpop.f32.mrb[34].mxu1  ;;  %v4110_v25 = vsel %vm4108_vm13, %v5337_v24, 0  ;;  %v4070_v39 = vld [vmem:[%s7535_s10] sm:$0x1] }
 0x609   :  { %v3218_v41 = vpop.f32.mrb[19].mxu0  ;;  %v3261_v42 = vpop.f32.mrb[35].mxu1 }
 0x62a   :  { %v3423_v43 = vpop.f32.mrb[20].mxu0 }
 0x62b   :  { %v3472_v44 = vadd.f32 %v3423_v43, %v3215_v35  ;;  %v3466_v45 = vpop.f32.mrb[36].mxu1  ;;  %v3425_v46 = vpop.f32.mrb[21].mxu0 }
 0x62c   :  { %v3473_v47 = vadd.f32 %v3466_v45, %v3258_v36  ;;  %v3468_v48 = vpop.f32.mrb[37].mxu1  ;;  %v3426_v49 = vpop.f32.mrb[22].mxu0 }
 0x62d   :  { %v3469_v50 = vpop.f32.mrb[38].mxu1  ;;  %v3427_v51 = vpop.f32.mrb[23].mxu0 }
 0x62e   :  { %v3470_v52 = vpop.f32.mrb[39].mxu1 }
 0x64e   :  { %v3634_v53 = vpop.f32.mrb[24].mxu0 }
 0x64f   :  { %v3683_v54 = vadd.f32 %v3634_v53, %v3472_v44  ;;  %v3677_v55 = vpop.f32.mrb[40].mxu1  ;;  %v3636_v56 = vpop.f32.mrb[25].mxu0 }
 0x650   :  { %v3684_v58 = vadd.f32 %v3677_v55, %v3473_v47  ;;  %v3679_v59 = vpop.f32.mrb[41].mxu1  ;;  %v3637_v15 = vpop.f32.mrb[26].mxu0 }
 0x651   :  { %v3680_v14 = vpop.f32.mrb[42].mxu1  ;;  %v3638_v37 = vpop.f32.mrb[27].mxu0 }
 0x652   :  { %v3681_v62 = vpop.f32.mrb[43].mxu1 }
 0x672   :  { %v3845_v13 = vpop.f32.mrb[28].mxu0 }
 0x673   :  { %v3894_v0 = vadd.f32 %v3845_v13, %v3683_v54  ;;  %v3888_v3 = vpop.f32.mrb[44].mxu1  ;;  %v3847_v4 = vpop.f32.mrb[29].mxu0 }
 0x674   :  { %v3895_v63 = vadd.f32 %v3888_v3, %v3684_v58  ;;  %v3890_v5 = vpop.f32.mrb[45].mxu1  ;;  %v3848_v57 = vpop.f32.mrb[30].mxu0 }
 0x675   :  { %v3897_v6 = vadd.f32 %v3896_v60, %v3894_v0  ;;  %v3891_v8 = vpop.f32.mrb[46].mxu1  ;;  %v3849_v10 = vpop.f32.mrb[31].mxu0 }
 0x676   :  { %v3898_v11 = vadd.f32 %v3896_v60, %v3895_v63  ;;  %v3892_v9 = vpop.f32.mrb[47].mxu1 }
 0x677   :  { %v3899_v17 = vmax.f32 %v3897_v6, 0.0 }
 0x678   :  { %v3900_v12 = vmax.f32 %v3898_v11, 0.0 }
 0x679   :  { %v3916_v16 = vpack.c.bf16 %v3899_v17, %v3899_v17 }
 0x67a   :  { %v3917_v1 = vpack.c.bf16 %v3900_v12, %v3900_v12 }
 0x67b   :  { %4838 = vmatmul.mubr.msk.bf16.vlgmr.msra.gmra.mrb[32].mxu0 %vm3964_vm12, %v3916_v16 }
 0x67c   :  { %4858 = vmatmul.mubr.msk.bf16.vlgmr.msra.gmra.mrb[48].mxu1 %vm3964_vm12, %v3917_v1  ;;  %4862 = vmatpush3.bf16.msra.mxu0 %v5332_v19 }
 0x67d   :  { %4878 = vmatpush3.bf16.msra.mxu1 %v5332_v19  ;;  %4863 = vmatprep.subr.bf16.mxu0 %v5366_v21 }
 0x67e   :  { %4879 = vmatprep.subr.bf16.mxu1 %v5366_v21  ;;  %4873 = vmatprep.mubr.msk.bf16.mxu0 %vm5367_vm11, %v5366_v21 }
 0x67f   :  { %4889 = vmatprep.mubr.msk.bf16.mxu1 %vm5367_vm11, %v5366_v21 }
 0x680   :  { %4864 = vmatpush3.bf16.msra.mxu0 %v5333_v61 }
 0x681   :  { %4880 = vmatpush3.bf16.msra.mxu1 %v5333_v61  ;;  %4865 = vmatprep.subr.bf16.mxu0 %v5366_v21 }
 0x682   :  { %4881 = vmatprep.subr.bf16.mxu1 %v5366_v21 }
 0x684   :  { %4866 = vmatpush3.bf16.msra.mxu0 %v5334_v20 }
 0x685   :  { %4882 = vmatpush3.bf16.msra.mxu1 %v5334_v20  ;;  %4867 = vmatprep.subr.bf16.mxu0 %v5366_v21 }
 0x686   :  { %4883 = vmatprep.subr.bf16.mxu1 %v5366_v21 }
 0x688   :  { %4868 = vmatpush3.bf16.msra.mxu0 %v5335_v22 }
 0x689   :  { %4884 = vmatpush3.bf16.msra.mxu1 %v5335_v22  ;;  %4869 = vmatprep.subr.bf16.mxu0 %v5366_v21 }
 0x68a   :  { %4885 = vmatprep.subr.bf16.mxu1 %v5366_v21 }
 0x68c   :  { %4870 = vmatpush3.bf16.msra.mxu0 %v5336_v23 }
 0x68d   :  { %4886 = vmatpush3.bf16.msra.mxu1 %v5336_v23  ;;  %4871 = vmatprep.subr.bf16.mxu0 %v5366_v21 }
 0x68e   :  { %4887 = vmatprep.subr.bf16.mxu1 %v5366_v21 }
 0x690   :  { %4872 = vmatpush3.bf16.msra.mxu0 %v4110_v25 }
 0x691   :  { %4888 = vmatpush3.bf16.msra.mxu1 %v4110_v25 }
 0x74e   :  { %v4006_v27 = vpop.f32.mrb[32].mxu0 }
 0x74f   :  { %v4007_v29 = vadd.f32 %v4006_v27, %v3918_v26  ;;  %v4049_v30 = vpop.f32.mrb[48].mxu1  ;;  %v4839_v28 = vpop.f32.mrb[33].mxu0 }
 0x750   :  { %v4050_v32 = vadd.f32 %v4049_v30, %v3918_v26  ;;  %v4859_v33 = vpop.f32.mrb[49].mxu1  ;;  %v4009_v34 = vpop.f32.mrb[34].mxu0 }
 0x751   :  { %v4055_v21 = vmax.f32 %v4007_v29, 0.0  ;;  %v4052_v31 = vpop.f32.mrb[50].mxu1  ;;  %v4840_v7 = vpop.f32.mrb[35].mxu0 }
 0x752   :  { %v4056_v2 = vmax.f32 %v4050_v32, 0.0  ;;  %v4860_v35 = vpop.f32.mrb[51].mxu1 }
 0x753   :  { %v4068_v36 = vpack.c.bf16 %v4055_v21, %v4055_v21 }
 0x754   :  { %v4069_v38 = vpack.c.bf16 %v4056_v2, %v4056_v2 }
 0x755   :  { %4874 = vmatmul.mubr.msk.bf16.vlgmr.msra.gmra.mrb[36].mxu0 %vm4104_vm14, %v4068_v36 }
 0x756   :  { %4890 = vmatmul.mubr.msk.bf16.vlgmr.msra.gmra.mrb[52].mxu1 %vm4104_vm14, %v4069_v38 }
 0x828   :  { %v4146_v40 = vpop.f32.mrb[36].mxu0 }
 0x829   :  { %v4147_v18 = vadd.f32 %v4146_v40, %v4070_v39  ;;  %v4189_v41 = vpop.f32.mrb[52].mxu1  ;;  %v4875_v42 = vpop.f32.mrb[37].mxu0 }
 0x82a   :  { %v4190_v43 = vadd.f32 %v4189_v41, %v4070_v39  ;;  %v4891_v44 = vpop.f32.mrb[53].mxu1  ;;  %v4149_v45 = vpop.f32.mrb[38].mxu0 }
 0x82b   :  { %4196 = vst.msk [vmem:[#allocation4] sm:$0x1] %vm4195_vm15, %v4147_v18  ;;  %v4192_v46 = vpop.f32.mrb[54].mxu1  ;;  %v4876_v47 = vpop.f32.mrb[39].mxu0 }
 0x82c   :  { %4197 = vst.msk [vmem:[#allocation4 + $0x1] sm:$0x1] %vm4195_vm15, %v4190_v43  ;;  %v4892_v48 = vpop.f32.mrb[55].mxu1 }
 0x82d   :  { %5349 = shalt.err (!%p5346_p4)
}
 0x82e   :  { %s5350_s12 = scalar_lea.hbm %s7536_s11, 32 }
 0x82f   :  { %p5351_p5 = scmp.ne.s32.totalorder %s7536_s11, %s5350_s12  ;;  %p5354_p6 = scmp.lt.u32.totalorder %s5350_s12, %s7536_s11 }
 0x831   :  { %p5356_p7 = pnand %p5354_p6, %p5351_p5 }
 0x833   :  { %5359 = shalt.err (!%p5356_p7)
}
 0x834   :  { %s5369_s15 = smov 16   ;;  %s5370_s16 = smov 1  }
 0x835   :  { %4209 = dma.vmem_to_hbm [thread:$0]  %s4204_s29, 32, %s7536_s11, [#allocation5], %s5369_s15, %s5369_s15, %s5370_s16  }
 0x836   :  { %5360 = dma.done.wait [#allocation5], 32  }
 0x837   :  { %5361 = vsyncadd [#allocation5], 4294967264 }
 0x838   :  { %4213 = vsyncpa [#allocation5], 1 }

</bundles_post_ra>
